<compile_context>
chip_gen: v7x
topology: tpu7x:2x2x1
jax: 0.10.0
libtpu: 0.0.40
codegen_flags: <defaults>
</compile_context>

<pallas_src>
import jax
import jax.numpy as jnp
from jax import lax
from jax.experimental import pallas as pl
from jax.experimental.pallas import tpu as pltpu

KW = 4          # conv kernel size
PAD = 1         # conv padding
LRELU = 0.2     # LeakyReLU negative slope
BN_EPS = 1e-5   # BatchNorm2d eps


# ----------------------------------------------------------------------------
# Pallas kernels
# ----------------------------------------------------------------------------

def _trunk_kernel(p_ref, w_ref, b_ref, o_ref):
    """One M-tile of: y = LeakyReLU(patches @ W + b).  bf16 in, f32 acc, bf16 out."""
    y = jnp.dot(p_ref[...], w_ref[...], preferred_element_type=jnp.float32)
    y = y + b_ref[...]                      # (1, Cout) broadcast over rows
    y = jnp.maximum(y, LRELU * y)           # LeakyReLU(0.2)
    o_ref[...] = y.astype(o_ref.dtype)


def _branch_bn_lrelu_kernel(p_ref, w_ref, g_ref, b_ref, o_ref):
    """Both branches at once (leading dim B=2):
       y = LeakyReLU(BN_batchstats(patches @ W) * gamma + beta).

    BatchNorm2d training-mode semantics: per (branch, channel) mean and biased
    variance over the N*H*W rows. The full M extent is resident in this block, so
    the statistics are exact (M-tiling would need cross-tile stat accumulation).
    """
    y = jnp.einsum("bmk,bkn->bmn", p_ref[...], w_ref[...],
                   preferred_element_type=jnp.float32)
    mean = jnp.mean(y, axis=1, keepdims=True)                     # (B, 1, C)
    var = jnp.mean(jnp.square(y - mean), axis=1, keepdims=True)   # biased variance
    scale = g_ref[...] * lax.rsqrt(var + BN_EPS)                  # (B, 1, C)
    shift = b_ref[...] - mean * scale
    y = y * scale + shift
    y = jnp.maximum(y, LRELU * y)
    o_ref[...] = y.astype(o_ref.dtype)


def _branch_final_kernel(p_ref, w_ref, b_ref, o_ref):
    """Both branches' final 1-channel conv: y = patches @ W + b (no activation)."""
    y = jnp.einsum("bmk,bkn->bmn", p_ref[...], w_ref[...],
                   preferred_element_type=jnp.float32)
    o_ref[...] = (y + b_ref[...]).astype(o_ref.dtype)


# ----------------------------------------------------------------------------
# Glue: im2col (JAX level, bf16) + pallas_call wrappers
# ----------------------------------------------------------------------------

def _full_spec(shape):
    # `shape`/`rank` are bound per call (fixes the previous late-binding lambda bug).
    rank = len(shape)
    return pl.BlockSpec(shape, lambda i: (0,) * rank)


def _im2col(x, stride):
    """x: (..., H, W, C) -> patches (..., Ho, Wo, KW*KW*C). Tap order (i, j, cin)."""
    *lead, h, w, c = x.shape
    xp = jnp.pad(x, [(0, 0)] * len(lead) + [(PAD, PAD), (PAD, PAD), (0, 0)])
    hp, wp = h + 2 * PAD, w + 2 * PAD
    ho = (hp - KW) // stride + 1
    wo = (wp - KW) // stride + 1
    taps = []
    for i in range(KW):
        for j in range(KW):
            taps.append(xp[..., i:i + stride * ho:stride,
                            j:j + stride * wo:stride, :])
    return jnp.concatenate(taps, axis=-1), (ho, wo)


def trunk_conv(x_nhwc, w, b, *, stride=2, block_m=256):
    """Conv2d(k=4, s=2, p=1, bias=True) + LeakyReLU(0.2), tiled over output rows."""
    n = x_nhwc.shape[0]
    patches, (ho, wo) = _im2col(x_nhwc, stride)
    m = n * ho * wo
    patches = patches.reshape(m, -1).astype(jnp.bfloat16)
    k = patches.shape[1]
    cout = w.shape[-1]
    w2 = w.reshape(-1, cout).astype(jnp.bfloat16)
    b2 = b.reshape(1, cout).astype(jnp.float32)

    bm = block_m if (m % block_m == 0) else m      # fall back to a single block
    y = pl.pallas_call(
        _trunk_kernel,
        grid=(m // bm,),
        in_specs=[
            pl.BlockSpec((bm, k), lambda i: (i, 0)),
            pl.BlockSpec((k, cout), lambda i: (0, 0)),
            pl.BlockSpec((1, cout), lambda i: (0, 0)),
        ],
        out_specs=pl.BlockSpec((bm, cout), lambda i: (i, 0)),
        out_shape=jax.ShapeDtypeStruct((m, cout), jnp.bfloat16),
        compiler_params=pltpu.CompilerParams(dimension_semantics=("parallel",)),
    )(patches, w2, b2)
    return y.reshape(n, ho, wo, cout)


def branch_conv_bn_lrelu(h, w, gamma, beta, stride):
    """Conv(k=4, p=1, bias=False) + BatchNorm(batch stats) + LeakyReLU for BOTH
    branches in one call.  h: (2, N, H, W, Cin), w: (2, 4, 4, Cin, Cout)."""
    nb, n = h.shape[0], h.shape[1]
    patches, (ho, wo) = _im2col(h, stride)
    m = n * ho * wo
    patches = patches.reshape(nb, m, -1).astype(jnp.bfloat16)
    k = patches.shape[-1]
    cout = w.shape[-1]
    w2 = w.reshape(nb, -1, cout).astype(jnp.bfloat16)
    g2 = gamma.reshape(nb, 1, cout).astype(jnp.float32)
    b2 = beta.reshape(nb, 1, cout).astype(jnp.float32)
    y = pl.pallas_call(
        _branch_bn_lrelu_kernel,
        grid=(1,),
        in_specs=[_full_spec((nb, m, k)), _full_spec((nb, k, cout)),
                  _full_spec((nb, 1, cout)), _full_spec((nb, 1, cout))],
        out_specs=_full_spec((nb, m, cout)),
        out_shape=jax.ShapeDtypeStruct((nb, m, cout), jnp.bfloat16),
    )(patches, w2, g2, b2)
    return y.reshape(nb, n, ho, wo, cout)


def branch_final_conv(h, w, bias):
    """Final Conv(k=4, s=1, p=1, Cout=1, bias=True) for BOTH branches in one call."""
    nb, n = h.shape[0], h.shape[1]
    patches, (ho, wo) = _im2col(h, 1)
    m = n * ho * wo
    patches = patches.reshape(nb, m, -1).astype(jnp.bfloat16)
    k = patches.shape[-1]
    cout = w.shape[-1]
    w2 = w.reshape(nb, -1, cout).astype(jnp.bfloat16)
    b2 = bias.reshape(nb, 1, cout).astype(jnp.float32)
    y = pl.pallas_call(
        _branch_final_kernel,
        grid=(1,),
        in_specs=[_full_spec((nb, m, k)), _full_spec((nb, k, cout)),
                  _full_spec((nb, 1, cout))],
        out_specs=_full_spec((nb, m, cout)),
        out_shape=jax.ShapeDtypeStruct((nb, m, cout), jnp.float32),
    )(patches, w2, b2)
    return y.reshape(nb, n, ho, wo, cout)


# ----------------------------------------------------------------------------
# Model: parameter init + forward
# ----------------------------------------------------------------------------

def init_params(key, input_nc, ndf, n_layers_b1=3, n_layers_b2=3):
    """Deterministic synthetic init. Conv weights stored as (KH, KW, Cin, Cout);
    branch weights stacked over a leading branch dim of size 2 (ad, critic)."""
    assert n_layers_b1 == n_layers_b2, (
        "batched branch fusion assumes identical branch depths (the defaults)")
    keys = iter(jax.random.split(key, 64))

    def randn(shape):
        return 0.02 * jax.random.normal(next(keys), shape, jnp.float32)

    params = {
        "trunk_w": randn((KW, KW, input_nc, ndf)),
        "trunk_b": randn((ndf,)),
    }
    # Branch layer schedule. Note: the reference uses n_layers_b1 for the last
    # layer's channel count of BOTH branches, so with equal depths the two
    # branches are shape-identical and can be batched.
    layers = []
    nf_mult_prev, nf_mult = 1, 1
    for n in range(1, n_layers_b1):
        nf_mult_prev, nf_mult = nf_mult, min(2 ** n, 8)
        layers.append((ndf * nf_mult_prev, ndf * nf_mult, 2))
    nf_mult_prev = nf_mult
    nf_mult = min(2 ** n_layers_b1, 8)
    layers.append((ndf * nf_mult_prev, ndf * nf_mult, 1))

    for idx, (cin, cout, _) in enumerate(layers):
        params[f"branch_w{idx}"] = randn((2, KW, KW, cin, cout))
        params[f"branch_g{idx}"] = jnp.ones((2, cout), jnp.float32)    # BN gamma
        params[f"branch_b{idx}"] = jnp.zeros((2, cout), jnp.float32)   # BN beta
    params["final_w"] = randn((2, KW, KW, ndf * nf_mult, 1))
    params["final_b"] = randn((2, 1))
    return params, layers


def multi_branch_discriminator(params, layers, x_nchw):
    """Forward pass. Returns (ad_out, critic_out), each NCHW like PyTorch."""
    x = jnp.transpose(x_nchw, (0, 2, 3, 1)).astype(jnp.float32)   # NCHW -> NHWC

    # trunk: Conv(input_nc, ndf, s2, bias=True) + LeakyReLU
    t = trunk_conv(x, params["trunk_w"], params["trunk_b"])

    # both branches consume the same trunk output -> broadcast a branch dim of 2
    h = jnp.broadcast_to(t[None], (2,) + t.shape)
    for idx, (_, _, stride) in enumerate(layers):
        h = branch_conv_bn_lrelu(h, params[f"branch_w{idx}"],
                                 params[f"branch_g{idx}"],
                                 params[f"branch_b{idx}"], stride)

    out = branch_final_conv(h, params["final_w"], params["final_b"])  # (2,N,Ho,Wo,1)
    out = jnp.transpose(out, (0, 1, 4, 2, 3))    # -> (2, N, 1, Ho, Wo), NCHW
    # use_sigmoid=False in the reference -> no sigmoid
    return out[0], out[1]


# ----------------------------------------------------------------------------
if __name__ == "__main__":
    key = jax.random.PRNGKey(0)
    k_x, k_p = jax.random.split(key)

    # Small shapes: batch=2, input_nc=4, spatial=32, ndf=16.
    # (16x16 spatial would shrink to 0x0 through the 5 convs of this architecture.)
    N, C, H, W = 2, 4, 32, 32
    ndf = 16
    x = jax.random.normal(k_x, (N, C, H, W), jnp.float32)

    params, layers = init_params(k_p, input_nc=C, ndf=ndf)

    fwd = jax.jit(lambda p, inp: multi_branch_discriminator(p, layers, inp))
    ad_out, critic_out = fwd(params, x)
    jax.block_until_ready(ad_out)
    jax.block_until_ready(critic_out)

    # 32 -> 16 (trunk s2) -> 8 -> 4 -> 3 (s1) -> 2 (final s1), 1 channel
    assert ad_out.shape == (N, 1, 2, 2), ad_out.shape
    assert critic_out.shape == (N, 1, 2, 2), critic_out.shape
    assert bool(jnp.all(jnp.isfinite(ad_out)))
    assert bool(jnp.all(jnp.isfinite(critic_out)))

    print("KERNEL_OK")
</pallas_src>

<mosaic_0001>
module attributes {stable_mosaic.version = 11 : i64} {
  func.func @_trunk_kernel(%arg0: i32, %arg1: memref<256x64xbf16, #tpu.memory_space<vmem>>, %arg2: memref<64x16xbf16, #tpu.memory_space<vmem>>, %arg3: memref<1x16xf32, #tpu.memory_space<vmem>>, %arg4: memref<256x16xbf16, #tpu.memory_space<vmem>>) attributes {dimension_semantics = [#tpu.dimension_semantics<parallel>], iteration_bounds = array<i64: 2>, scalar_prefetch = 0 : i64, scratch_operands = 0 : i64, tpu.core_type = #tpu.core_type<tc>, window_params = [{transform_indices = @transform_0, window_bounds = array<i64: 256, 64>}, {pipeline_mode = #tpu.pipeline_mode<synchronous>, transform_indices = @transform_1, window_bounds = array<i64: 64, 16>}, {pipeline_mode = #tpu.pipeline_mode<synchronous>, transform_indices = @transform_2, window_bounds = array<i64: 1, 16>}, {transform_indices = @transform_3, window_bounds = array<i64: 256, 16>}]} {
    %c0 = arith.constant 0 : index
    %c0_0 = arith.constant 0 : index
    %0 = vector.load %arg1[%c0, %c0_0] : memref<256x64xbf16, #tpu.memory_space<vmem>>, vector<256x64xbf16>
    %c0_1 = arith.constant 0 : index
    %c0_2 = arith.constant 0 : index
    %1 = vector.load %arg2[%c0_1, %c0_2] : memref<64x16xbf16, #tpu.memory_space<vmem>>, vector<64x16xbf16>
    %cst = arith.constant dense<0.000000e+00> : vector<256x16xf32>
    %2 = tpu.matmul %0, %1, %cst {dimension_numbers = #tpu.dot_dimension_numbers<[1], [0], [0], [1], [0, 0, 1, 1], [], []>} : vector<256x64xbf16>, vector<64x16xbf16>, vector<256x16xf32> -> vector<256x16xf32>
    %c0_3 = arith.constant 0 : index
    %c0_4 = arith.constant 0 : index
    %3 = vector.load %arg3[%c0_3, %c0_4] : memref<1x16xf32, #tpu.memory_space<vmem>>, vector<1x16xf32>
    %4 = vector.broadcast %3 : vector<1x16xf32> to vector<256x16xf32>
    %5 = arith.addf %2, %4 : vector<256x16xf32>
    %cst_5 = arith.constant 2.000000e-01 : f32
    %6 = vector.broadcast %cst_5 : f32 to vector<256x16xf32>
    %7 = arith.mulf %6, %5 : vector<256x16xf32>
    %8 = arith.maximumf %5, %7 : vector<256x16xf32>
    %9 = arith.truncf %8 : vector<256x16xf32> to vector<256x16xbf16>
    %c0_6 = arith.constant 0 : index
    %c0_7 = arith.constant 0 : index
    %10 = vector.load %arg4[%c0_6, %c0_7] : memref<256x16xbf16, #tpu.memory_space<vmem>>, vector<256x16xbf16>
    tpu.vector_store %arg4[%c0_6, %c0_7], %9 {strides = array<i32>} : memref<256x16xbf16, #tpu.memory_space<vmem>>, vector<256x16xbf16>,
    return
  }
  func.func @transform_0(%arg0: i32) -> (i32, i32) {
    %c0_i32 = arith.constant 0 : i32
    %c0_i32_0 = arith.constant 0 : i32
    return %arg0, %c0_i32 : i32, i32
  }
  func.func @transform_1(%arg0: i32) -> (i32, i32) {
    %c0_i32 = arith.constant 0 : i32
    %c0_i32_0 = arith.constant 0 : i32
    %c0_i32_1 = arith.constant 0 : i32
    return %c0_i32, %c0_i32_0 : i32, i32
  }
  func.func @transform_2(%arg0: i32) -> (i32, i32) {
    %c0_i32 = arith.constant 0 : i32
    %c0_i32_0 = arith.constant 0 : i32
    %c0_i32_1 = arith.constant 0 : i32
    return %c0_i32, %c0_i32_0 : i32, i32
  }
  func.func @transform_3(%arg0: i32) -> (i32, i32) {
    %c0_i32 = arith.constant 0 : i32
    %c0_i32_0 = arith.constant 0 : i32
    return %arg0, %c0_i32 : i32, i32
  }
}

module attributes {stable_mosaic.version = 11 : i64} {
  func.func @_branch_bn_lrelu_kernel(%arg0: i32, %arg1: memref<2x128x256xbf16, #tpu.memory_space<vmem>>, %arg2: memref<2x256x32xbf16, #tpu.memory_space<vmem>>, %arg3: memref<2x1x32xf32, #tpu.memory_space<vmem>>, %arg4: memref<2x1x32xf32, #tpu.memory_space<vmem>>, %arg5: memref<2x128x32xbf16, #tpu.memory_space<vmem>>) attributes {dimension_semantics = [#tpu.dimension_semantics<arbitrary>], iteration_bounds = array<i64: 1>, scalar_prefetch = 0 : i64, scratch_operands = 0 : i64, tpu.core_type = #tpu.core_type<tc>, window_params = [{pipeline_mode = #tpu.pipeline_mode<synchronous>, transform_indices = @transform_0, window_bounds = array<i64: 2, 128, 256>}, {pipeline_mode = #tpu.pipeline_mode<synchronous>, transform_indices = @transform_1, window_bounds = array<i64: 2, 256, 32>}, {pipeline_mode = #tpu.pipeline_mode<synchronous>, transform_indices = @transform_2, window_bounds = array<i64: 2, 1, 32>}, {pipeline_mode = #tpu.pipeline_mode<synchronous>, transform_indices = @transform_3, window_bounds = array<i64: 2, 1, 32>}, {pipeline_mode = #tpu.pipeline_mode<synchronous>, transform_indices = @transform_4, window_bounds = array<i64: 2, 128, 32>}]} {
    %c0 = arith.constant 0 : index
    %c0_0 = arith.constant 0 : index
    %c0_1 = arith.constant 0 : index
    %0 = vector.load %arg1[%c0, %c0_0, %c0_1] : memref<2x128x256xbf16, #tpu.memory_space<vmem>>, vector<2x128x256xbf16>
    %c0_2 = arith.constant 0 : index
    %c0_3 = arith.constant 0 : index
    %c0_4 = arith.constant 0 : index
    %1 = vector.load %arg2[%c0_2, %c0_3, %c0_4] : memref<2x256x32xbf16, #tpu.memory_space<vmem>>, vector<2x256x32xbf16>
    "tpu.trace_start"() <{level = 10 : i32, message = "bmk,bkn->bmn"}> : () -> ()
    %cst = arith.constant dense<0.000000e+00> : vector<2x128x32xf32>
    %2 = tpu.matmul %0, %1, %cst {dimension_numbers = #tpu.dot_dimension_numbers<[2], [1], [1], [2], [0, 0, 0, 1, 1, 2], [0], [0]>} : vector<2x128x256xbf16>, vector<2x256x32xbf16>, vector<2x128x32xf32> -> vector<2x128x32xf32>
    "tpu.trace_stop"() : () -> ()
    %cst_5 = arith.constant dense<0.000000e+00> : vector<2x32xf32>
    %3 = vector.multi_reduction <add>, %2, %cst_5 [1] : vector<2x128x32xf32> to vector<2x32xf32>
    %4 = vector.shape_cast %3 : vector<2x32xf32> to vector<2x1x32xf32>
    %cst_6 = arith.constant 1.280000e+02 : f32
    %5 = vector.broadcast %cst_6 : f32 to vector<2x1x32xf32>
    %6 = arith.divf %4, %5 : vector<2x1x32xf32>
    %7 = vector.broadcast %6 : vector<2x1x32xf32> to vector<2x128x32xf32>
    %8 = arith.subf %2, %7 : vector<2x128x32xf32>
    %9 = arith.mulf %8, %8 : vector<2x128x32xf32>
    %cst_7 = arith.constant dense<0.000000e+00> : vector<2x32xf32>
    %10 = vector.multi_reduction <add>, %9, %cst_7 [1] : vector<2x128x32xf32> to vector<2x32xf32>
    %11 = vector.shape_cast %10 : vector<2x32xf32> to vector<2x1x32xf32>
    %cst_8 = arith.constant 1.280000e+02 : f32
    %12 = vector.broadcast %cst_8 : f32 to vector<2x1x32xf32>
    %13 = arith.divf %11, %12 : vector<2x1x32xf32>
    %c0_9 = arith.constant 0 : index
    %c0_10 = arith.constant 0 : index
    %c0_11 = arith.constant 0 : index
    %14 = vector.load %arg3[%c0_9, %c0_10, %c0_11] : memref<2x1x32xf32, #tpu.memory_space<vmem>>, vector<2x1x32xf32>
    %cst_12 = arith.constant 9.99999974E-6 : f32
    %15 = vector.broadcast %cst_12 : f32 to vector<2x1x32xf32>
    %16 = arith.addf %13, %15 : vector<2x1x32xf32>
    %17 = math.rsqrt %16 : vector<2x1x32xf32>
    %18 = arith.mulf %14, %17 : vector<2x1x32xf32>
    %c0_13 = arith.constant 0 : index
    %c0_14 = arith.constant 0 : index
    %c0_15 = arith.constant 0 : index
    %19 = vector.load %arg4[%c0_13, %c0_14, %c0_15] : memref<2x1x32xf32, #tpu.memory_space<vmem>>, vector<2x1x32xf32>
    %20 = arith.mulf %6, %18 : vector<2x1x32xf32>
    %21 = arith.subf %19, %20 : vector<2x1x32xf32>
    %22 = vector.broadcast %18 : vector<2x1x32xf32> to vector<2x128x32xf32>
    %23 = arith.mulf %2, %22 : vector<2x128x32xf32>
    %24 = vector.broadcast %21 : vector<2x1x32xf32> to vector<2x128x32xf32>
    %25 = arith.addf %23, %24 : vector<2x128x32xf32>
    %cst_16 = arith.constant 2.000000e-01 : f32
    %26 = vector.broadcast %cst_16 : f32 to vector<2x128x32xf32>
    %27 = arith.mulf %26, %25 : vector<2x128x32xf32>
    %28 = arith.maximumf %25, %27 : vector<2x128x32xf32>
    %29 = arith.truncf %28 : vector<2x128x32xf32> to vector<2x128x32xbf16>
    %c0_17 = arith.constant 0 : index
    %c0_18 = arith.constant 0 : index
    %c0_19 = arith.constant 0 : index
    %30 = vector.load %arg5[%c0_17, %c0_18, %c0_19] : memref<2x128x32xbf16, #tpu.memory_space<vmem>>, vector<2x128x32xbf16>
    tpu.vector_store %arg5[%c0_17, %c0_18, %c0_19], %29 {strides = array<i32>} : memref<2x128x32xbf16, #tpu.memory_space<vmem>>, vector<2x128x32xbf16>,
    return
  }
  func.func @transform_0(%arg0: i32) -> (i32, i32, i32) {
    %c0_i32 = arith.constant 0 : i32
    %c0_i32_0 = arith.constant 0 : i32
    %c0_i32_1 = arith.constant 0 : i32
    %c0_i32_2 = arith.constant 0 : i32
    return %c0_i32, %c0_i32_0, %c0_i32_1 : i32, i32, i32
  }
  func.func @transform_1(%arg0: i32) -> (i32, i32, i32) {
    %c0_i32 = arith.constant 0 : i32
    %c0_i32_0 = arith.constant 0 : i32
    %c0_i32_1 = arith.constant 0 : i32
    %c0_i32_2 = arith.constant 0 : i32
    return %c0_i32, %c0_i32_0, %c0_i32_1 : i32, i32, i32
  }
  func.func @transform_2(%arg0: i32) -> (i32, i32, i32) {
    %c0_i32 = arith.constant 0 : i32
    %c0_i32_0 = arith.constant 0 : i32
    %c0_i32_1 = arith.constant 0 : i32
    %c0_i32_2 = arith.constant 0 : i32
    return %c0_i32, %c0_i32_0, %c0_i32_1 : i32, i32, i32
  }
  func.func @transform_3(%arg0: i32) -> (i32, i32, i32) {
    %c0_i32 = arith.constant 0 : i32
    %c0_i32_0 = arith.constant 0 : i32
    %c0_i32_1 = arith.constant 0 : i32
    %c0_i32_2 = arith.constant 0 : i32
    return %c0_i32, %c0_i32_0, %c0_i32_1 : i32, i32, i32
  }
  func.func @transform_4(%arg0: i32) -> (i32, i32, i32) {
    %c0_i32 = arith.constant 0 : i32
    %c0_i32_0 = arith.constant 0 : i32
    %c0_i32_1 = arith.constant 0 : i32
    %c0_i32_2 = arith.constant 0 : i32
    return %c0_i32, %c0_i32_0, %c0_i32_1 : i32, i32, i32
  }
}

module attributes {stable_mosaic.version = 11 : i64} {
  func.func @_branch_bn_lrelu_kernel(%arg0: i32, %arg1: memref<2x32x512xbf16, #tpu.memory_space<vmem>>, %arg2: memref<2x512x64xbf16, #tpu.memory_space<vmem>>, %arg3: memref<2x1x64xf32, #tpu.memory_space<vmem>>, %arg4: memref<2x1x64xf32, #tpu.memory_space<vmem>>, %arg5: memref<2x32x64xbf16, #tpu.memory_space<vmem>>) attributes {dimension_semantics = [#tpu.dimension_semantics<arbitrary>], iteration_bounds = array<i64: 1>, scalar_prefetch = 0 : i64, scratch_operands = 0 : i64, tpu.core_type = #tpu.core_type<tc>, window_params = [{pipeline_mode = #tpu.pipeline_mode<synchronous>, transform_indices = @transform_0, window_bounds = array<i64: 2, 32, 512>}, {pipeline_mode = #tpu.pipeline_mode<synchronous>, transform_indices = @transform_1, window_bounds = array<i64: 2, 512, 64>}, {pipeline_mode = #tpu.pipeline_mode<synchronous>, transform_indices = @transform_2, window_bounds = array<i64: 2, 1, 64>}, {pipeline_mode = #tpu.pipeline_mode<synchronous>, transform_indices = @transform_3, window_bounds = array<i64: 2, 1, 64>}, {pipeline_mode = #tpu.pipeline_mode<synchronous>, transform_indices = @transform_4, window_bounds = array<i64: 2, 32, 64>}]} {
    %c0 = arith.constant 0 : index
    %c0_0 = arith.constant 0 : index
    %c0_1 = arith.constant 0 : index
    %0 = vector.load %arg1[%c0, %c0_0, %c0_1] : memref<2x32x512xbf16, #tpu.memory_space<vmem>>, vector<2x32x512xbf16>
    %c0_2 = arith.constant 0 : index
    %c0_3 = arith.constant 0 : index
    %c0_4 = arith.constant 0 : index
    %1 = vector.load %arg2[%c0_2, %c0_3, %c0_4] : memref<2x512x64xbf16, #tpu.memory_space<vmem>>, vector<2x512x64xbf16>
    "tpu.trace_start"() <{level = 10 : i32, message = "bmk,bkn->bmn"}> : () -> ()
    %cst = arith.constant dense<0.000000e+00> : vector<2x32x64xf32>
    %2 = tpu.matmul %0, %1, %cst {dimension_numbers = #tpu.dot_dimension_numbers<[2], [1], [1], [2], [0, 0, 0, 1, 1, 2], [0], [0]>} : vector<2x32x512xbf16>, vector<2x512x64xbf16>, vector<2x32x64xf32> -> vector<2x32x64xf32>
    "tpu.trace_stop"() : () -> ()
    %cst_5 = arith.constant dense<0.000000e+00> : vector<2x64xf32>
    %3 = vector.multi_reduction <add>, %2, %cst_5 [1] : vector<2x32x64xf32> to vector<2x64xf32>
    %4 = vector.shape_cast %3 : vector<2x64xf32> to vector<2x1x64xf32>
    %cst_6 = arith.constant 3.200000e+01 : f32
    %5 = vector.broadcast %cst_6 : f32 to vector<2x1x64xf32>
    %6 = arith.divf %4, %5 : vector<2x1x64xf32>
    %7 = vector.broadcast %6 : vector<2x1x64xf32> to vector<2x32x64xf32>
    %8 = arith.subf %2, %7 : vector<2x32x64xf32>
    %9 = arith.mulf %8, %8 : vector<2x32x64xf32>
    %cst_7 = arith.constant dense<0.000000e+00> : vector<2x64xf32>
    %10 = vector.multi_reduction <add>, %9, %cst_7 [1] : vector<2x32x64xf32> to vector<2x64xf32>
    %11 = vector.shape_cast %10 : vector<2x64xf32> to vector<2x1x64xf32>
    %cst_8 = arith.constant 3.200000e+01 : f32
    %12 = vector.broadcast %cst_8 : f32 to vector<2x1x64xf32>
    %13 = arith.divf %11, %12 : vector<2x1x64xf32>
    %c0_9 = arith.constant 0 : index
    %c0_10 = arith.constant 0 : index
    %c0_11 = arith.constant 0 : index
    %14 = vector.load %arg3[%c0_9, %c0_10, %c0_11] : memref<2x1x64xf32, #tpu.memory_space<vmem>>, vector<2x1x64xf32>
    %cst_12 = arith.constant 9.99999974E-6 : f32
    %15 = vector.broadcast %cst_12 : f32 to vector<2x1x64xf32>
    %16 = arith.addf %13, %15 : vector<2x1x64xf32>
    %17 = math.rsqrt %16 : vector<2x1x64xf32>
    %18 = arith.mulf %14, %17 : vector<2x1x64xf32>
    %c0_13 = arith.constant 0 : index
    %c0_14 = arith.constant 0 : index
    %c0_15 = arith.constant 0 : index
    %19 = vector.load %arg4[%c0_13, %c0_14, %c0_15] : memref<2x1x64xf32, #tpu.memory_space<vmem>>, vector<2x1x64xf32>
    %20 = arith.mulf %6, %18 : vector<2x1x64xf32>
    %21 = arith.subf %19, %20 : vector<2x1x64xf32>
    %22 = vector.broadcast %18 : vector<2x1x64xf32> to vector<2x32x64xf32>
    %23 = arith.mulf %2, %22 : vector<2x32x64xf32>
    %24 = vector.broadcast %21 : vector<2x1x64xf32> to vector<2x32x64xf32>
    %25 = arith.addf %23, %24 : vector<2x32x64xf32>
    %cst_16 = arith.constant 2.000000e-01 : f32
    %26 = vector.broadcast %cst_16 : f32 to vector<2x32x64xf32>
    %27 = arith.mulf %26, %25 : vector<2x32x64xf32>
    %28 = arith.maximumf %25, %27 : vector<2x32x64xf32>
    %29 = arith.truncf %28 : vector<2x32x64xf32> to vector<2x32x64xbf16>
    %c0_17 = arith.constant 0 : index
    %c0_18 = arith.constant 0 : index
    %c0_19 = arith.constant 0 : index
    %30 = vector.load %arg5[%c0_17, %c0_18, %c0_19] : memref<2x32x64xbf16, #tpu.memory_space<vmem>>, vector<2x32x64xbf16>
    tpu.vector_store %arg5[%c0_17, %c0_18, %c0_19], %29 {strides = array<i32>} : memref<2x32x64xbf16, #tpu.memory_space<vmem>>, vector<2x32x64xbf16>,
    return
  }
  func.func @transform_0(%arg0: i32) -> (i32, i32, i32) {
    %c0_i32 = arith.constant 0 : i32
    %c0_i32_0 = arith.constant 0 : i32
    %c0_i32_1 = arith.constant 0 : i32
    %c0_i32_2 = arith.constant 0 : i32
    return %c0_i32, %c0_i32_0, %c0_i32_1 : i32, i32, i32
  }
  func.func @transform_1(%arg0: i32) -> (i32, i32, i32) {
    %c0_i32 = arith.constant 0 : i32
    %c0_i32_0 = arith.constant 0 : i32
    %c0_i32_1 = arith.constant 0 : i32
    %c0_i32_2 = arith.constant 0 : i32
    return %c0_i32, %c0_i32_0, %c0_i32_1 : i32, i32, i32
  }
  func.func @transform_2(%arg0: i32) -> (i32, i32, i32) {
    %c0_i32 = arith.constant 0 : i32
    %c0_i32_0 = arith.constant 0 : i32
    %c0_i32_1 = arith.constant 0 : i32
    %c0_i32_2 = arith.constant 0 : i32
    return %c0_i32, %c0_i32_0, %c0_i32_1 : i32, i32, i32
  }
  func.func @transform_3(%arg0: i32) -> (i32, i32, i32) {
    %c0_i32 = arith.constant 0 : i32
    %c0_i32_0 = arith.constant 0 : i32
    %c0_i32_1 = arith.constant 0 : i32
    %c0_i32_2 = arith.constant 0 : i32
    return %c0_i32, %c0_i32_0, %c0_i32_1 : i32, i32, i32
  }
  func.func @transform_4(%arg0: i32) -> (i32, i32, i32) {
    %c0_i32 = arith.constant 0 : i32
    %c0_i32_0 = arith.constant 0 : i32
    %c0_i32_1 = arith.constant 0 : i32
    %c0_i32_2 = arith.constant 0 : i32
    return %c0_i32, %c0_i32_0, %c0_i32_1 : i32, i32, i32
  }
}

module attributes {stable_mosaic.version = 11 : i64} {
  func.func @_branch_bn_lrelu_kernel(%arg0: i32, %arg1: memref<2x18x1024xbf16, #tpu.memory_space<vmem>>, %arg2: memref<2x1024x128xbf16, #tpu.memory_space<vmem>>, %arg3: memref<2x1x128xf32, #tpu.memory_space<vmem>>, %arg4: memref<2x1x128xf32, #tpu.memory_space<vmem>>, %arg5: memref<2x18x128xbf16, #tpu.memory_space<vmem>>) attributes {dimension_semantics = [#tpu.dimension_semantics<arbitrary>], iteration_bounds = array<i64: 1>, scalar_prefetch = 0 : i64, scratch_operands = 0 : i64, tpu.core_type = #tpu.core_type<tc>, window_params = [{pipeline_mode = #tpu.pipeline_mode<synchronous>, transform_indices = @transform_0, window_bounds = array<i64: 2, 18, 1024>}, {pipeline_mode = #tpu.pipeline_mode<synchronous>, transform_indices = @transform_1, window_bounds = array<i64: 2, 1024, 128>}, {pipeline_mode = #tpu.pipeline_mode<synchronous>, transform_indices = @transform_2, window_bounds = array<i64: 2, 1, 128>}, {pipeline_mode = #tpu.pipeline_mode<synchronous>, transform_indices = @transform_3, window_bounds = array<i64: 2, 1, 128>}, {pipeline_mode = #tpu.pipeline_mode<synchronous>, transform_indices = @transform_4, window_bounds = array<i64: 2, 18, 128>}]} {
    %c0 = arith.constant 0 : index
    %c0_0 = arith.constant 0 : index
    %c0_1 = arith.constant 0 : index
    %0 = vector.load %arg1[%c0, %c0_0, %c0_1] : memref<2x18x1024xbf16, #tpu.memory_space<vmem>>, vector<2x18x1024xbf16>
    %c0_2 = arith.constant 0 : index
    %c0_3 = arith.constant 0 : index
    %c0_4 = arith.constant 0 : index
    %1 = vector.load %arg2[%c0_2, %c0_3, %c0_4] : memref<2x1024x128xbf16, #tpu.memory_space<vmem>>, vector<2x1024x128xbf16>
    "tpu.trace_start"() <{level = 10 : i32, message = "bmk,bkn->bmn"}> : () -> ()
    %cst = arith.constant dense<0.000000e+00> : vector<2x18x128xf32>
    %2 = tpu.matmul %0, %1, %cst {dimension_numbers = #tpu.dot_dimension_numbers<[2], [1], [1], [2], [0, 0, 0, 1, 1, 2], [0], [0]>} : vector<2x18x1024xbf16>, vector<2x1024x128xbf16>, vector<2x18x128xf32> -> vector<2x18x128xf32>
    "tpu.trace_stop"() : () -> ()
    %cst_5 = arith.constant dense<0.000000e+00> : vector<2x128xf32>
    %3 = vector.multi_reduction <add>, %2, %cst_5 [1] : vector<2x18x128xf32> to vector<2x128xf32>
    %4 = vector.shape_cast %3 : vector<2x128xf32> to vector<2x1x128xf32>
    %cst_6 = arith.constant 1.800000e+01 : f32
    %5 = vector.broadcast %cst_6 : f32 to vector<2x1x128xf32>
    %6 = arith.divf %4, %5 : vector<2x1x128xf32>
    %7 = vector.broadcast %6 : vector<2x1x128xf32> to vector<2x18x128xf32>
    %8 = arith.subf %2, %7 : vector<2x18x128xf32>
    %9 = arith.mulf %8, %8 : vector<2x18x128xf32>
    %cst_7 = arith.constant dense<0.000000e+00> : vector<2x128xf32>
    %10 = vector.multi_reduction <add>, %9, %cst_7 [1] : vector<2x18x128xf32> to vector<2x128xf32>
    %11 = vector.shape_cast %10 : vector<2x128xf32> to vector<2x1x128xf32>
    %cst_8 = arith.constant 1.800000e+01 : f32
    %12 = vector.broadcast %cst_8 : f32 to vector<2x1x128xf32>
    %13 = arith.divf %11, %12 : vector<2x1x128xf32>
    %c0_9 = arith.constant 0 : index
    %c0_10 = arith.constant 0 : index
    %c0_11 = arith.constant 0 : index
    %14 = vector.load %arg3[%c0_9, %c0_10, %c0_11] : memref<2x1x128xf32, #tpu.memory_space<vmem>>, vector<2x1x128xf32>
    %cst_12 = arith.constant 9.99999974E-6 : f32
    %15 = vector.broadcast %cst_12 : f32 to vector<2x1x128xf32>
    %16 = arith.addf %13, %15 : vector<2x1x128xf32>
    %17 = math.rsqrt %16 : vector<2x1x128xf32>
    %18 = arith.mulf %14, %17 : vector<2x1x128xf32>
    %c0_13 = arith.constant 0 : index
    %c0_14 = arith.constant 0 : index
    %c0_15 = arith.constant 0 : index
    %19 = vector.load %arg4[%c0_13, %c0_14, %c0_15] : memref<2x1x128xf32, #tpu.memory_space<vmem>>, vector<2x1x128xf32>
    %20 = arith.mulf %6, %18 : vector<2x1x128xf32>
    %21 = arith.subf %19, %20 : vector<2x1x128xf32>
    %22 = vector.broadcast %18 : vector<2x1x128xf32> to vector<2x18x128xf32>
    %23 = arith.mulf %2, %22 : vector<2x18x128xf32>
    %24 = vector.broadcast %21 : vector<2x1x128xf32> to vector<2x18x128xf32>
    %25 = arith.addf %23, %24 : vector<2x18x128xf32>
    %cst_16 = arith.constant 2.000000e-01 : f32
    %26 = vector.broadcast %cst_16 : f32 to vector<2x18x128xf32>
    %27 = arith.mulf %26, %25 : vector<2x18x128xf32>
    %28 = arith.maximumf %25, %27 : vector<2x18x128xf32>
    %29 = arith.truncf %28 : vector<2x18x128xf32> to vector<2x18x128xbf16>
    %c0_17 = arith.constant 0 : index
    %c0_18 = arith.constant 0 : index
    %c0_19 = arith.constant 0 : index
    %30 = vector.load %arg5[%c0_17, %c0_18, %c0_19] : memref<2x18x128xbf16, #tpu.memory_space<vmem>>, vector<2x18x128xbf16>
    tpu.vector_store %arg5[%c0_17, %c0_18, %c0_19], %29 {strides = array<i32>} : memref<2x18x128xbf16, #tpu.memory_space<vmem>>, vector<2x18x128xbf16>,
    return
  }
  func.func @transform_0(%arg0: i32) -> (i32, i32, i32) {
    %c0_i32 = arith.constant 0 : i32
    %c0_i32_0 = arith.constant 0 : i32
    %c0_i32_1 = arith.constant 0 : i32
    %c0_i32_2 = arith.constant 0 : i32
    return %c0_i32, %c0_i32_0, %c0_i32_1 : i32, i32, i32
  }
  func.func @transform_1(%arg0: i32) -> (i32, i32, i32) {
    %c0_i32 = arith.constant 0 : i32
    %c0_i32_0 = arith.constant 0 : i32
    %c0_i32_1 = arith.constant 0 : i32
    %c0_i32_2 = arith.constant 0 : i32
    return %c0_i32, %c0_i32_0, %c0_i32_1 : i32, i32, i32
  }
  func.func @transform_2(%arg0: i32) -> (i32, i32, i32) {
    %c0_i32 = arith.constant 0 : i32
    %c0_i32_0 = arith.constant 0 : i32
    %c0_i32_1 = arith.constant 0 : i32
    %c0_i32_2 = arith.constant 0 : i32
    return %c0_i32, %c0_i32_0, %c0_i32_1 : i32, i32, i32
  }
  func.func @transform_3(%arg0: i32) -> (i32, i32, i32) {
    %c0_i32 = arith.constant 0 : i32
    %c0_i32_0 = arith.constant 0 : i32
    %c0_i32_1 = arith.constant 0 : i32
    %c0_i32_2 = arith.constant 0 : i32
    return %c0_i32, %c0_i32_0, %c0_i32_1 : i32, i32, i32
  }
  func.func @transform_4(%arg0: i32) -> (i32, i32, i32) {
    %c0_i32 = arith.constant 0 : i32
    %c0_i32_0 = arith.constant 0 : i32
    %c0_i32_1 = arith.constant 0 : i32
    %c0_i32_2 = arith.constant 0 : i32
    return %c0_i32, %c0_i32_0, %c0_i32_1 : i32, i32, i32
  }
}

module attributes {stable_mosaic.version = 11 : i64} {
  func.func @_branch_final_kernel(%arg0: i32, %arg1: memref<2x8x2048xbf16, #tpu.memory_space<vmem>>, %arg2: memref<2x2048x1xbf16, #tpu.memory_space<vmem>>, %arg3: memref<2x1x1xf32, #tpu.memory_space<vmem>>, %arg4: memref<2x8x1xf32, #tpu.memory_space<vmem>>) attributes {dimension_semantics = [#tpu.dimension_semantics<arbitrary>], iteration_bounds = array<i64: 1>, scalar_prefetch = 0 : i64, scratch_operands = 0 : i64, tpu.core_type = #tpu.core_type<tc>, window_params = [{pipeline_mode = #tpu.pipeline_mode<synchronous>, transform_indices = @transform_0, window_bounds = array<i64: 2, 8, 2048>}, {pipeline_mode = #tpu.pipeline_mode<synchronous>, transform_indices = @transform_1, window_bounds = array<i64: 2, 2048, 1>}, {pipeline_mode = #tpu.pipeline_mode<synchronous>, transform_indices = @transform_2, window_bounds = array<i64: 2, 1, 1>}, {pipeline_mode = #tpu.pipeline_mode<synchronous>, transform_indices = @transform_3, window_bounds = array<i64: 2, 8, 1>}]} {
    %c0 = arith.constant 0 : index
    %c0_0 = arith.constant 0 : index
    %c0_1 = arith.constant 0 : index
    %0 = vector.load %arg1[%c0, %c0_0, %c0_1] : memref<2x8x2048xbf16, #tpu.memory_space<vmem>>, vector<2x8x2048xbf16>
    %c0_2 = arith.constant 0 : index
    %c0_3 = arith.constant 0 : index
    %c0_4 = arith.constant 0 : index
    %1 = vector.load %arg2[%c0_2, %c0_3, %c0_4] : memref<2x2048x1xbf16, #tpu.memory_space<vmem>>, vector<2x2048x1xbf16>
    "tpu.trace_start"() <{level = 10 : i32, message = "bmk,bkn->bmn"}> : () -> ()
    %cst = arith.constant dense<0.000000e+00> : vector<2x8x1xf32>
    %2 = tpu.matmul %0, %1, %cst {dimension_numbers = #tpu.dot_dimension_numbers<[2], [1], [1], [2], [0, 0, 0, 1, 1, 2], [0], [0]>} : vector<2x8x2048xbf16>, vector<2x2048x1xbf16>, vector<2x8x1xf32> -> vector<2x8x1xf32>
    "tpu.trace_stop"() : () -> ()
    %c0_5 = arith.constant 0 : index
    %c0_6 = arith.constant 0 : index
    %c0_7 = arith.constant 0 : index
    %3 = vector.load %arg3[%c0_5, %c0_6, %c0_7] : memref<2x1x1xf32, #tpu.memory_space<vmem>>, vector<2x1x1xf32>
    %4 = vector.broadcast %3 : vector<2x1x1xf32> to vector<2x8x1xf32>
    %5 = arith.addf %2, %4 : vector<2x8x1xf32>
    %c0_8 = arith.constant 0 : index
    %c0_9 = arith.constant 0 : index
    %c0_10 = arith.constant 0 : index
    %6 = vector.load %arg4[%c0_8, %c0_9, %c0_10] : memref<2x8x1xf32, #tpu.memory_space<vmem>>, vector<2x8x1xf32>
    tpu.vector_store %arg4[%c0_8, %c0_9, %c0_10], %5 {strides = array<i32>} : memref<2x8x1xf32, #tpu.memory_space<vmem>>, vector<2x8x1xf32>,
    return
  }
  func.func @transform_0(%arg0: i32) -> (i32, i32, i32) {
    %c0_i32 = arith.constant 0 : i32
    %c0_i32_0 = arith.constant 0 : i32
    %c0_i32_1 = arith.constant 0 : i32
    %c0_i32_2 = arith.constant 0 : i32
    return %c0_i32, %c0_i32_0, %c0_i32_1 : i32, i32, i32
  }
  func.func @transform_1(%arg0: i32) -> (i32, i32, i32) {
    %c0_i32 = arith.constant 0 : i32
    %c0_i32_0 = arith.constant 0 : i32
    %c0_i32_1 = arith.constant 0 : i32
    %c0_i32_2 = arith.constant 0 : i32
    return %c0_i32, %c0_i32_0, %c0_i32_1 : i32, i32, i32
  }
  func.func @transform_2(%arg0: i32) -> (i32, i32, i32) {
    %c0_i32 = arith.constant 0 : i32
    %c0_i32_0 = arith.constant 0 : i32
    %c0_i32_1 = arith.constant 0 : i32
    %c0_i32_2 = arith.constant 0 : i32
    return %c0_i32, %c0_i32_0, %c0_i32_1 : i32, i32, i32
  }
  func.func @transform_3(%arg0: i32) -> (i32, i32, i32) {
    %c0_i32 = arith.constant 0 : i32
    %c0_i32_0 = arith.constant 0 : i32
    %c0_i32_1 = arith.constant 0 : i32
    %c0_i32_2 = arith.constant 0 : i32
    return %c0_i32, %c0_i32_0, %c0_i32_1 : i32, i32, i32
  }
}

</mosaic_0001>

<bundles_post_ra>
// kernel: _lambda_.5
= control target key start
LH: loop header
LB: loop body
LE: loop exit
PB: predicated region body
PF: predicated region fallthrough
CT: control target
= control target key end

     0   :  { %s1053_s12 = smov 0   ;;  %s1226_s0 = inlined_call_operand.vmem [shape: bf16[512,64], index: 0, kind: input, shape index: {}]   ;;  %s1227_s1 = inlined_call_operand.vmem [shape: bf16[64,16], index: 1, kind: input, shape index: {}]   ;;  %s1228_s2 = inlined_call_operand.vmem [shape: f32[1,16], index: 2, kind: input, shape index: {}]   ;;  %s1229_s3 = inlined_call_operand.vmem [shape: bf16[512,16], index: 3, kind: output, shape index: {}]  }
   0x1 LB: > { %s817_s13 = sadd.s32 4294967295, %s1031_s12   ;;  %p821_p0 = scmp.ge.s32.totalorder %s1031_s12, 1  ;;  %s1031_s12 = sphi %s1053_s12, %s13_s12  }
   0x2   : > { %p138_p1 = scmp.lt.s32.totalorder %s1031_s12, 3 }
   0x4   : > { %p139_p2 = pnand %p821_p0, %p138_p1 }
   0x5   : > { %v1005_v0 = vld [vmem:[%s1227_s1] sm:$0xff] (!%p139_p2)   ;;  %s822_s16 = sshll.u32 (!%p139_p2), %s817_s13, 5  ;;  %v1006_v1 = vld [vmem:[%s1227_s1 + $0x8] sm:$0xff] (!%p139_p2)   ;;  %v1007_v2 = vld [vmem:[%s1227_s1 + $0x10] sm:$0xff] (!%p139_p2)   ;;  %vm326_vm0 = vcmask (!%p139_p2), 523264   ;;  %vm728_vm1 = vcmask (!%p139_p2), 125952  }
   0x6   : > { %142 = sbr.rel (%p139_p2) target bundleno = 273 (0x111), region = 32  ;;  %p163_p3 = scmp.lt.s32.totalorder (!%p139_p2), %s822_s16, 63  ;;  %949 = vmatprep.subr.bf16.mxu0 (!%p139_p2), %v1005_v0  ;;  %989 = vmatprep.subr.bf16.mxu1 (!%p139_p2), %v1005_v0  ;;  %v1008_v3 = vld [vmem:[%s1227_s1 + $0x18] sm:$0xff] (!%p139_p2)   ;;  %v1118_v20 = vld [vmem:[%s1228_s2] ss:$0 sm:$0xff] (!%p139_p2) }
   0x7   : > { %950 = vmatpush3.bf16.msra.mxu0 (!%p139_p2), %v1005_v0  ;;  %993 = vmatpush3.bf16.msra.mxu1 (!%p139_p2), %v1005_v0 }
   0x8   : > { %951 = vmatprep.subr.bf16.mxu0 (!%p139_p2), %v1006_v1  ;;  %990 = vmatprep.subr.bf16.mxu1 (!%p139_p2), %v1006_v1 }
   0xb   : > { %952 = vmatpush3.bf16.msra.mxu0 (!%p139_p2), %v1006_v1  ;;  %994 = vmatpush3.bf16.msra.mxu1 (!%p139_p2), %v1006_v1 }
   0xc   : > { %953 = vmatprep.subr.bf16.mxu0 (!%p139_p2), %v1007_v2  ;;  %991 = vmatprep.subr.bf16.mxu1 (!%p139_p2), %v1007_v2 }
   0xd   : > { %s1231_s16 = smov (!%p163_p3, %s822_s16), 63 }
   0xe   : > { %s823_s21 = sshll.u32 %s1231_s16, 2 }
   0xf   : > { %s1081_s26 = scalar_lea.vmem %s1226_s0, %s823_s21  ;;  %954 = vmatpush3.bf16.msra.mxu0 %v1007_v2  ;;  %995 = vmatpush3.bf16.msra.mxu1 %v1007_v2  ;;  %s1133_s4 = scalar_lea.vmem %s1229_s3, %s823_s21 }
  0x10   : > { %v1009_v4 = vld [vmem:[%s1081_s26] sm:$0xff]   ;;  %955 = vmatprep.subr.bf16.mxu0 %v1008_v3  ;;  %992 = vmatprep.subr.bf16.mxu1 %v1008_v3  ;;  %v1011_v6 = vld [vmem:[%s1081_s26 + $0x8] sm:$0xff]   ;;  %v1013_v8 = vld [vmem:[%s1081_s26 + $0x10] sm:$0xff]  }
  0x11   : > { %v1010_v5 = vld [vmem:[%s1081_s26 + $0x40] sm:$0xff]   ;;  %957 = vmatprep.mubr.msk.bf16.mxu0 %vm326_vm0, %v1009_v4  ;;  %v1012_v7 = vld [vmem:[%s1081_s26 + $0x48] sm:$0xff]   ;;  %v1014_v9 = vld [vmem:[%s1081_s26 + $0x50] sm:$0xff]  }
  0x12   : > { %973 = vmatprep.mubr.msk.bf16.mxu1 %vm326_vm0, %v1010_v5  ;;  %v1015_v10 = vld [vmem:[%s1081_s26 + $0x18] sm:$0xff]   ;;  %v1017_v12 = vld [vmem:[%s1081_s26 + $0x20] sm:$0xff]   ;;  %v1019_v14 = vld [vmem:[%s1081_s26 + $0x28] sm:$0xff]  }
  0x13   : > { %956 = vmatpush3.bf16.msra.mxu0 %v1008_v3  ;;  %996 = vmatpush3.bf16.msra.mxu1 %v1008_v3  ;;  %v1016_v11 = vld [vmem:[%s1081_s26 + $0x58] sm:$0xff]   ;;  %v1018_v13 = vld [vmem:[%s1081_s26 + $0x60] sm:$0xff]   ;;  %v1020_v15 = vld [vmem:[%s1081_s26 + $0x68] sm:$0xff]  }
  0x14   : > { %v1021_v16 = vld [vmem:[%s1081_s26 + $0x30] sm:$0xff]   ;;  %v1023_v18 = vld [vmem:[%s1081_s26 + $0x38] sm:$0xff]  }
  0x15   : > { %v1022_v17 = vld [vmem:[%s1081_s26 + $0x70] sm:$0xff]   ;;  %v1024_v19 = vld [vmem:[%s1081_s26 + $0x78] sm:$0xff]  }
  0x16   : > { %958 = vmatmul.mubr.msk.bf16.vlgmr.msra.gmra.mrb[0].mxu0 %vm326_vm0, %v1011_v6  ;;  %974 = vmatmul.mubr.msk.bf16.vlgmr.msra.gmra.mrb[0].mxu1 %vm326_vm0, %v1012_v7 }
  0x17   : > { %961 = vmatprep.mubr.msk.bf16.mxu0 %vm326_vm0, %v1013_v8  ;;  %977 = vmatprep.mubr.msk.bf16.mxu1 %vm326_vm0, %v1014_v9 }
  0x1e   : > { %962 = vmatmul.mubr.msk.bf16.gmra.mrb[4].mxu0 %vm326_vm0, %v1015_v10  ;;  %978 = vmatmul.mubr.msk.bf16.gmra.mrb[4].mxu1 %vm326_vm0, %v1016_v11 }
  0x1f   : > { %965 = vmatprep.mubr.msk.bf16.mxu0 %vm326_vm0, %v1017_v12  ;;  %981 = vmatprep.mubr.msk.bf16.mxu1 %vm326_vm0, %v1018_v13 }
  0x26   : > { %966 = vmatmul.mubr.msk.bf16.gmra.mrb[8].mxu0 %vm326_vm0, %v1019_v14  ;;  %982 = vmatmul.mubr.msk.bf16.gmra.mrb[8].mxu1 %vm326_vm0, %v1020_v15 }
  0x27   : > { %969 = vmatprep.mubr.msk.bf16.mxu0 %vm326_vm0, %v1021_v16  ;;  %985 = vmatprep.mubr.msk.bf16.mxu1 %vm326_vm0, %v1022_v17 }
  0x2e   : > { %970 = vmatmul.mubr.msk.bf16.gmra.mrb[12].mxu0 %vm326_vm0, %v1023_v18  ;;  %986 = vmatmul.mubr.msk.bf16.gmra.mrb[12].mxu1 %vm326_vm0, %v1024_v19 }
  0xe9   : > { %v959_v21 = vpop.f32.mrb[0].mxu0  ;;  %v975_v22 = vpop.f32.mrb[0].mxu1 }
  0xea   : > { %v418_v23 = vadd.f32 %v959_v21, %v1118_v20  ;;  %v482_v24 = vadd.f32 %v975_v22, %v1118_v20  ;;  %v409_v25 = vpop.f32.mrb[1].mxu0  ;;  %v473_v26 = vpop.f32.mrb[1].mxu1 }
  0xeb   : > { %v410_v27 = vadd.f32 %v1118_v20, %v409_v25  ;;  %v474_v28 = vadd.f32 %v1118_v20, %v473_v26  ;;  %v960_v29 = vpop.f32.mrb[2].mxu0  ;;  %v976_v30 = vpop.f32.mrb[2].mxu1 }
  0xec   : > { %v538_v31 = vmul.f32 0.2, %v418_v23  ;;  %v554_v32 = vmul.f32 0.2, %v482_v24  ;;  %v421_v33 = vadd.f32 %v960_v29, %v1118_v20  ;;  %v485_v34 = vadd.f32 %v976_v30, %v1118_v20  ;;  %v412_v35 = vpop.f32.mrb[3].mxu0  ;;  %v476_v36 = vpop.f32.mrb[3].mxu1 }
  0xed   : > { %v536_v37 = vmul.f32 0.2, %v410_v27  ;;  %v552_v38 = vmul.f32 0.2, %v474_v28  ;;  %v413_v39 = vadd.f32 %v1118_v20, %v412_v35  ;;  %v477_v40 = vadd.f32 %v1118_v20, %v476_v36 }
  0xee   : > { %v570_v41 = vmax.f32 %v418_v23, %v538_v31  ;;  %v586_v42 = vmax.f32 %v482_v24, %v554_v32  ;;  %v539_v43 = vmul.f32 0.2, %v421_v33  ;;  %v555_v44 = vmul.f32 0.2, %v485_v34 }
  0xef   : > { %v568_v45 = vmax.f32 %v410_v27, %v536_v37  ;;  %v584_v46 = vmax.f32 %v474_v28, %v552_v38  ;;  %v537_v47 = vmul.f32 0.2, %v413_v39  ;;  %v553_v48 = vmul.f32 0.2, %v477_v40 }
  0xf0   : > { %v899_v49 = vpack.c.bf16 %v570_v41, %v570_v41  ;;  %v915_v50 = vpack.c.bf16 %v586_v42, %v586_v42  ;;  %v571_v51 = vmax.f32 %v421_v33, %v539_v43  ;;  %v587_v52 = vmax.f32 %v485_v34, %v555_v44 }
  0xf1   : > { %v897_v53 = vpack.c.bf16 %v568_v45, %v568_v45  ;;  %v913_v54 = vpack.c.bf16 %v584_v46, %v584_v46  ;;  %v569_v55 = vmax.f32 %v413_v39, %v537_v47  ;;  %v585_v56 = vmax.f32 %v477_v40, %v553_v48  ;;  %v963_v57 = vpop.f32.mrb[4].mxu0  ;;  %v979_v58 = vpop.f32.mrb[4].mxu1 }
  0xf2   : > { %731 = vst.msk [vmem:[%s1133_s4 + $0x8] sm:$0xf] %vm728_vm1, %v899_v49  ;;  %747 = vst.msk [vmem:[%s1133_s4 + $0x48] sm:$0xf] %vm728_vm1, %v915_v50  ;;  %v900_v59 = vpack.c.bf16 %v571_v51, %v571_v51  ;;  %v916_v60 = vpack.c.bf16 %v587_v52, %v587_v52  ;;  %v434_v61 = vadd.f32 %v963_v57, %v1118_v20  ;;  %v425_v63 = vpop.f32.mrb[5].mxu0  ;;  %v489_v0 = vpop.f32.mrb[5].mxu1 }
  0xf3   : > { %v498_v62 = vadd.f32 %v979_v58, %v1118_v20  ;;  %729 = vst.msk [vmem:[%s1133_s4] sm:$0xf] %vm728_vm1, %v897_v53  ;;  %745 = vst.msk [vmem:[%s1133_s4 + $0x40] sm:$0xf] %vm728_vm1, %v913_v54  ;;  %v898_v1 = vpack.c.bf16 %v569_v55, %v569_v55  ;;  %v914_v2 = vpack.c.bf16 %v585_v56, %v585_v56  ;;  %v964_v5 = vpop.f32.mrb[6].mxu0  ;;  %v980_v6 = vpop.f32.mrb[6].mxu1 }
  0xf4   : > { %v426_v3 = vadd.f32 %v1118_v20, %v425_v63  ;;  %v490_v4 = vadd.f32 %v1118_v20, %v489_v0  ;;  %732 = vst.msk [vmem:[%s1133_s4 + $0xc] sm:$0xf] %vm728_vm1, %v900_v59  ;;  %748 = vst.msk [vmem:[%s1133_s4 + $0x4c] sm:$0xf] %vm728_vm1, %v916_v60  ;;  %v542_v7 = vmul.f32 0.2, %v434_v61  ;;  %v437_v9 = vadd.f32 %v964_v5, %v1118_v20 }
  0xf5   : > { %v558_v8 = vmul.f32 0.2, %v498_v62  ;;  %v501_v10 = vadd.f32 %v980_v6, %v1118_v20  ;;  %v428_v11 = vpop.f32.mrb[7].mxu0  ;;  %v492_v12 = vpop.f32.mrb[7].mxu1  ;;  %730 = vst.msk [vmem:[%s1133_s4 + $0x4] sm:$0xf] %vm728_vm1, %v898_v1 }
  0xf6   : > { %746 = vst.msk [vmem:[%s1133_s4 + $0x44] sm:$0xf] %vm728_vm1, %v914_v2  ;;  %v540_v13 = vmul.f32 0.2, %v426_v3  ;;  %v556_v14 = vmul.f32 0.2, %v490_v4  ;;  %v429_v15 = vadd.f32 %v1118_v20, %v428_v11  ;;  %v493_v16 = vadd.f32 %v1118_v20, %v492_v12 }
  0xf7   : > { %v574_v17 = vmax.f32 %v434_v61, %v542_v7  ;;  %v590_v18 = vmax.f32 %v498_v62, %v558_v8  ;;  %v543_v19 = vmul.f32 0.2, %v437_v9  ;;  %v559_v21 = vmul.f32 0.2, %v501_v10 }
  0xf8   : > { %v572_v22 = vmax.f32 %v426_v3, %v540_v13  ;;  %v588_v23 = vmax.f32 %v490_v4, %v556_v14  ;;  %v541_v24 = vmul.f32 0.2, %v429_v15  ;;  %v557_v25 = vmul.f32 0.2, %v493_v16 }
  0xf9   : > { %v903_v26 = vpack.c.bf16 %v574_v17, %v574_v17  ;;  %v919_v27 = vpack.c.bf16 %v590_v18, %v590_v18  ;;  %v575_v28 = vmax.f32 %v437_v9, %v543_v19  ;;  %v591_v29 = vmax.f32 %v501_v10, %v559_v21  ;;  %v967_v34 = vpop.f32.mrb[8].mxu0  ;;  %v983_v35 = vpop.f32.mrb[8].mxu1 }
  0xfa   : > { %v901_v30 = vpack.c.bf16 %v572_v22, %v572_v22  ;;  %v917_v31 = vpack.c.bf16 %v588_v23, %v588_v23  ;;  %v573_v32 = vmax.f32 %v429_v15, %v541_v24  ;;  %v589_v33 = vmax.f32 %v493_v16, %v557_v25  ;;  %v441_v40 = vpop.f32.mrb[9].mxu0  ;;  %v505_v41 = vpop.f32.mrb[9].mxu1 }
  0xfb   : > { %735 = vst.msk [vmem:[%s1133_s4 + $0x18] sm:$0xf] %vm728_vm1, %v903_v26  ;;  %751 = vst.msk [vmem:[%s1133_s4 + $0x58] sm:$0xf] %vm728_vm1, %v919_v27  ;;  %v904_v36 = vpack.c.bf16 %v575_v28, %v575_v28  ;;  %v920_v37 = vpack.c.bf16 %v591_v29, %v591_v29  ;;  %v450_v38 = vadd.f32 %v967_v34, %v1118_v20  ;;  %v968_v46 = vpop.f32.mrb[10].mxu0  ;;  %v984_v47 = vpop.f32.mrb[10].mxu1 }
  0xfc   : > { %v514_v39 = vadd.f32 %v983_v35, %v1118_v20  ;;  %733 = vst.msk [vmem:[%s1133_s4 + $0x10] sm:$0xf] %vm728_vm1, %v901_v30  ;;  %749 = vst.msk [vmem:[%s1133_s4 + $0x50] sm:$0xf] %vm728_vm1, %v917_v31  ;;  %v902_v42 = vpack.c.bf16 %v573_v32, %v573_v32  ;;  %v918_v43 = vpack.c.bf16 %v589_v33, %v589_v33  ;;  %v444_v52 = vpop.f32.mrb[11].mxu0  ;;  %v508_v53 = vpop.f32.mrb[11].mxu1 }
  0xfd   : > { %v442_v44 = vadd.f32 %v1118_v20, %v441_v40  ;;  %v506_v45 = vadd.f32 %v1118_v20, %v505_v41  ;;  %736 = vst.msk [vmem:[%s1133_s4 + $0x1c] sm:$0xf] %vm728_vm1, %v904_v36  ;;  %752 = vst.msk [vmem:[%s1133_s4 + $0x5c] sm:$0xf] %vm728_vm1, %v920_v37  ;;  %v546_v48 = vmul.f32 0.2, %v450_v38  ;;  %v453_v50 = vadd.f32 %v968_v46, %v1118_v20 }
  0xfe   : > { %v562_v49 = vmul.f32 0.2, %v514_v39  ;;  %v517_v51 = vadd.f32 %v984_v47, %v1118_v20  ;;  %734 = vst.msk [vmem:[%s1133_s4 + $0x14] sm:$0xf] %vm728_vm1, %v902_v42  ;;  %750 = vst.msk [vmem:[%s1133_s4 + $0x54] sm:$0xf] %vm728_vm1, %v918_v43  ;;  %v445_v56 = vadd.f32 %v1118_v20, %v444_v52  ;;  %v509_v57 = vadd.f32 %v1118_v20, %v508_v53 }
  0xff   : > { %v544_v54 = vmul.f32 0.2, %v442_v44  ;;  %v560_v55 = vmul.f32 0.2, %v506_v45  ;;  %v578_v58 = vmax.f32 %v450_v38, %v546_v48  ;;  %v547_v60 = vmul.f32 0.2, %v453_v50 }
 0x100   : > { %v594_v59 = vmax.f32 %v514_v39, %v562_v49  ;;  %v563_v61 = vmul.f32 0.2, %v517_v51  ;;  %v545_v0 = vmul.f32 0.2, %v445_v56  ;;  %v561_v1 = vmul.f32 0.2, %v509_v57 }
 0x101   : > { %v576_v62 = vmax.f32 %v442_v44, %v544_v54  ;;  %v592_v63 = vmax.f32 %v506_v45, %v560_v55  ;;  %v907_v2 = vpack.c.bf16 %v578_v58, %v578_v58  ;;  %v579_v4 = vmax.f32 %v453_v50, %v547_v60  ;;  %v971_v10 = vpop.f32.mrb[12].mxu0  ;;  %v987_v11 = vpop.f32.mrb[12].mxu1 }
 0x102   : > { %v923_v3 = vpack.c.bf16 %v594_v59, %v594_v59  ;;  %v595_v5 = vmax.f32 %v517_v51, %v563_v61  ;;  %v577_v8 = vmax.f32 %v445_v56, %v545_v0  ;;  %v593_v9 = vmax.f32 %v509_v57, %v561_v1  ;;  %v457_v16 = vpop.f32.mrb[13].mxu0  ;;  %v521_v17 = vpop.f32.mrb[13].mxu1 }
 0x103   : > { %v905_v6 = vpack.c.bf16 %v576_v62, %v576_v62  ;;  %v921_v7 = vpack.c.bf16 %v592_v63, %v592_v63  ;;  %739 = vst.msk [vmem:[%s1133_s4 + $0x28] sm:$0xf] %vm728_vm1, %v907_v2  ;;  %v908_v12 = vpack.c.bf16 %v579_v4, %v579_v4  ;;  %v466_v14 = vadd.f32 %v971_v10, %v1118_v20  ;;  %v972_v23 = vpop.f32.mrb[14].mxu0  ;;  %v988_v24 = vpop.f32.mrb[14].mxu1 }
 0x104   : > { %755 = vst.msk [vmem:[%s1133_s4 + $0x68] sm:$0xf] %vm728_vm1, %v923_v3  ;;  %v924_v13 = vpack.c.bf16 %v595_v5, %v595_v5  ;;  %v530_v15 = vadd.f32 %v987_v11, %v1118_v20  ;;  %v906_v18 = vpack.c.bf16 %v577_v8, %v577_v8  ;;  %v922_v19 = vpack.c.bf16 %v593_v9, %v593_v9  ;;  %v460_v29 = vpop.f32.mrb[15].mxu0  ;;  %v524_v30 = vpop.f32.mrb[15].mxu1 }
 0x105   : > { %737 = vst.msk [vmem:[%s1133_s4 + $0x20] sm:$0xf] %vm728_vm1, %v905_v6  ;;  %753 = vst.msk [vmem:[%s1133_s4 + $0x60] sm:$0xf] %vm728_vm1, %v921_v7  ;;  %v458_v21 = vadd.f32 %v1118_v20, %v457_v16  ;;  %v522_v22 = vadd.f32 %v1118_v20, %v521_v17  ;;  %v550_v25 = vmul.f32 0.2, %v466_v14  ;;  %v469_v27 = vadd.f32 %v972_v23, %v1118_v20 }
 0x106   : > { %740 = vst.msk [vmem:[%s1133_s4 + $0x2c] sm:$0xf] %vm728_vm1, %v908_v12  ;;  %756 = vst.msk [vmem:[%s1133_s4 + $0x6c] sm:$0xf] %vm728_vm1, %v924_v13  ;;  %v566_v26 = vmul.f32 0.2, %v530_v15  ;;  %v533_v28 = vadd.f32 %v988_v24, %v1118_v20  ;;  %v461_v33 = vadd.f32 %v1118_v20, %v460_v29  ;;  %v525_v34 = vadd.f32 %v1118_v20, %v524_v30 }
 0x107   : > { %738 = vst.msk [vmem:[%s1133_s4 + $0x24] sm:$0xf] %vm728_vm1, %v906_v18  ;;  %754 = vst.msk [vmem:[%s1133_s4 + $0x64] sm:$0xf] %vm728_vm1, %v922_v19  ;;  %v548_v31 = vmul.f32 0.2, %v458_v21  ;;  %v582_v35 = vmax.f32 %v466_v14, %v550_v25 }
 0x108   : > { %v564_v32 = vmul.f32 0.2, %v522_v22  ;;  %v598_v36 = vmax.f32 %v530_v15, %v566_v26  ;;  %v551_v37 = vmul.f32 0.2, %v469_v27  ;;  %v567_v38 = vmul.f32 0.2, %v533_v28 }
 0x109   : > { %v580_v39 = vmax.f32 %v458_v21, %v548_v31  ;;  %v549_v41 = vmul.f32 0.2, %v461_v33  ;;  %v565_v42 = vmul.f32 0.2, %v525_v34  ;;  %v911_v43 = vpack.c.bf16 %v582_v35, %v582_v35 }
 0x10a   : > { %v596_v40 = vmax.f32 %v522_v22, %v564_v32  ;;  %v927_v44 = vpack.c.bf16 %v598_v36, %v598_v36  ;;  %v583_v45 = vmax.f32 %v469_v27, %v551_v37  ;;  %v599_v46 = vmax.f32 %v533_v28, %v567_v38 }
 0x10b   : > { %v909_v20 = vpack.c.bf16 %v580_v39, %v580_v39  ;;  %v581_v48 = vmax.f32 %v461_v33, %v549_v41  ;;  %v597_v49 = vmax.f32 %v525_v34, %v565_v42  ;;  %743 = vst.msk [vmem:[%s1133_s4 + $0x38] sm:$0xf] %vm728_vm1, %v911_v43 }
 0x10c   : > { %v925_v47 = vpack.c.bf16 %v596_v40, %v596_v40  ;;  %759 = vst.msk [vmem:[%s1133_s4 + $0x78] sm:$0xf] %vm728_vm1, %v927_v44  ;;  %v912_v50 = vpack.c.bf16 %v583_v45, %v583_v45  ;;  %v928_v51 = vpack.c.bf16 %v599_v46, %v599_v46 }
 0x10d   : > { %741 = vst.msk [vmem:[%s1133_s4 + $0x30] sm:$0xf] %vm728_vm1, %v909_v20  ;;  %v910_v52 = vpack.c.bf16 %v581_v48, %v581_v48  ;;  %v926_v53 = vpack.c.bf16 %v597_v49, %v597_v49 }
 0x10e   : > { %757 = vst.msk [vmem:[%s1133_s4 + $0x70] sm:$0xf] %vm728_vm1, %v925_v47  ;;  %744 = vst.msk [vmem:[%s1133_s4 + $0x3c] sm:$0xf] %vm728_vm1, %v912_v50 }
 0x10f   : > { %760 = vst.msk [vmem:[%s1133_s4 + $0x7c] sm:$0xf] %vm728_vm1, %v928_v51  ;;  %742 = vst.msk [vmem:[%s1133_s4 + $0x34] sm:$0xf] %vm728_vm1, %v910_v52 }
 0x110   : > { %758 = vst.msk [vmem:[%s1133_s4 + $0x74] sm:$0xf] %vm728_vm1, %v926_v53 }
 0x111 PF: > { %s13_s12 = sadd.s32 1, %s1031_s12  }
 0x112   : > { %p10_p4 = scmp.ge.s32.totalorder %s13_s12, 4  }
 0x114   :  { %12 = sbr.rel (!%p10_p4) target bundleno = 1 (0x1), region = 62 }

// kernel: _lambda_.6
= control target key start
LH: loop header
LB: loop body
LE: loop exit
PB: predicated region body
PF: predicated region fallthrough
CT: control target
= control target key end

     0   :  { %vm660_vm0 = vcmask 261120   ;;  %vm1172_vm1 = vcmask 257024   ;;  %s2174_s1 = inlined_call_operand.vmem [shape: bf16[2,256,32], index: 1, kind: input, shape index: {}]   ;;  %s2175_s0 = inlined_call_operand.vmem [shape: bf16[2,128,256], index: 0, kind: input, shape index: {}]   ;;  %s2176_s2 = inlined_call_operand.vmem [shape: f32[2,1,32], index: 2, kind: input, shape index: {}]   ;;  %s2177_s3 = inlined_call_operand.vmem [shape: f32[2,1,32], index: 3, kind: input, shape index: {}]   ;;  %s2178_s4 = inlined_call_operand.vmem [shape: bf16[2,128,32], index: 4, kind: output, shape index: {}]  }
   0x1   :  { %v1465_v0 = vld [vmem:[%s2174_s1 + $0x40] sm:$0xff]   ;;  %v1469_v4 = vld [vmem:[%s2174_s1 + $0x48] sm:$0xff]   ;;  %v1473_v8 = vld [vmem:[%s2174_s1 + $0x50] sm:$0xff]  }
   0x2   :  { %v1466_v1 = vld [vmem:[%s2174_s1 + $0xc0] sm:$0xff]   ;;  %1337 = vmatprep.subr.bf16.mxu0 %v1465_v0  ;;  %v1470_v5 = vld [vmem:[%s2174_s1 + $0xc8] sm:$0xff]   ;;  %v1474_v9 = vld [vmem:[%s2174_s1 + $0xd0] sm:$0xff]  }
   0x3   :  { %v1467_v2 = vld [vmem:[%s2174_s1] sm:$0xff]   ;;  %1401 = vmatprep.subr.bf16.mxu1 %v1466_v1  ;;  %v1471_v6 = vld [vmem:[%s2174_s1 + $0x8] sm:$0xff]   ;;  %v1475_v10 = vld [vmem:[%s2174_s1 + $0x10] sm:$0xff]  }
   0x4   :  { %v1468_v3 = vld [vmem:[%s2174_s1 + $0x80] sm:$0xff]   ;;  %1338 = vmatpush3.bf16.msra.mxu0 %v1467_v2  ;;  %v1472_v7 = vld [vmem:[%s2174_s1 + $0x88] sm:$0xff]   ;;  %v1476_v11 = vld [vmem:[%s2174_s1 + $0x90] sm:$0xff]  }
   0x5   :  { %1402 = vmatpush3.bf16.msra.mxu1 %v1468_v3  ;;  %1339 = vmatprep.subr.bf16.mxu0 %v1469_v4  ;;  %v1477_v12 = vld [vmem:[%s2174_s1 + $0x58] sm:$0xff]   ;;  %v1481_v16 = vld [vmem:[%s2174_s1 + $0x60] sm:$0xff]   ;;  %v1485_v20 = vld [vmem:[%s2174_s1 + $0x68] sm:$0xff]  }
   0x6   :  { %1403 = vmatprep.subr.bf16.mxu1 %v1470_v5  ;;  %v1478_v13 = vld [vmem:[%s2174_s1 + $0xd8] sm:$0xff]   ;;  %v1482_v17 = vld [vmem:[%s2174_s1 + $0xe0] sm:$0xff]   ;;  %v1486_v21 = vld [vmem:[%s2174_s1 + $0xe8] sm:$0xff]  }
   0x7   :  { %v1479_v14 = vld [vmem:[%s2174_s1 + $0x18] sm:$0xff]   ;;  %v1483_v18 = vld [vmem:[%s2174_s1 + $0x20] sm:$0xff]   ;;  %v1487_v22 = vld [vmem:[%s2174_s1 + $0x28] sm:$0xff]  }
   0x8   :  { %1340 = vmatpush3.bf16.msra.mxu0 %v1471_v6  ;;  %v1480_v15 = vld [vmem:[%s2174_s1 + $0x98] sm:$0xff]   ;;  %v1484_v19 = vld [vmem:[%s2174_s1 + $0xa0] sm:$0xff]   ;;  %v1488_v23 = vld [vmem:[%s2174_s1 + $0xa8] sm:$0xff]  }
   0x9   :  { %1404 = vmatpush3.bf16.msra.mxu1 %v1472_v7  ;;  %1341 = vmatprep.subr.bf16.mxu0 %v1473_v8  ;;  %v1489_v24 = vld [vmem:[%s2174_s1 + $0x70] sm:$0xff]   ;;  %v1493_v28 = vld [vmem:[%s2174_s1 + $0x78] sm:$0xff]   ;;  %v1497_v32 = vld [vmem:[%s2175_s0] ss:$8 sps:$4 sm:$0xff]  }
   0xa   :  { %1405 = vmatprep.subr.bf16.mxu1 %v1474_v9  ;;  %v1490_v25 = vld [vmem:[%s2174_s1 + $0xf0] sm:$0xff]   ;;  %v1494_v29 = vld [vmem:[%s2174_s1 + $0xf8] sm:$0xff]   ;;  %v1499_v33 = vld [vmem:[%s2175_s0 + $0x4] ss:$8 sps:$4 sm:$0xff]  }
   0xb   :  { %v1491_v26 = vld [vmem:[%s2174_s1 + $0x30] sm:$0xff]   ;;  %v1495_v30 = vld [vmem:[%s2174_s1 + $0x38] sm:$0xff]   ;;  %v1500_v34 = vld [vmem:[%s2175_s0 + $0x80] ss:$8 sps:$4 sm:$0xff]   ;;  %322 = vmatprep.mubr.bf16.mxu0 %v1499_v33 }
   0xc   :  { %1342 = vmatpush3.bf16.msra.mxu0 %v1475_v10  ;;  %v1492_v27 = vld [vmem:[%s2174_s1 + $0xb0] sm:$0xff]   ;;  %v1496_v31 = vld [vmem:[%s2174_s1 + $0xb8] sm:$0xff]   ;;  %v1502_v35 = vld [vmem:[%s2175_s0 + $0x84] ss:$8 sps:$4 sm:$0xff]  }
   0xd   :  { %1406 = vmatpush3.bf16.msra.mxu1 %v1476_v11  ;;  %1343 = vmatprep.subr.bf16.mxu0 %v1477_v12  ;;  %v1503_v36 = vld [vmem:[%s2175_s0 + $0x14] ss:$8 sps:$4 sm:$0xff]   ;;  %v1507_v38 = vld [vmem:[%s2175_s0 + $0x10] ss:$8 sps:$4 sm:$0xff]   ;;  %v1509_v40 = vld [vmem:[%s2175_s0 + $0x24] ss:$8 sps:$4 sm:$0xff]  }
   0xe   :  { %1407 = vmatprep.subr.bf16.mxu1 %v1478_v13  ;;  %595 = vmatprep.mubr.bf16.mxu1 %v1502_v35  ;;  %v1505_v37 = vld [vmem:[%s2175_s0 + $0x94] ss:$8 sps:$4 sm:$0xff]   ;;  %v1508_v39 = vld [vmem:[%s2175_s0 + $0x90] ss:$8 sps:$4 sm:$0xff]   ;;  %v1511_v41 = vld [vmem:[%s2175_s0 + $0xa4] ss:$8 sps:$4 sm:$0xff]  }
   0xf   :  { %v1513_v42 = vld [vmem:[%s2175_s0 + $0x20] ss:$8 sps:$4 sm:$0xff]   ;;  %v1515_v44 = vld [vmem:[%s2175_s0 + $0x34] ss:$8 sps:$4 sm:$0xff]   ;;  %v1519_v46 = vld [vmem:[%s2175_s0 + $0x30] ss:$8 sps:$4 sm:$0xff]  }
  0x10   :  { %1344 = vmatpush3.bf16.msra.mxu0 %v1479_v14  ;;  %v1514_v43 = vld [vmem:[%s2175_s0 + $0xa0] ss:$8 sps:$4 sm:$0xff]   ;;  %v1517_v45 = vld [vmem:[%s2175_s0 + $0xb4] ss:$8 sps:$4 sm:$0xff]   ;;  %v1520_v47 = vld [vmem:[%s2175_s0 + $0xb0] ss:$8 sps:$4 sm:$0xff]  }
  0x11   :  { %1408 = vmatpush3.bf16.msra.mxu1 %v1480_v15  ;;  %1345 = vmatprep.subr.bf16.mxu0 %v1481_v16  ;;  %v1521_v48 = vld [vmem:[%s2175_s0 + $0x44] ss:$8 sps:$4 sm:$0xff]   ;;  %v1525_v50 = vld [vmem:[%s2175_s0 + $0x40] ss:$8 sps:$4 sm:$0xff]   ;;  %v1527_v52 = vld [vmem:[%s2175_s0 + $0x54] ss:$8 sps:$4 sm:$0xff]  }
  0x12   :  { %1409 = vmatprep.subr.bf16.mxu1 %v1482_v17  ;;  %v1523_v49 = vld [vmem:[%s2175_s0 + $0xc4] ss:$8 sps:$4 sm:$0xff]   ;;  %v1526_v51 = vld [vmem:[%s2175_s0 + $0xc0] ss:$8 sps:$4 sm:$0xff]   ;;  %v1529_v53 = vld [vmem:[%s2175_s0 + $0xd4] ss:$8 sps:$4 sm:$0xff]  }
  0x13   :  { %v1531_v54 = vld [vmem:[%s2175_s0 + $0x50] ss:$8 sps:$4 sm:$0xff]   ;;  %v1533_v56 = vld [vmem:[%s2175_s0 + $0x64] ss:$8 sps:$4 sm:$0xff]   ;;  %v1537_v58 = vld [vmem:[%s2175_s0 + $0x60] ss:$8 sps:$4 sm:$0xff]  }
  0x14   :  { %1346 = vmatpush3.bf16.msra.mxu0 %v1483_v18  ;;  %v1532_v55 = vld [vmem:[%s2175_s0 + $0xd0] ss:$8 sps:$4 sm:$0xff]   ;;  %v1535_v57 = vld [vmem:[%s2175_s0 + $0xe4] ss:$8 sps:$4 sm:$0xff]   ;;  %v1538_v59 = vld [vmem:[%s2175_s0 + $0xe0] ss:$8 sps:$4 sm:$0xff]  }
  0x15   :  { %1410 = vmatpush3.bf16.msra.mxu1 %v1484_v19  ;;  %1347 = vmatprep.subr.bf16.mxu0 %v1485_v20  ;;  %v1539_v60 = vld [vmem:[%s2175_s0 + $0x74] ss:$8 sps:$4 sm:$0xff]   ;;  %v1543_v62 = vld [vmem:[%s2175_s0 + $0x70] ss:$8 sps:$4 sm:$0xff]  }
  0x16   :  { %1411 = vmatprep.subr.bf16.mxu1 %v1486_v21  ;;  %v1541_v61 = vld [vmem:[%s2175_s0 + $0xf4] ss:$8 sps:$4 sm:$0xff]   ;;  %v1544_v63 = vld [vmem:[%s2175_s0 + $0xf0] ss:$8 sps:$4 sm:$0xff]  }
  0x18   :  { %1348 = vmatpush3.bf16.msra.mxu0 %v1487_v22 }
  0x19   :  { %1412 = vmatpush3.bf16.msra.mxu1 %v1488_v23  ;;  %1349 = vmatprep.subr.bf16.mxu0 %v1489_v24 }
  0x1a   :  { %1413 = vmatprep.subr.bf16.mxu1 %v1490_v25 }
  0x1c   :  { %1350 = vmatpush3.bf16.msra.mxu0 %v1491_v26 }
  0x1d   :  { %1414 = vmatpush3.bf16.msra.mxu1 %v1492_v27  ;;  %1351 = vmatprep.subr.bf16.mxu0 %v1493_v28 }
  0x1e   :  { %1415 = vmatprep.subr.bf16.mxu1 %v1494_v29 }
  0x20   :  { %1352 = vmatpush3.bf16.msra.mxu0 %v1495_v30 }
  0x21   :  { %1416 = vmatpush3.bf16.msra.mxu1 %v1496_v31 }
  0x23   :  { %323 = vmatmul.mubr.bf16.vlgmr.msra.gmra.mrb[0].mxu0 %v1497_v32 }
  0x24   :  { %596 = vmatmul.mubr.bf16.vlgmr.msra.gmra.mrb[0].mxu1 %v1500_v34  ;;  %330 = vmatprep.mubr.bf16.mxu0 %v1503_v36 }
  0x25   :  { %603 = vmatprep.mubr.bf16.mxu1 %v1505_v37 }
  0x2b   :  { %331 = vmatmul.mubr.bf16.gmra.mrb[4].mxu0 %v1507_v38 }
  0x2c   :  { %604 = vmatmul.mubr.bf16.gmra.mrb[4].mxu1 %v1508_v39  ;;  %338 = vmatprep.mubr.bf16.mxu0 %v1509_v40 }
  0x2d   :  { %611 = vmatprep.mubr.bf16.mxu1 %v1511_v41 }
  0x33   :  { %339 = vmatmul.mubr.bf16.gmra.mrb[8].mxu0 %v1513_v42 }
  0x34   :  { %612 = vmatmul.mubr.bf16.gmra.mrb[8].mxu1 %v1514_v43  ;;  %346 = vmatprep.mubr.bf16.mxu0 %v1515_v44 }
  0x35   :  { %619 = vmatprep.mubr.bf16.mxu1 %v1517_v45 }
  0x3b   :  { %347 = vmatmul.mubr.bf16.gmra.mrb[12].mxu0 %v1519_v46 }
  0x3c   :  { %620 = vmatmul.mubr.bf16.gmra.mrb[12].mxu1 %v1520_v47  ;;  %354 = vmatprep.mubr.bf16.mxu0 %v1521_v48 }
  0x3d   :  { %627 = vmatprep.mubr.bf16.mxu1 %v1523_v49 }
  0x43   :  { %355 = vmatmul.mubr.bf16.gmra.mrb[16].mxu0 %v1525_v50 }
  0x44   :  { %628 = vmatmul.mubr.bf16.gmra.mrb[16].mxu1 %v1526_v51  ;;  %362 = vmatprep.mubr.bf16.mxu0 %v1527_v52 }
  0x45   :  { %635 = vmatprep.mubr.bf16.mxu1 %v1529_v53 }
  0x4b   :  { %363 = vmatmul.mubr.bf16.gmra.mrb[20].mxu0 %v1531_v54 }
  0x4c   :  { %636 = vmatmul.mubr.bf16.gmra.mrb[20].mxu1 %v1532_v55  ;;  %370 = vmatprep.mubr.bf16.mxu0 %v1533_v56 }
  0x4d   :  { %643 = vmatprep.mubr.bf16.mxu1 %v1535_v57 }
  0x53   :  { %371 = vmatmul.mubr.bf16.gmra.mrb[24].mxu0 %v1537_v58 }
  0x54   :  { %644 = vmatmul.mubr.bf16.gmra.mrb[24].mxu1 %v1538_v59  ;;  %378 = vmatprep.mubr.bf16.mxu0 %v1539_v60 }
  0x55   :  { %651 = vmatprep.mubr.bf16.mxu1 %v1541_v61 }
  0x5b   :  { %379 = vmatmul.mubr.bf16.gmra.mrb[28].mxu0 %v1543_v62 }
  0x5c   :  { %652 = vmatmul.mubr.bf16.gmra.mrb[28].mxu1 %v1544_v63 }
  0xf6   :  { %v1353_v0 = vpop.f32.mrb[0].mxu0 }
  0xf7   :  { %v1417_v1 = vpop.f32.mrb[0].mxu1  ;;  %v1354_v2 = vpop.f32.mrb[1].mxu0 }
  0xf8   :  { %v1766_v3 = vadd.f32 %v1354_v2, %v1353_v0  ;;  %v1418_v4 = vpop.f32.mrb[1].mxu1  ;;  %v1356_v5 = vpop.f32.mrb[2].mxu0 }
  0xf9   :  { %v1768_v6 = vadd.f32 %v1418_v4, %v1417_v1  ;;  %v1420_v7 = vpop.f32.mrb[2].mxu1  ;;  %v1357_v8 = vpop.f32.mrb[3].mxu0 }
  0xfa   :  { %v1770_v9 = vadd.f32 %v1357_v8, %v1356_v5  ;;  %v1421_v10 = vpop.f32.mrb[3].mxu1  ;;  %v661_v38 = vsel %vm660_vm0, %v1766_v3, 0.0 }
  0xfb   :  { %v1772_v11 = vadd.f32 %v1421_v10, %v1420_v7  ;;  %v698_v40 = vsel %vm660_vm0, %v1768_v6, 0.0 }
  0xfc   :  { %v662_v33 = vsel %vm660_vm0, %v1770_v9, 0.0 }
  0xfd   :  { %v699_v36 = vsel %vm660_vm0, %v1772_v11, 0.0  ;;  %v663_v41 = vadd.f32 %v662_v33, %v661_v38 }
  0xfe   :  { %v1359_v12 = vpop.f32.mrb[4].mxu0  ;;  %v700_v43 = vadd.f32 %v699_v36, %v698_v40 }
  0xff   :  { %v1423_v13 = vpop.f32.mrb[4].mxu1  ;;  %v1360_v14 = vpop.f32.mrb[5].mxu0 }
 0x100   :  { %v1774_v15 = vadd.f32 %v1360_v14, %v1359_v12  ;;  %v1424_v16 = vpop.f32.mrb[5].mxu1  ;;  %v1362_v17 = vpop.f32.mrb[6].mxu0 }
 0x101   :  { %v1776_v18 = vadd.f32 %v1424_v16, %v1423_v13  ;;  %v1426_v19 = vpop.f32.mrb[6].mxu1  ;;  %v1363_v20 = vpop.f32.mrb[7].mxu0 }
 0x102   :  { %v1778_v21 = vadd.f32 %v1363_v20, %v1362_v17  ;;  %v1427_v22 = vpop.f32.mrb[7].mxu1  ;;  %v664_v39 = vsel %vm660_vm0, %v1774_v15, 0.0 }
 0x103   :  { %v1780_v23 = vadd.f32 %v1427_v22, %v1426_v19  ;;  %v701_v42 = vsel %vm660_vm0, %v1776_v18, 0.0  ;;  %v665_v45 = vadd.f32 %v664_v39, %v663_v41 }
 0x104   :  { %v702_v48 = vadd.f32 %v701_v42, %v700_v43  ;;  %v666_v49 = vsel %vm660_vm0, %v1778_v21, 0.0 }
 0x105   :  { %v703_v53 = vsel %vm660_vm0, %v1780_v23, 0.0  ;;  %v667_v60 = vadd.f32 %v666_v49, %v665_v45 }
 0x106   :  { %v1365_v24 = vpop.f32.mrb[8].mxu0  ;;  %v704_v63 = vadd.f32 %v703_v53, %v702_v48 }
 0x107   :  { %v1429_v25 = vpop.f32.mrb[8].mxu1  ;;  %v1366_v26 = vpop.f32.mrb[9].mxu0 }
 0x108   :  { %v1782_v27 = vadd.f32 %v1366_v26, %v1365_v24  ;;  %v1430_v28 = vpop.f32.mrb[9].mxu1  ;;  %v1368_v29 = vpop.f32.mrb[10].mxu0 }
 0x109   :  { %v1784_v30 = vadd.f32 %v1430_v28, %v1429_v25  ;;  %v1432_v31 = vpop.f32.mrb[10].mxu1  ;;  %v1369_v32 = vpop.f32.mrb[11].mxu0 }
 0x10a   :  { %v1788_v34 = vadd.f32 %v1369_v32, %v1368_v29  ;;  %v1433_v35 = vpop.f32.mrb[11].mxu1  ;;  %v668_v57 = vsel %vm660_vm0, %v1782_v27, 0.0 }
 0x10b   :  { %v1792_v37 = vadd.f32 %v1433_v35, %v1432_v31  ;;  %v705_v61 = vsel %vm660_vm0, %v1784_v30, 0.0  ;;  %v669_v0 = vadd.f32 %v668_v57, %v667_v60 }
 0x10c   :  { %v706_v1 = vadd.f32 %v705_v61, %v704_v63  ;;  %v670_v2 = vsel %vm660_vm0, %v1788_v34, 0.0 }
 0x10d   :  { %v707_v5 = vsel %vm660_vm0, %v1792_v37, 0.0  ;;  %v671_v16 = vadd.f32 %v670_v2, %v669_v0 }
 0x10e   :  { %v1371_v44 = vpop.f32.mrb[12].mxu0  ;;  %v708_v24 = vadd.f32 %v707_v5, %v706_v1 }
 0x10f   :  { %v1435_v46 = vpop.f32.mrb[12].mxu1  ;;  %v1372_v47 = vpop.f32.mrb[13].mxu0 }
 0x110   :  { %v1804_v50 = vadd.f32 %v1372_v47, %v1371_v44  ;;  %v1436_v51 = vpop.f32.mrb[13].mxu1  ;;  %v1374_v52 = vpop.f32.mrb[14].mxu0 }
 0x111   :  { %v1808_v54 = vadd.f32 %v1436_v51, %v1435_v46  ;;  %v1438_v55 = vpop.f32.mrb[14].mxu1  ;;  %v1375_v56 = vpop.f32.mrb[15].mxu0 }
 0x112   :  { %v1812_v58 = vadd.f32 %v1375_v56, %v1374_v52  ;;  %v1439_v59 = vpop.f32.mrb[15].mxu1  ;;  %v672_v10 = vsel %vm660_vm0, %v1804_v50, 0.0 }
 0x113   :  { %v1816_v62 = vadd.f32 %v1439_v59, %v1438_v55  ;;  %v709_v17 = vsel %vm660_vm0, %v1808_v54, 0.0  ;;  %v673_v28 = vadd.f32 %v672_v10, %v671_v16 }
 0x114   :  { %v710_v31 = vadd.f32 %v709_v17, %v708_v24  ;;  %v674_v32 = vsel %vm660_vm0, %v1812_v58, 0.0 }
 0x115   :  { %v711_v33 = vsel %vm660_vm0, %v1816_v62, 0.0  ;;  %v675_v38 = vadd.f32 %v674_v32, %v673_v28 }
 0x116   :  { %v1377_v4 = vpop.f32.mrb[16].mxu0  ;;  %v712_v42 = vadd.f32 %v711_v33, %v710_v31 }
 0x117   :  { %v1441_v7 = vpop.f32.mrb[16].mxu1  ;;  %v1378_v8 = vpop.f32.mrb[17].mxu0 }
 0x118   :  { %v1824_v12 = vadd.f32 %v1378_v8, %v1377_v4  ;;  %v1442_v13 = vpop.f32.mrb[17].mxu1  ;;  %v1380_v14 = vpop.f32.mrb[18].mxu0 }
 0x119   :  { %v1828_v19 = vadd.f32 %v1442_v13, %v1441_v7  ;;  %v1444_v20 = vpop.f32.mrb[18].mxu1  ;;  %v1381_v22 = vpop.f32.mrb[19].mxu0 }
 0x11a   :  { %v1830_v25 = vadd.f32 %v1381_v22, %v1380_v14  ;;  %v1445_v26 = vpop.f32.mrb[19].mxu1  ;;  %v676_v35 = vsel %vm660_vm0, %v1824_v12, 0.0 }
 0x11b   :  { %v1832_v29 = vadd.f32 %v1445_v26, %v1444_v20  ;;  %v713_v39 = vsel %vm660_vm0, %v1828_v19, 0.0  ;;  %v677_v46 = vadd.f32 %v676_v35, %v675_v38 }
 0x11c   :  { %v714_v51 = vadd.f32 %v713_v39, %v712_v42  ;;  %v678_v52 = vsel %vm660_vm0, %v1830_v25, 0.0 }
 0x11d   :  { %v715_v56 = vsel %vm660_vm0, %v1832_v29, 0.0  ;;  %v679_v60 = vadd.f32 %v678_v52, %v677_v46 }
 0x11e   :  { %v1383_v36 = vpop.f32.mrb[20].mxu0  ;;  %v716_v63 = vadd.f32 %v715_v56, %v714_v51 }
 0x11f   :  { %v1447_v40 = vpop.f32.mrb[20].mxu1  ;;  %v1384_v41 = vpop.f32.mrb[21].mxu0 }
 0x120   :  { %v1842_v43 = vadd.f32 %v1384_v41, %v1383_v36  ;;  %v1448_v44 = vpop.f32.mrb[21].mxu1  ;;  %v1386_v45 = vpop.f32.mrb[22].mxu0 }
 0x121   :  { %v1844_v47 = vadd.f32 %v1448_v44, %v1447_v40  ;;  %v1450_v48 = vpop.f32.mrb[22].mxu1  ;;  %v1387_v49 = vpop.f32.mrb[23].mxu0 }
 0x122   :  { %v1848_v53 = vadd.f32 %v1387_v49, %v1386_v45  ;;  %v1451_v55 = vpop.f32.mrb[23].mxu1  ;;  %v680_v59 = vsel %vm660_vm0, %v1842_v43, 0.0 }
 0x123   :  { %v1852_v57 = vadd.f32 %v1451_v55, %v1450_v48  ;;  %v717_v61 = vsel %vm660_vm0, %v1844_v47, 0.0  ;;  %v681_v1 = vadd.f32 %v680_v59, %v679_v60 }
 0x124   :  { %v718_v5 = vadd.f32 %v717_v61, %v716_v63  ;;  %v682_v7 = vsel %vm660_vm0, %v1848_v53, 0.0 }
 0x125   :  { %v719_v14 = vsel %vm660_vm0, %v1852_v57, 0.0  ;;  %v683_v28 = vadd.f32 %v682_v7, %v681_v1 }
 0x126   :  { %v1389_v0 = vpop.f32.mrb[24].mxu0  ;;  %v720_v33 = vadd.f32 %v719_v14, %v718_v5 }
 0x127   :  { %v1453_v2 = vpop.f32.mrb[24].mxu1  ;;  %v1390_v4 = vpop.f32.mrb[25].mxu0 }
 0x128   :  { %v1860_v8 = vadd.f32 %v1390_v4, %v1389_v0  ;;  %v1454_v10 = vpop.f32.mrb[25].mxu1  ;;  %v1392_v13 = vpop.f32.mrb[26].mxu0 }
 0x129   :  { %v1864_v16 = vadd.f32 %v1454_v10, %v1453_v2  ;;  %v1456_v17 = vpop.f32.mrb[26].mxu1  ;;  %v1393_v20 = vpop.f32.mrb[27].mxu0 }
 0x12a   :  { %v684_v22 = vsel %vm660_vm0, %v1860_v8, 0.0  ;;  %v1868_v24 = vadd.f32 %v1393_v20, %v1392_v13  ;;  %v1457_v26 = vpop.f32.mrb[27].mxu1 }
 0x12b   :  { %2183 = vst [vmem:[#allocation2_spill] sm:$0xff] %v1864_v16  ;;  %v721_v31 = vsel %vm660_vm0, %v1864_v16, 0.0  ;;  %v1872_v32 = vadd.f32 %v1457_v26, %v1456_v17  ;;  %v685_v35 = vadd.f32 %v684_v22, %v683_v28 }
 0x12c   :  { %v722_v36 = vadd.f32 %v721_v31, %v720_v33  ;;  %v686_v38 = vsel %vm660_vm0, %v1868_v24, 0.0 }
 0x12d   :  { %2184 = vst [vmem:[#allocation3_spill] sm:$0xff] %v1872_v32  ;;  %v723_v40 = vsel %vm660_vm0, %v1872_v32, 0.0  ;;  %v687_v48 = vadd.f32 %v686_v38, %v685_v35 }
 0x12e   :  { %v1395_v39 = vpop.f32.mrb[28].mxu0  ;;  %v724_v55 = vadd.f32 %v723_v40, %v722_v36 }
 0x12f   :  { %v1459_v41 = vpop.f32.mrb[28].mxu1  ;;  %v1396_v42 = vpop.f32.mrb[29].mxu0 }
 0x130   :  { %v1878_v44 = vadd.f32 %v1396_v42, %v1395_v39  ;;  %v1460_v45 = vpop.f32.mrb[29].mxu1  ;;  %v1398_v46 = vpop.f32.mrb[30].mxu0 }
 0x131   :  { %v1880_v49 = vadd.f32 %v1460_v45, %v1459_v41  ;;  %v1462_v51 = vpop.f32.mrb[30].mxu1  ;;  %v1399_v52 = vpop.f32.mrb[31].mxu0 }
 0x132   :  { %v688_v56 = vsel %vm660_vm0, %v1878_v44, 0.0  ;;  %v1884_v59 = vadd.f32 %v1399_v52, %v1398_v46  ;;  %v1463_v60 = vpop.f32.mrb[31].mxu1 }
 0x133   :  { %2185 = vst [vmem:[#allocation4_spill] sm:$0xff] %v1880_v49  ;;  %v689_v61 = vadd.f32 %v688_v56, %v687_v48  ;;  %v725_v63 = vsel %vm660_vm0, %v1880_v49, 0.0  ;;  %v1888_v0 = vadd.f32 %v1463_v60, %v1462_v51 }
 0x134   :  { %v726_v1 = vadd.f32 %v725_v63, %v724_v55  ;;  %v690_v2 = vsel %vm660_vm0, %v1884_v59, 0.0 }
 0x135   :  { %2186 = vst [vmem:[#allocation5_spill] sm:$0xff] %v1888_v0  ;;  %v691_v4 = vadd.f32 %v690_v2, %v689_v61  ;;  %v727_v5 = vsel %vm660_vm0, %v1888_v0, 0.0 }
 0x136   :  { %v728_v7 = vadd.f32 %v727_v5, %v726_v1 }
 0x137   :  { %v692_v10 = vrot.slane %v691_v4, 4 }
 0x138   :  { %v729_v13 = vrot.slane %v728_v7, 4 }
 0x139   :  { %v693_v14 = vadd.f32 %v692_v10, %v691_v4 }
 0x13a   :  { %v730_v17 = vadd.f32 %v729_v13, %v728_v7 }
 0x13b   :  { %v694_v20 = vrot.slane %v693_v14, 2 }
 0x13c   :  { %v731_v26 = vrot.slane %v730_v17, 2 }
 0x13d   :  { %v695_v22 = vadd.f32 %v694_v20, %v693_v14 }
 0x13e   :  { %v732_v33 = vadd.f32 %v731_v26, %v730_v17 }
 0x13f   :  { %v696_v28 = vrot.slane %v695_v22, 1 }
 0x140   :  { %v733_v39 = vrot.slane %v732_v33, 1 }
 0x141   :  { %v697_v31 = vadd.f32 %v696_v28, %v695_v22 }
 0x142   :  { %v734_v46 = vadd.f32 %v733_v39, %v732_v33 }
 0x143   :  { %v1894_v35 = vmul.f32 0.0078125, %v697_v31 }
 0x144   :  { %v1910_v63 = vmul.f32 0.0078125, %v734_v46 }
 0x145   :  { %v738_v36 = vsub.f32 %v1766_v3, %v1894_v35  ;;  %v739_v38 = vsub.f32 %v1770_v9, %v1894_v35  ;;  %v740_v40 = vsub.f32 %v1774_v15, %v1894_v35  ;;  %v741_v41 = vsub.f32 %v1778_v21, %v1894_v35 }
 0x146   :  { %v742_v48 = vsub.f32 %v1782_v27, %v1894_v35  ;;  %v743_v52 = vsub.f32 %v1788_v34, %v1894_v35  ;;  %v744_v1 = vsub.f32 %v1804_v50, %v1894_v35  ;;  %v745_v7 = vsub.f32 %v1812_v58, %v1894_v35 }
 0x147   :  { %v770_v42 = vmul.f32 %v738_v36, %v738_v36  ;;  %v771_v45 = vmul.f32 %v739_v38, %v739_v38  ;;  %v772_v51 = vmul.f32 %v740_v40, %v740_v40  ;;  %v773_v55 = vmul.f32 %v741_v41, %v741_v41 }
 0x148   :  { %v774_v2 = vmul.f32 %v742_v48, %v742_v48  ;;  %v775_v10 = vmul.f32 %v743_v52, %v743_v52  ;;  %v754_v17 = vsub.f32 %v1768_v6, %v1910_v63  ;;  %v746_v20 = vsub.f32 %v1824_v12, %v1894_v35 }
 0x149   :  { %v802_v56 = vsel %vm660_vm0, %v770_v42, 0.0  ;;  %v803_v60 = vsel %vm660_vm0, %v771_v45, 0.0  ;;  %v805_v4 = vsel %vm660_vm0, %v772_v51, 0.0  ;;  %v807_v13 = vsel %vm660_vm0, %v773_v55, 0.0 }
 0x14a   :  { %v804_v61 = vadd.f32 %v803_v60, %v802_v56  ;;  %v776_v22 = vmul.f32 %v744_v1, %v744_v1  ;;  %v809_v26 = vsel %vm660_vm0, %v774_v2, 0.0  ;;  %v755_v28 = vsub.f32 %v1772_v11, %v1910_v63 }
 0x14b   :  { %v747_v33 = vsub.f32 %v1830_v25, %v1894_v35  ;;  %v777_v36 = vmul.f32 %v745_v7, %v745_v7  ;;  %v811_v38 = vsel %vm660_vm0, %v775_v10, 0.0  ;;  %v756_v39 = vsub.f32 %v1776_v18, %v1910_v63 }
 0x14c   :  { %v806_v5 = vadd.f32 %v805_v4, %v804_v61  ;;  %v748_v40 = vsub.f32 %v1842_v43, %v1894_v35  ;;  %v786_v42 = vmul.f32 %v754_v17, %v754_v17  ;;  %v778_v45 = vmul.f32 %v746_v20, %v746_v20 }
 0x14d   :  { %v813_v46 = vsel %vm660_vm0, %v776_v22, 0.0  ;;  %v757_v48 = vsub.f32 %v1780_v23, %v1910_v63  ;;  %v787_v51 = vmul.f32 %v755_v28, %v755_v28  ;;  %v749_v52 = vsub.f32 %v1848_v53, %v1894_v35 }
 0x14e   :  { %v808_v14 = vadd.f32 %v807_v13, %v806_v5  ;;  %v779_v56 = vmul.f32 %v747_v33, %v747_v33  ;;  %v815_v60 = vsel %vm660_vm0, %v777_v36, 0.0  ;;  %v758_v61 = vsub.f32 %v1784_v30, %v1910_v63 }
 0x14f   :  { %v788_v1 = vmul.f32 %v756_v39, %v756_v39  ;;  %v750_v2 = vsub.f32 %v1860_v8, %v1894_v35  ;;  %v780_v4 = vmul.f32 %v748_v40, %v748_v40  ;;  %v839_v7 = vsel %vm660_vm0, %v786_v42, 0.0 }
 0x150   :  { %v810_v31 = vadd.f32 %v809_v26, %v808_v14  ;;  %v817_v10 = vsel %vm660_vm0, %v778_v45, 0.0  ;;  %v759_v13 = vsub.f32 %v1792_v37, %v1910_v63  ;;  %v789_v14 = vmul.f32 %v757_v48, %v757_v48 }
 0x151   :  { %v840_v17 = vsel %vm660_vm0, %v787_v51, 0.0  ;;  %v751_v20 = vsub.f32 %v1868_v24, %v1894_v35  ;;  %v781_v22 = vmul.f32 %v749_v52, %v749_v52  ;;  %v760_v33 = vsub.f32 %v1808_v54, %v1910_v63 }
 0x152   :  { %v812_v41 = vadd.f32 %v811_v38, %v810_v31  ;;  %v841_v28 = vadd.f32 %v840_v17, %v839_v7  ;;  %v819_v31 = vsel %vm660_vm0, %v779_v56, 0.0  ;;  %v790_v36 = vmul.f32 %v758_v61, %v758_v61 }
 0x153   :  { %v842_v38 = vsel %vm660_vm0, %v788_v1, 0.0  ;;  %v752_v39 = vsub.f32 %v1878_v44, %v1894_v35  ;;  %v782_v40 = vmul.f32 %v750_v2, %v750_v2  ;;  %v821_v45 = vsel %vm660_vm0, %v780_v4, 0.0 }
 0x154   :  { %v814_v55 = vadd.f32 %v813_v46, %v812_v41  ;;  %v843_v42 = vadd.f32 %v842_v38, %v841_v28  ;;  %v761_v46 = vsub.f32 %v1816_v62, %v1910_v63  ;;  %v791_v48 = vmul.f32 %v759_v13, %v759_v13 }
 0x155   :  { %v844_v51 = vsel %vm660_vm0, %v789_v14, 0.0  ;;  %v753_v52 = vsub.f32 %v1884_v59, %v1894_v35  ;;  %v823_v61 = vsel %vm660_vm0, %v781_v22, 0.0  ;;  %v762_v1 = vsub.f32 %v1828_v19, %v1910_v63 }
 0x156   :  { %v816_v5 = vadd.f32 %v815_v60, %v814_v55  ;;  %v783_v55 = vmul.f32 %v751_v20, %v751_v20  ;;  %v845_v60 = vadd.f32 %v844_v51, %v843_v42  ;;  %v792_v2 = vmul.f32 %v760_v33, %v760_v33 }
 0x157   :  { %v846_v4 = vsel %vm660_vm0, %v790_v36, 0.0  ;;  %v825_v13 = vsel %vm660_vm0, %v782_v40, 0.0  ;;  %v763_v14 = vsub.f32 %v1832_v29, %v1910_v63  ;;  %v793_v17 = vmul.f32 %v761_v46, %v761_v46 }
 0x158   :  { %v818_v26 = vadd.f32 %v817_v10, %v816_v5  ;;  %v784_v5 = vmul.f32 %v752_v39, %v752_v39  ;;  %v847_v10 = vadd.f32 %v846_v4, %v845_v60  ;;  %v848_v20 = vsel %vm660_vm0, %v791_v48, 0.0 }
 0x159   :  { %v764_v33 = vsub.f32 %v1844_v47, %v1910_v63  ;;  %v794_v36 = vmul.f32 %v762_v1, %v762_v1  ;;  %v850_v38 = vsel %vm660_vm0, %v792_v2, 0.0  ;;  %v765_v42 = vsub.f32 %v1852_v57, %v1910_v63 }
 0x15a   :  { %v820_v41 = vadd.f32 %v819_v31, %v818_v26  ;;  %v785_v26 = vmul.f32 %v753_v52, %v753_v52  ;;  %v849_v22 = vadd.f32 %v848_v20, %v847_v10  ;;  %v827_v31 = vsel %vm660_vm0, %v783_v55, 0.0 }
 0x15b   :  { %v829_v40 = vsel %vm660_vm0, %v784_v5, 0.0  ;;  %v852_v46 = vsel %vm660_vm0, %v793_v17, 0.0  ;;  %v766_v55 = vsub.f32 %v1864_v16, %v1910_v63  ;;  %v854_v60 = vsel %vm660_vm0, %v794_v36, 0.0 }
 0x15c   :  { %v822_v56 = vadd.f32 %v821_v45, %v820_v41  ;;  %v851_v41 = vadd.f32 %v850_v38, %v849_v22  ;;  %v795_v45 = vmul.f32 %v763_v14, %v763_v14  ;;  %v831_v52 = vsel %vm660_vm0, %v785_v26, 0.0 }
 0x15d   :  { %v767_v2 = vsub.f32 %v1872_v32, %v1910_v63  ;;  %v797_v4 = vmul.f32 %v765_v42, %v765_v42  ;;  %v798_v14 = vmul.f32 %v766_v55, %v766_v55 }
 0x15e   :  { %v824_v7 = vadd.f32 %v823_v61, %v822_v56  ;;  %v853_v51 = vadd.f32 %v852_v46, %v851_v41  ;;  %v796_v56 = vmul.f32 %v764_v33, %v764_v33  ;;  %v856_v5 = vsel %vm660_vm0, %v795_v45, 0.0 }
 0x15f   :  { %v799_v22 = vmul.f32 %v767_v2, %v767_v2 }
 0x160   :  { %v826_v28 = vadd.f32 %v825_v13, %v824_v7  ;;  %v855_v1 = vadd.f32 %v854_v60, %v853_v51  ;;  %v768_v13 = vsub.f32 %v1880_v49, %v1910_v63  ;;  %v858_v17 = vsel %vm660_vm0, %v796_v56, 0.0 }
 0x161   :  { %v864_v45 = vsel %vm660_vm0, %v799_v22, 0.0 }
 0x162   :  { %v828_v39 = vadd.f32 %v827_v31, %v826_v28  ;;  %v857_v10 = vadd.f32 %v856_v5, %v855_v1  ;;  %v769_v28 = vsub.f32 %v1888_v0, %v1910_v63  ;;  %v860_v31 = vsel %vm660_vm0, %v797_v4, 0.0 }
 0x163   :  { %v800_v38 = vmul.f32 %v768_v13, %v768_v13  ;;  %v894_v5 = vlaneseq }
 0x164   :  { %v830_v48 = vadd.f32 %v829_v40, %v828_v39  ;;  %v859_v26 = vadd.f32 %v858_v17, %v857_v10  ;;  %v862_v39 = vsel %vm660_vm0, %v798_v14, 0.0  ;;  %v801_v42 = vmul.f32 %v769_v28, %v769_v28  ;;  %v878_v17 = vld [vmem:[%s2176_s2] sm:$0x1] }
 0x165   :  { %v866_v51 = vsel %vm660_vm0, %v800_v38, 0.0  ;;  %v895_v13 = vshrl.u32 %v894_v5, 7 }
 0x166   :  { %v832_v61 = vadd.f32 %v831_v52, %v830_v48  ;;  %v861_v36 = vadd.f32 %v860_v31, %v859_v26  ;;  %v868_v56 = vsel %vm660_vm0, %v801_v42, 0.0 }
 0x167   :  { %v1997_v26 = vsub.s32 0, %v895_v13 }
 0x168   :  { %v833_v7 = vrot.slane %v832_v61, 4  ;;  %v863_v40 = vadd.f32 %v862_v39, %v861_v36 }
 0x16a   :  { %v834_v20 = vadd.f32 %v833_v7, %v832_v61  ;;  %v865_v48 = vadd.f32 %v864_v45, %v863_v40 }
 0x16c   :  { %v835_v33 = vrot.slane %v834_v20, 2  ;;  %v867_v55 = vadd.f32 %v866_v51, %v865_v48 }
 0x16e   :  { %v836_v41 = vadd.f32 %v835_v33, %v834_v20  ;;  %v869_v61 = vadd.f32 %v868_v56, %v867_v55  ;;  %v886_v33 = vld [vmem:[%s2177_s3] sm:$0x1] }
 0x170   :  { %v837_v46 = vrot.slane %v836_v41, 1  ;;  %v870_v2 = vrot.slane %v869_v61, 4 }
 0x172   :  { %v838_v52 = vadd.f32 %v837_v46, %v836_v41  ;;  %v871_v4 = vadd.f32 %v870_v2, %v869_v61 }
 0x174   :  { %v876_v60 = vmul.f32 0.0078125, %v838_v52  ;;  %v872_v7 = vrot.slane %v871_v4, 2 }
 0x176   :  { %v880_v1 = vadd.f32 1e-05, %v876_v60  ;;  %v873_v10 = vadd.f32 %v872_v7, %v871_v4 }
 0x178   :  { %1545 = vrsqrt.f32 %v880_v1  ;;  %v874_v14 = vrot.slane %v873_v10, 1 }
 0x17a   :  { %v875_v20 = vadd.f32 %v874_v14, %v873_v10 }
 0x17c   :  { %v877_v22 = vmul.f32 0.0078125, %v875_v20 }
 0x17e   :  { %v881_v36 = vadd.f32 1e-05, %v877_v22 }
 0x180   :  { %1547 = vrsqrt.f32 %v881_v36 }
 0x182   :  { %v1546_v28 = vpop.eup %1545 }
 0x183   :  { %v884_v31 = vmul.f32 %v1546_v28, %v878_v17 }
 0x185   :  { %v888_v38 = vmul.f32 %v884_v31, %v1894_v35  ;;  %v897_v39 = vrot.slane %v884_v31, %v1997_v26 }
 0x187   :  { %v890_v41 = vsub.f32 %v886_v33, %v888_v38  ;;  %v904_v40 = vmul.f32 %v1766_v3, %v897_v39  ;;  %v905_v42 = vmul.f32 %v1770_v9, %v897_v39  ;;  %v906_v45 = vmul.f32 %v1774_v15, %v897_v39 }
 0x188   :  { %v907_v46 = vmul.f32 %v1778_v21, %v897_v39  ;;  %v908_v48 = vmul.f32 %v1782_v27, %v897_v39  ;;  %v909_v51 = vmul.f32 %v1788_v34, %v897_v39  ;;  %v910_v52 = vmul.f32 %v1804_v50, %v897_v39 }
 0x189   :  { %v911_v35 = vmul.f32 %v1812_v58, %v897_v39  ;;  %v912_v55 = vmul.f32 %v1824_v12, %v897_v39  ;;  %v913_v56 = vmul.f32 %v1830_v25, %v897_v39  ;;  %v914_v3 = vmul.f32 %v1842_v43, %v897_v39 }
 0x18a   :  { %v941_v9 = vrot.slane %v890_v41, %v1997_v26  ;;  %v915_v15 = vmul.f32 %v1848_v53, %v897_v39  ;;  %v916_v21 = vmul.f32 %v1860_v8, %v897_v39  ;;  %v917_v27 = vmul.f32 %v1868_v24, %v897_v39  ;;  %v879_v53 = vld [vmem:[%s2176_s2 + $0x1] sm:$0x1]  ;;  %v1548_v8 = vpop.eup %1547 }
 0x18b   :  { %v918_v34 = vmul.f32 %v1878_v44, %v897_v39  ;;  %v919_v50 = vmul.f32 %v1884_v59, %v897_v39  ;;  %v885_v33 = vmul.f32 %v1548_v8, %v879_v53 }
 0x18c   :  { %v948_v60 = vadd.f32 %v941_v9, %v904_v40  ;;  %v949_v58 = vadd.f32 %v941_v9, %v905_v42  ;;  %v950_v61 = vadd.f32 %v941_v9, %v906_v45  ;;  %v951_v12 = vadd.f32 %v941_v9, %v907_v46 }
 0x18d   :  { %v952_v1 = vadd.f32 %v941_v9, %v908_v48  ;;  %v953_v25 = vadd.f32 %v941_v9, %v909_v51  ;;  %v954_v2 = vadd.f32 %v941_v9, %v910_v52  ;;  %v955_v43 = vadd.f32 %v941_v9, %v911_v35 }
 0x18e   :  { %v956_v4 = vadd.f32 %v941_v9, %v912_v55  ;;  %v957_v5 = vadd.f32 %v941_v9, %v913_v56  ;;  %v958_v7 = vadd.f32 %v941_v9, %v914_v3  ;;  %v959_v24 = vadd.f32 %v941_v9, %v915_v15 }
 0x18f   :  { %v960_v44 = vadd.f32 %v941_v9, %v916_v21  ;;  %v961_v10 = vadd.f32 %v941_v9, %v917_v27  ;;  %v962_v59 = vadd.f32 %v941_v9, %v918_v34  ;;  %v963_v13 = vadd.f32 %v941_v9, %v919_v50 }
 0x190   :  { %v980_v14 = vmul.f32 0.2, %v948_v60  ;;  %v981_v17 = vmul.f32 0.2, %v949_v58  ;;  %v982_v20 = vmul.f32 0.2, %v950_v61 }
 0x191   :  { %v983_v28 = vmul.f32 0.2, %v951_v12  ;;  %v984_v22 = vmul.f32 0.2, %v952_v1  ;;  %v985_v31 = vmul.f32 0.2, %v953_v25 }
 0x192   :  { %v986_v36 = vmul.f32 0.2, %v954_v2  ;;  %v987_v38 = vmul.f32 0.2, %v955_v43  ;;  %v988_v39 = vmul.f32 0.2, %v956_v4  ;;  %v1012_v41 = vmax.f32 %v948_v60, %v980_v14 }
 0x193   :  { %v989_v40 = vmul.f32 0.2, %v957_v5  ;;  %v990_v42 = vmul.f32 0.2, %v958_v7  ;;  %v991_v45 = vmul.f32 0.2, %v959_v24  ;;  %v1013_v46 = vmax.f32 %v949_v58, %v981_v17 }
 0x194   :  { %v992_v48 = vmul.f32 0.2, %v960_v44  ;;  %v993_v51 = vmul.f32 0.2, %v961_v10  ;;  %v994_v52 = vmul.f32 0.2, %v962_v59  ;;  %v1014_v35 = vmax.f32 %v950_v61, %v982_v20 }
 0x195   :  { %v995_v55 = vmul.f32 0.2, %v963_v13  ;;  %v1015_v56 = vmax.f32 %v951_v12, %v983_v28  ;;  %v1016_v3 = vmax.f32 %v952_v1, %v984_v22  ;;  %v1017_v9 = vmax.f32 %v953_v25, %v985_v31 }
 0x196   :  { %v1018_v15 = vmax.f32 %v954_v2, %v986_v36  ;;  %v1019_v21 = vmax.f32 %v955_v43, %v987_v38  ;;  %v1020_v27 = vmax.f32 %v956_v4, %v988_v39  ;;  %v1021_v34 = vmax.f32 %v957_v5, %v989_v40  ;;  %v2187_v38 = vld [vmem:[#allocation2_spill] sm:$0xff]  ;;  %v2188_v39 = vld [vmem:[#allocation3_spill] sm:$0xff] }
 0x197   :  { %v1022_v50 = vmax.f32 %v958_v7, %v990_v42  ;;  %v1023_v53 = vmax.f32 %v959_v24, %v991_v45  ;;  %v1024_v8 = vmax.f32 %v960_v44, %v992_v48  ;;  %v1025_v60 = vmax.f32 %v961_v10, %v993_v51 }
 0x198   :  { %v1026_v14 = vmax.f32 %v962_v59, %v994_v52  ;;  %v1027_v0 = vmax.f32 %v963_v13, %v995_v55  ;;  %v1305_v49 = vpack.c.bf16 %v1012_v41, %v1012_v41  ;;  %v1306_v58 = vpack.c.bf16 %v1013_v46, %v1013_v46  ;;  %v2189_v41 = vld [vmem:[#allocation4_spill] sm:$0xff] }
 0x199   :  { %v1307_v17 = vpack.c.bf16 %v1014_v35, %v1014_v35  ;;  %v1308_v32 = vpack.c.bf16 %v1015_v56, %v1015_v56  ;;  %v1309_v16 = vpack.c.bf16 %v1016_v3, %v1016_v3  ;;  %v1310_v61 = vpack.c.bf16 %v1017_v9, %v1017_v9 }
 0x19a   :  { %v1311_v20 = vpack.c.bf16 %v1018_v15, %v1018_v15  ;;  %v1312_v12 = vpack.c.bf16 %v1019_v21, %v1019_v21  ;;  %v1313_v1 = vpack.c.bf16 %v1020_v27, %v1020_v27  ;;  %v1314_v25 = vpack.c.bf16 %v1021_v34, %v1021_v34  ;;  %1173 = vst.msk [vmem:[%s2178_s4] sm:$0xf] %vm1172_vm1, %v1305_v49  ;;  %v887_v49 = vld [vmem:[%s2177_s3 + $0x1] sm:$0x1] }
 0x19b   :  { %1174 = vst.msk [vmem:[%s2178_s4 + $0x4] sm:$0xf] %vm1172_vm1, %v1306_v58  ;;  %v1315_v2 = vpack.c.bf16 %v1022_v50, %v1022_v50  ;;  %v1316_v43 = vpack.c.bf16 %v1023_v53, %v1023_v53  ;;  %v1317_v4 = vpack.c.bf16 %v1024_v8, %v1024_v8  ;;  %v1318_v5 = vpack.c.bf16 %v1025_v60, %v1025_v60 }
 0x19c   :  { %1175 = vst.msk [vmem:[%s2178_s4 + $0x8] sm:$0xf] %vm1172_vm1, %v1307_v17  ;;  %1176 = vst.msk [vmem:[%s2178_s4 + $0xc] sm:$0xf] %vm1172_vm1, %v1308_v32  ;;  %v1319_v7 = vpack.c.bf16 %v1026_v14, %v1026_v14  ;;  %v1320_v24 = vpack.c.bf16 %v1027_v0, %v1027_v0  ;;  %v901_v32 = vrot.slane %v885_v33, %v1997_v26 }
 0x19d   :  { %1177 = vst.msk [vmem:[%s2178_s4 + $0x10] sm:$0xf] %vm1172_vm1, %v1309_v16  ;;  %1178 = vst.msk [vmem:[%s2178_s4 + $0x14] sm:$0xf] %vm1172_vm1, %v1310_v61  ;;  %v889_v16 = vmul.f32 %v885_v33, %v1910_v63 }
 0x19e   :  { %1179 = vst.msk [vmem:[%s2178_s4 + $0x18] sm:$0xf] %vm1172_vm1, %v1311_v20  ;;  %1180 = vst.msk [vmem:[%s2178_s4 + $0x1c] sm:$0xf] %vm1172_vm1, %v1312_v12  ;;  %v920_v63 = vmul.f32 %v1768_v6, %v901_v32  ;;  %v921_v44 = vmul.f32 %v1772_v11, %v901_v32  ;;  %v922_v10 = vmul.f32 %v1776_v18, %v901_v32 }
 0x19f   :  { %1181 = vst.msk [vmem:[%s2178_s4 + $0x20] sm:$0xf] %vm1172_vm1, %v1313_v1  ;;  %1182 = vst.msk [vmem:[%s2178_s4 + $0x24] sm:$0xf] %vm1172_vm1, %v1314_v25  ;;  %v891_v0 = vsub.f32 %v887_v49, %v889_v16  ;;  %v923_v59 = vmul.f32 %v1780_v23, %v901_v32  ;;  %v924_v13 = vmul.f32 %v1784_v30, %v901_v32 }
 0x1a0   :  { %1183 = vst.msk [vmem:[%s2178_s4 + $0x28] sm:$0xf] %vm1172_vm1, %v1315_v2  ;;  %1184 = vst.msk [vmem:[%s2178_s4 + $0x2c] sm:$0xf] %vm1172_vm1, %v1316_v43  ;;  %v925_v28 = vmul.f32 %v1792_v37, %v901_v32  ;;  %v926_v22 = vmul.f32 %v1808_v54, %v901_v32  ;;  %v927_v31 = vmul.f32 %v1816_v62, %v901_v32  ;;  %v2190_v62 = vld [vmem:[#allocation5_spill] sm:$0xff] }
 0x1a1   :  { %1185 = vst.msk [vmem:[%s2178_s4 + $0x30] sm:$0xf] %vm1172_vm1, %v1317_v4  ;;  %1186 = vst.msk [vmem:[%s2178_s4 + $0x34] sm:$0xf] %vm1172_vm1, %v1318_v5  ;;  %v928_v33 = vmul.f32 %v1828_v19, %v901_v32  ;;  %v929_v36 = vmul.f32 %v1832_v29, %v901_v32  ;;  %v945_v6 = vrot.slane %v891_v0, %v1997_v26 }
 0x1a2   :  { %1187 = vst.msk [vmem:[%s2178_s4 + $0x38] sm:$0xf] %vm1172_vm1, %v1319_v7  ;;  %1188 = vst.msk [vmem:[%s2178_s4 + $0x3c] sm:$0xf] %vm1172_vm1, %v1320_v24  ;;  %v930_v11 = vmul.f32 %v1844_v47, %v901_v32  ;;  %v931_v18 = vmul.f32 %v1852_v57, %v901_v32  ;;  %v932_v23 = vmul.f32 %v2187_v38, %v901_v32 }
 0x1a3   :  { %v933_v30 = vmul.f32 %v2188_v39, %v901_v32  ;;  %v934_v37 = vmul.f32 %v2189_v41, %v901_v32  ;;  %v964_v40 = vadd.f32 %v945_v6, %v920_v63  ;;  %v965_v54 = vadd.f32 %v945_v6, %v921_v44 }
 0x1a4   :  { %v966_v42 = vadd.f32 %v945_v6, %v922_v10  ;;  %v935_v45 = vmul.f32 %v2190_v62, %v901_v32  ;;  %v967_v19 = vadd.f32 %v945_v6, %v923_v59  ;;  %v968_v46 = vadd.f32 %v945_v6, %v924_v13 }
 0x1a5   :  { %v969_v29 = vadd.f32 %v945_v6, %v925_v28  ;;  %v970_v48 = vadd.f32 %v945_v6, %v926_v22  ;;  %v971_v26 = vadd.f32 %v945_v6, %v927_v31  ;;  %v972_v51 = vadd.f32 %v945_v6, %v928_v33 }
 0x1a6   :  { %v973_v47 = vadd.f32 %v945_v6, %v929_v36  ;;  %v974_v52 = vadd.f32 %v945_v6, %v930_v11  ;;  %v975_v57 = vadd.f32 %v945_v6, %v931_v18  ;;  %v976_v35 = vadd.f32 %v945_v6, %v932_v23 }
 0x1a7   :  { %v977_v55 = vadd.f32 %v945_v6, %v933_v30  ;;  %v978_v56 = vadd.f32 %v945_v6, %v934_v37  ;;  %v996_v3 = vmul.f32 0.2, %v964_v40  ;;  %v997_v9 = vmul.f32 0.2, %v965_v54 }
 0x1a8   :  { %v998_v15 = vmul.f32 0.2, %v966_v42  ;;  %v979_v21 = vadd.f32 %v945_v6, %v935_v45  ;;  %v999_v27 = vmul.f32 0.2, %v967_v19  ;;  %v1000_v34 = vmul.f32 0.2, %v968_v46 }
 0x1a9   :  { %v1001_v50 = vmul.f32 0.2, %v969_v29  ;;  %v1002_v53 = vmul.f32 0.2, %v970_v48  ;;  %v1003_v8 = vmul.f32 0.2, %v971_v26  ;;  %v1028_v14 = vmax.f32 %v964_v40, %v996_v3 }
 0x1aa   :  { %v1004_v60 = vmul.f32 0.2, %v972_v51  ;;  %v1005_v58 = vmul.f32 0.2, %v973_v47  ;;  %v1006_v17 = vmul.f32 0.2, %v974_v52  ;;  %v1029_v20 = vmax.f32 %v965_v54, %v997_v9 }
 0x1ab   :  { %v1007_v61 = vmul.f32 0.2, %v975_v57  ;;  %v1008_v12 = vmul.f32 0.2, %v976_v35  ;;  %v1009_v1 = vmul.f32 0.2, %v977_v55  ;;  %v1030_v2 = vmax.f32 %v966_v42, %v998_v15 }
 0x1ac   :  { %v1010_v25 = vmul.f32 0.2, %v978_v56  ;;  %v1011_v43 = vmul.f32 0.2, %v979_v21  ;;  %v1031_v4 = vmax.f32 %v967_v19, %v999_v27  ;;  %v1032_v5 = vmax.f32 %v968_v46, %v1000_v34 }
 0x1ad   :  { %v1033_v49 = vmax.f32 %v969_v29, %v1001_v50  ;;  %v1034_v7 = vmax.f32 %v970_v48, %v1002_v53  ;;  %v1035_v24 = vmax.f32 %v971_v26, %v1003_v8  ;;  %v1036_v16 = vmax.f32 %v972_v51, %v1004_v60 }
 0x1ae   :  { %v1037_v32 = vmax.f32 %v973_v47, %v1005_v58  ;;  %v1038_v0 = vmax.f32 %v974_v52, %v1006_v17  ;;  %v1039_v63 = vmax.f32 %v975_v57, %v1007_v61  ;;  %v1040_v44 = vmax.f32 %v976_v35, %v1008_v12 }
 0x1af   :  { %v1041_v10 = vmax.f32 %v977_v55, %v1009_v1  ;;  %v1042_v59 = vmax.f32 %v978_v56, %v1010_v25  ;;  %v1043_v13 = vmax.f32 %v979_v21, %v1011_v43  ;;  %v1321_v28 = vpack.c.bf16 %v1028_v14, %v1028_v14 }
 0x1b0   :  { %v1322_v22 = vpack.c.bf16 %v1029_v20, %v1029_v20  ;;  %v1323_v31 = vpack.c.bf16 %v1030_v2, %v1030_v2  ;;  %v1324_v33 = vpack.c.bf16 %v1031_v4, %v1031_v4  ;;  %v1325_v36 = vpack.c.bf16 %v1032_v5, %v1032_v5 }
 0x1b1   :  { %v1326_v6 = vpack.c.bf16 %v1033_v49, %v1033_v49  ;;  %v1327_v11 = vpack.c.bf16 %v1034_v7, %v1034_v7  ;;  %v1328_v18 = vpack.c.bf16 %v1035_v24, %v1035_v24  ;;  %v1329_v38 = vpack.c.bf16 %v1036_v16, %v1036_v16  ;;  %1189 = vst.msk [vmem:[%s2178_s4 + $0x40] sm:$0xf] %vm1172_vm1, %v1321_v28 }
 0x1b2   :  { %v1330_v23 = vpack.c.bf16 %v1037_v32, %v1037_v32  ;;  %1190 = vst.msk [vmem:[%s2178_s4 + $0x44] sm:$0xf] %vm1172_vm1, %v1322_v22  ;;  %v1331_v39 = vpack.c.bf16 %v1038_v0, %v1038_v0  ;;  %v1332_v30 = vpack.c.bf16 %v1039_v63, %v1039_v63  ;;  %v1333_v41 = vpack.c.bf16 %v1040_v44, %v1040_v44 }
 0x1b3   :  { %v1334_v37 = vpack.c.bf16 %v1041_v10, %v1041_v10  ;;  %1191 = vst.msk [vmem:[%s2178_s4 + $0x48] sm:$0xf] %vm1172_vm1, %v1323_v31  ;;  %1192 = vst.msk [vmem:[%s2178_s4 + $0x4c] sm:$0xf] %vm1172_vm1, %v1324_v33  ;;  %v1335_v40 = vpack.c.bf16 %v1042_v59, %v1042_v59  ;;  %v1336_v54 = vpack.c.bf16 %v1043_v13, %v1043_v13 }
 0x1b4   :  { %1193 = vst.msk [vmem:[%s2178_s4 + $0x50] sm:$0xf] %vm1172_vm1, %v1325_v36  ;;  %1194 = vst.msk [vmem:[%s2178_s4 + $0x54] sm:$0xf] %vm1172_vm1, %v1326_v6 }
 0x1b5   :  { %1195 = vst.msk [vmem:[%s2178_s4 + $0x58] sm:$0xf] %vm1172_vm1, %v1327_v11  ;;  %1196 = vst.msk [vmem:[%s2178_s4 + $0x5c] sm:$0xf] %vm1172_vm1, %v1328_v18 }
 0x1b6   :  { %1197 = vst.msk [vmem:[%s2178_s4 + $0x60] sm:$0xf] %vm1172_vm1, %v1329_v38  ;;  %1198 = vst.msk [vmem:[%s2178_s4 + $0x64] sm:$0xf] %vm1172_vm1, %v1330_v23 }
 0x1b7   :  { %1199 = vst.msk [vmem:[%s2178_s4 + $0x68] sm:$0xf] %vm1172_vm1, %v1331_v39  ;;  %1200 = vst.msk [vmem:[%s2178_s4 + $0x6c] sm:$0xf] %vm1172_vm1, %v1332_v30 }
 0x1b8   :  { %1201 = vst.msk [vmem:[%s2178_s4 + $0x70] sm:$0xf] %vm1172_vm1, %v1333_v41  ;;  %1202 = vst.msk [vmem:[%s2178_s4 + $0x74] sm:$0xf] %vm1172_vm1, %v1334_v37 }
 0x1b9   :  { %1203 = vst.msk [vmem:[%s2178_s4 + $0x78] sm:$0xf] %vm1172_vm1, %v1335_v40  ;;  %1204 = vst.msk [vmem:[%s2178_s4 + $0x7c] sm:$0xf] %vm1172_vm1, %v1336_v54 }

// kernel: _lambda_.7
= control target key start
LH: loop header
LB: loop body
LE: loop exit
PB: predicated region body
PF: predicated region fallthrough
CT: control target
= control target key end

     0   :  { %vm822_vm0 = vcmask 523264   ;;  %vm998_vm1 = vcmask 519168   ;;  %s1696_s1 = inlined_call_operand.vmem [shape: bf16[2,512,64], index: 1, kind: input, shape index: {}]   ;;  %s1697_s0 = inlined_call_operand.vmem [shape: bf16[2,32,512], index: 0, kind: input, shape index: {}]   ;;  %s1698_s2 = inlined_call_operand.vmem [shape: f32[2,1,64], index: 2, kind: input, shape index: {}]   ;;  %s1699_s3 = inlined_call_operand.vmem [shape: f32[2,1,64], index: 3, kind: input, shape index: {}]   ;;  %s1700_s4 = inlined_call_operand.vmem [shape: bf16[2,32,64], index: 4, kind: output, shape index: {}]  }
   0x1   :  { %v1219_v0 = vld [vmem:[%s1696_s1 + $0x40] sm:$0xff]   ;;  %v1223_v4 = vld [vmem:[%s1696_s1 + $0x48] sm:$0xff]   ;;  %v1227_v8 = vld [vmem:[%s1696_s1 + $0x50] sm:$0xff]  }
   0x2   :  { %v1220_v1 = vld [vmem:[%s1696_s1 + $0xc0] sm:$0xff]   ;;  %1107 = vmatprep.subr.bf16.mxu0 %v1219_v0  ;;  %v1224_v5 = vld [vmem:[%s1696_s1 + $0xc8] sm:$0xff]   ;;  %v1228_v9 = vld [vmem:[%s1696_s1 + $0xd0] sm:$0xff]  }
   0x3   :  { %v1221_v2 = vld [vmem:[%s1696_s1] sm:$0xff]   ;;  %1135 = vmatprep.subr.bf16.mxu1 %v1220_v1  ;;  %v1225_v6 = vld [vmem:[%s1696_s1 + $0x8] sm:$0xff]   ;;  %v1229_v10 = vld [vmem:[%s1696_s1 + $0x10] sm:$0xff]  }
   0x4   :  { %v1222_v3 = vld [vmem:[%s1696_s1 + $0x80] sm:$0xff]   ;;  %1108 = vmatpush3.bf16.msra.mxu0 %v1221_v2  ;;  %v1226_v7 = vld [vmem:[%s1696_s1 + $0x88] sm:$0xff]   ;;  %v1230_v11 = vld [vmem:[%s1696_s1 + $0x90] sm:$0xff]  }
   0x5   :  { %1136 = vmatpush3.bf16.msra.mxu1 %v1222_v3  ;;  %1109 = vmatprep.subr.bf16.mxu0 %v1223_v4  ;;  %v1231_v12 = vld [vmem:[%s1696_s1 + $0x58] sm:$0xff]   ;;  %v1235_v16 = vld [vmem:[%s1696_s1 + $0x60] sm:$0xff]   ;;  %v1239_v20 = vld [vmem:[%s1696_s1 + $0x68] sm:$0xff]  }
   0x6   :  { %1137 = vmatprep.subr.bf16.mxu1 %v1224_v5  ;;  %v1232_v13 = vld [vmem:[%s1696_s1 + $0xd8] sm:$0xff]   ;;  %v1236_v17 = vld [vmem:[%s1696_s1 + $0xe0] sm:$0xff]   ;;  %v1240_v21 = vld [vmem:[%s1696_s1 + $0xe8] sm:$0xff]  }
   0x7   :  { %v1233_v14 = vld [vmem:[%s1696_s1 + $0x18] sm:$0xff]   ;;  %v1237_v18 = vld [vmem:[%s1696_s1 + $0x20] sm:$0xff]   ;;  %v1241_v22 = vld [vmem:[%s1696_s1 + $0x28] sm:$0xff]  }
   0x8   :  { %1110 = vmatpush3.bf16.msra.mxu0 %v1225_v6  ;;  %v1234_v15 = vld [vmem:[%s1696_s1 + $0x98] sm:$0xff]   ;;  %v1238_v19 = vld [vmem:[%s1696_s1 + $0xa0] sm:$0xff]   ;;  %v1242_v23 = vld [vmem:[%s1696_s1 + $0xa8] sm:$0xff]  }
   0x9   :  { %1138 = vmatpush3.bf16.msra.mxu1 %v1226_v7  ;;  %1111 = vmatprep.subr.bf16.mxu0 %v1227_v8  ;;  %v1243_v24 = vld [vmem:[%s1696_s1 + $0x70] sm:$0xff]   ;;  %v1247_v28 = vld [vmem:[%s1696_s1 + $0x78] sm:$0xff]   ;;  %v1257_v36 = vld [vmem:[%s1696_s1 + $0x140] sm:$0xff]  }
   0xa   :  { %1139 = vmatprep.subr.bf16.mxu1 %v1228_v9  ;;  %v1244_v25 = vld [vmem:[%s1696_s1 + $0xf0] sm:$0xff]   ;;  %v1248_v29 = vld [vmem:[%s1696_s1 + $0xf8] sm:$0xff]   ;;  %v1258_v37 = vld [vmem:[%s1696_s1 + $0x1c0] sm:$0xff]  }
   0xb   :  { %v1245_v26 = vld [vmem:[%s1696_s1 + $0x30] sm:$0xff]   ;;  %v1249_v30 = vld [vmem:[%s1696_s1 + $0x38] sm:$0xff]   ;;  %v1259_v38 = vld [vmem:[%s1696_s1 + $0x100] sm:$0xff]  }
   0xc   :  { %1112 = vmatpush3.bf16.msra.mxu0 %v1229_v10  ;;  %v1246_v27 = vld [vmem:[%s1696_s1 + $0xb0] sm:$0xff]   ;;  %v1250_v31 = vld [vmem:[%s1696_s1 + $0xb8] sm:$0xff]   ;;  %v1260_v39 = vld [vmem:[%s1696_s1 + $0x180] sm:$0xff]  }
   0xd   :  { %1140 = vmatpush3.bf16.msra.mxu1 %v1230_v11  ;;  %1113 = vmatprep.subr.bf16.mxu0 %v1231_v12  ;;  %v1251_v32 = vld [vmem:[%s1697_s0] ss:$16 sps:$4 sm:$0xff]   ;;  %v1253_v33 = vld [vmem:[%s1697_s0 + $0x4] ss:$16 sps:$4 sm:$0xff]   ;;  %v1254_v34 = vld [vmem:[%s1697_s0 + $0x8] ss:$16 sps:$4 sm:$0xff]  }
   0xe   :  { %1141 = vmatprep.subr.bf16.mxu1 %v1232_v13  ;;  %v1256_v35 = vld [vmem:[%s1697_s0 + $0xc] ss:$16 sps:$4 sm:$0xff]   ;;  %426 = vmatprep.mubr.bf16.mxu0 %v1253_v33  ;;  %v1265_v44 = vld [vmem:[%s1697_s0 + $0x24] ss:$16 sps:$4 sm:$0xff]   ;;  %v1269_v46 = vld [vmem:[%s1697_s0 + $0x20] ss:$16 sps:$4 sm:$0xff]  }
   0xf   :  { %475 = vmatprep.mubr.bf16.mxu1 %v1256_v35  ;;  %v1261_v40 = vld [vmem:[%s1696_s1 + $0x148] sm:$0xff]   ;;  %v1271_v48 = vld [vmem:[%s1696_s1 + $0x150] sm:$0xff]   ;;  %v1275_v52 = vld [vmem:[%s1696_s1 + $0x158] sm:$0xff]  }
  0x10   :  { %1114 = vmatpush3.bf16.msra.mxu0 %v1233_v14  ;;  %v1262_v41 = vld [vmem:[%s1696_s1 + $0x1c8] sm:$0xff]   ;;  %v1272_v49 = vld [vmem:[%s1696_s1 + $0x1d0] sm:$0xff]   ;;  %v1276_v53 = vld [vmem:[%s1696_s1 + $0x1d8] sm:$0xff]  }
  0x11   :  { %1142 = vmatpush3.bf16.msra.mxu1 %v1234_v15  ;;  %1115 = vmatprep.subr.bf16.mxu0 %v1235_v16  ;;  %v1263_v42 = vld [vmem:[%s1696_s1 + $0x108] sm:$0xff]   ;;  %v1273_v50 = vld [vmem:[%s1696_s1 + $0x110] sm:$0xff]   ;;  %v1277_v54 = vld [vmem:[%s1696_s1 + $0x118] sm:$0xff]  }
  0x12   :  { %1143 = vmatprep.subr.bf16.mxu1 %v1236_v17  ;;  %v1264_v43 = vld [vmem:[%s1696_s1 + $0x188] sm:$0xff]   ;;  %v1274_v51 = vld [vmem:[%s1696_s1 + $0x190] sm:$0xff]   ;;  %v1278_v55 = vld [vmem:[%s1696_s1 + $0x198] sm:$0xff]  }
  0x13   :  { %v1267_v45 = vld [vmem:[%s1697_s0 + $0x2c] ss:$16 sps:$4 sm:$0xff]   ;;  %v1270_v47 = vld [vmem:[%s1697_s0 + $0x28] ss:$16 sps:$4 sm:$0xff]   ;;  %v1279_v56 = vld [vmem:[%s1696_s1 + $0x160] sm:$0xff]  }
  0x14   :  { %1116 = vmatpush3.bf16.msra.mxu0 %v1237_v18  ;;  %v1280_v57 = vld [vmem:[%s1696_s1 + $0x1e0] sm:$0xff]   ;;  %v1283_v60 = vld [vmem:[%s1696_s1 + $0x168] sm:$0xff]   ;;  %v1287_v0 = vld [vmem:[%s1696_s1 + $0x170] sm:$0xff]  }
  0x15   :  { %1144 = vmatpush3.bf16.msra.mxu1 %v1238_v19  ;;  %1117 = vmatprep.subr.bf16.mxu0 %v1239_v20  ;;  %v1281_v58 = vld [vmem:[%s1696_s1 + $0x120] sm:$0xff]   ;;  %v1284_v61 = vld [vmem:[%s1696_s1 + $0x1e8] sm:$0xff]   ;;  %v1288_v1 = vld [vmem:[%s1696_s1 + $0x1f0] sm:$0xff]  }
  0x16   :  { %1145 = vmatprep.subr.bf16.mxu1 %v1240_v21  ;;  %v1282_v59 = vld [vmem:[%s1696_s1 + $0x1a0] sm:$0xff]   ;;  %v1285_v62 = vld [vmem:[%s1696_s1 + $0x128] sm:$0xff]   ;;  %v1289_v2 = vld [vmem:[%s1696_s1 + $0x130] sm:$0xff]  }
  0x17   :  { %v1286_v63 = vld [vmem:[%s1696_s1 + $0x1a8] sm:$0xff]   ;;  %v1290_v3 = vld [vmem:[%s1696_s1 + $0x1b0] sm:$0xff]   ;;  %v1291_v4 = vld [vmem:[%s1696_s1 + $0x178] sm:$0xff]  }
  0x18   :  { %1118 = vmatpush3.bf16.msra.mxu0 %v1241_v22  ;;  %v1292_v5 = vld [vmem:[%s1696_s1 + $0x1f8] sm:$0xff]   ;;  %v1295_v8 = vld [vmem:[%s1697_s0 + $0x40] ss:$16 sps:$4 sm:$0xff]   ;;  %v1297_v9 = vld [vmem:[%s1697_s0 + $0x44] ss:$16 sps:$4 sm:$0xff]  }
  0x19   :  { %1146 = vmatpush3.bf16.msra.mxu1 %v1242_v23  ;;  %1119 = vmatprep.subr.bf16.mxu0 %v1243_v24  ;;  %v1293_v6 = vld [vmem:[%s1696_s1 + $0x138] sm:$0xff]   ;;  %v1301_v12 = vld [vmem:[%s1697_s0 + $0x64] ss:$16 sps:$4 sm:$0xff]   ;;  %v1305_v14 = vld [vmem:[%s1697_s0 + $0x60] ss:$16 sps:$4 sm:$0xff]  }
  0x1a   :  { %1147 = vmatprep.subr.bf16.mxu1 %v1244_v25  ;;  %v1294_v7 = vld [vmem:[%s1696_s1 + $0x1b8] sm:$0xff]  }
  0x1b   :  { %v1298_v10 = vld [vmem:[%s1697_s0 + $0x48] ss:$16 sps:$4 sm:$0xff]   ;;  %v1300_v11 = vld [vmem:[%s1697_s0 + $0x4c] ss:$16 sps:$4 sm:$0xff]  }
  0x1c   :  { %1120 = vmatpush3.bf16.msra.mxu0 %v1245_v26  ;;  %v1303_v13 = vld [vmem:[%s1697_s0 + $0x6c] ss:$16 sps:$4 sm:$0xff]   ;;  %v1306_v15 = vld [vmem:[%s1697_s0 + $0x68] ss:$16 sps:$4 sm:$0xff]  }
  0x1d   :  { %1148 = vmatpush3.bf16.msra.mxu1 %v1246_v27  ;;  %1121 = vmatprep.subr.bf16.mxu0 %v1247_v28 }
  0x1e   :  { %1149 = vmatprep.subr.bf16.mxu1 %v1248_v29 }
  0x20   :  { %1122 = vmatpush3.bf16.msra.mxu0 %v1249_v30 }
  0x21   :  { %1150 = vmatpush3.bf16.msra.mxu1 %v1250_v31  ;;  %1163 = vmatprep.subr.bf16.mxu0 %v1257_v36 }
  0x22   :  { %1191 = vmatprep.subr.bf16.mxu1 %v1258_v37 }
  0x23   :  { %427 = vmatmul.mubr.bf16.vlgmr.msra.gmra.mrb[0].mxu0 %v1251_v32 }
  0x24   :  { %476 = vmatmul.mubr.bf16.vlgmr.msra.gmra.mrb[0].mxu1 %v1254_v34  ;;  %1164 = vmatpush3.bf16.msra.mxu0 %v1259_v38 }
  0x25   :  { %1192 = vmatpush3.bf16.msra.mxu1 %v1260_v39  ;;  %1165 = vmatprep.subr.bf16.mxu0 %v1261_v40 }
  0x26   :  { %1193 = vmatprep.subr.bf16.mxu1 %v1262_v41  ;;  %434 = vmatprep.mubr.bf16.mxu0 %v1265_v44 }
  0x27   :  { %483 = vmatprep.mubr.bf16.mxu1 %v1267_v45 }
  0x28   :  { %1166 = vmatpush3.bf16.msra.mxu0 %v1263_v42 }
  0x29   :  { %1194 = vmatpush3.bf16.msra.mxu1 %v1264_v43  ;;  %1167 = vmatprep.subr.bf16.mxu0 %v1271_v48 }
  0x2a   :  { %1195 = vmatprep.subr.bf16.mxu1 %v1272_v49 }
  0x2b   :  { %435 = vmatmul.mubr.bf16.gmra.mrb[4].mxu0 %v1269_v46 }
  0x2c   :  { %484 = vmatmul.mubr.bf16.gmra.mrb[4].mxu1 %v1270_v47  ;;  %1168 = vmatpush3.bf16.msra.mxu0 %v1273_v50 }
  0x2d   :  { %1196 = vmatpush3.bf16.msra.mxu1 %v1274_v51  ;;  %1169 = vmatprep.subr.bf16.mxu0 %v1275_v52 }
  0x2e   :  { %1197 = vmatprep.subr.bf16.mxu1 %v1276_v53  ;;  %756 = vmatprep.mubr.bf16.mxu0 %v1297_v9 }
  0x2f   :  { %805 = vmatprep.mubr.bf16.mxu1 %v1300_v11 }
  0x30   :  { %1170 = vmatpush3.bf16.msra.mxu0 %v1277_v54 }
  0x31   :  { %1198 = vmatpush3.bf16.msra.mxu1 %v1278_v55  ;;  %1171 = vmatprep.subr.bf16.mxu0 %v1279_v56 }
  0x32   :  { %1199 = vmatprep.subr.bf16.mxu1 %v1280_v57 }
  0x34   :  { %1172 = vmatpush3.bf16.msra.mxu0 %v1281_v58 }
  0x35   :  { %1200 = vmatpush3.bf16.msra.mxu1 %v1282_v59  ;;  %1173 = vmatprep.subr.bf16.mxu0 %v1283_v60 }
  0x36   :  { %1201 = vmatprep.subr.bf16.mxu1 %v1284_v61 }
  0x38   :  { %1174 = vmatpush3.bf16.msra.mxu0 %v1285_v62 }
  0x39   :  { %1202 = vmatpush3.bf16.msra.mxu1 %v1286_v63  ;;  %1175 = vmatprep.subr.bf16.mxu0 %v1287_v0 }
  0x3a   :  { %1203 = vmatprep.subr.bf16.mxu1 %v1288_v1 }
  0x3c   :  { %1176 = vmatpush3.bf16.msra.mxu0 %v1289_v2 }
  0x3d   :  { %1204 = vmatpush3.bf16.msra.mxu1 %v1290_v3  ;;  %1177 = vmatprep.subr.bf16.mxu0 %v1291_v4 }
  0x3e   :  { %1205 = vmatprep.subr.bf16.mxu1 %v1292_v5 }
  0x40   :  { %1178 = vmatpush3.bf16.msra.mxu0 %v1293_v6 }
  0x41   :  { %1206 = vmatpush3.bf16.msra.mxu1 %v1294_v7 }
  0x43   :  { %757 = vmatmul.mubr.bf16.vlgmr.msra.gmra.mrb[8].mxu0 %v1295_v8 }
  0x44   :  { %806 = vmatmul.mubr.bf16.vlgmr.msra.gmra.mrb[8].mxu1 %v1298_v10  ;;  %764 = vmatprep.mubr.bf16.mxu0 %v1301_v12 }
  0x45   :  { %813 = vmatprep.mubr.bf16.mxu1 %v1303_v13 }
  0x4b   :  { %765 = vmatmul.mubr.bf16.gmra.mrb[12].mxu0 %v1305_v14 }
  0x4c   :  { %814 = vmatmul.mubr.bf16.gmra.mrb[12].mxu1 %v1306_v15 }
  0xf6   :  { %v1123_v16 = vpop.f32.mrb[0].mxu0 }
  0xf7   :  { %v1151_v17 = vpop.f32.mrb[0].mxu1  ;;  %v1124_v18 = vpop.f32.mrb[1].mxu0 }
  0xf8   :  { %v1125_v19 = vadd.f32 %v1124_v18, %v1123_v16  ;;  %v1152_v20 = vpop.f32.mrb[1].mxu1  ;;  %v1126_v21 = vpop.f32.mrb[2].mxu0 }
  0xf9   :  { %v1153_v22 = vadd.f32 %v1152_v20, %v1151_v17  ;;  %v1154_v23 = vpop.f32.mrb[2].mxu1  ;;  %v1127_v24 = vpop.f32.mrb[3].mxu0 }
  0xfa   :  { %v1128_v25 = vadd.f32 %v1127_v24, %v1126_v21  ;;  %v1155_v26 = vpop.f32.mrb[3].mxu1 }
  0xfb   :  { %v1576_v27 = vadd.f32 %v1153_v22, %v1125_v19  ;;  %v1156_v28 = vadd.f32 %v1155_v26, %v1154_v23 }
  0xfd   :  { %v1578_v29 = vadd.f32 %v1156_v28, %v1128_v25  ;;  %v823_v42 = vsel %vm822_vm0, %v1576_v27, 0.0 }
  0xfe   :  { %v1129_v30 = vpop.f32.mrb[4].mxu0 }
  0xff   :  { %v1157_v31 = vpop.f32.mrb[4].mxu1  ;;  %v1130_v32 = vpop.f32.mrb[5].mxu0  ;;  %v824_v36 = vsel %vm822_vm0, %v1578_v29, 0.0 }
 0x100   :  { %v1131_v33 = vadd.f32 %v1130_v32, %v1129_v30  ;;  %v1158_v34 = vpop.f32.mrb[5].mxu1  ;;  %v1132_v35 = vpop.f32.mrb[6].mxu0  ;;  %v825_v45 = vadd.f32 %v824_v36, %v823_v42 }
 0x101   :  { %v1159_v37 = vadd.f32 %v1158_v34, %v1157_v31  ;;  %v1160_v38 = vpop.f32.mrb[6].mxu1  ;;  %v1133_v39 = vpop.f32.mrb[7].mxu0 }
 0x102   :  { %v1134_v40 = vadd.f32 %v1133_v39, %v1132_v35  ;;  %v1161_v41 = vpop.f32.mrb[7].mxu1 }
 0x103   :  { %v1584_v43 = vadd.f32 %v1159_v37, %v1131_v33  ;;  %v1162_v44 = vadd.f32 %v1161_v41, %v1160_v38 }
 0x105   :  { %v826_v46 = vsel %vm822_vm0, %v1584_v43, 0.0  ;;  %v1588_v47 = vadd.f32 %v1162_v44, %v1134_v40 }
 0x106   :  { %v827_v48 = vadd.f32 %v826_v46, %v825_v45 }
 0x107   :  { %v828_v49 = vsel %vm822_vm0, %v1588_v47, 0.0 }
 0x108   :  { %v829_v50 = vadd.f32 %v828_v49, %v827_v48 }
 0x10a   :  { %v830_v51 = vrot.slane %v829_v50, 4 }
 0x10c   :  { %v831_v52 = vadd.f32 %v830_v51, %v829_v50 }
 0x10e   :  { %v832_v53 = vrot.slane %v831_v52, 2 }
 0x110   :  { %v833_v54 = vadd.f32 %v832_v53, %v831_v52 }
 0x112   :  { %v834_v55 = vrot.slane %v833_v54, 1 }
 0x114   :  { %v835_v56 = vadd.f32 %v834_v55, %v833_v54 }
 0x116   :  { %v1592_v57 = vmul.f32 0.03125, %v835_v56  ;;  %v1179_v62 = vpop.f32.mrb[8].mxu0 }
 0x117   :  { %v1207_v2 = vpop.f32.mrb[8].mxu1  ;;  %v1180_v3 = vpop.f32.mrb[9].mxu0 }
 0x118   :  { %v852_v58 = vsub.f32 %v1576_v27, %v1592_v57  ;;  %v853_v59 = vsub.f32 %v1578_v29, %v1592_v57  ;;  %v854_v60 = vsub.f32 %v1584_v43, %v1592_v57  ;;  %v855_v61 = vsub.f32 %v1588_v47, %v1592_v57  ;;  %v1208_v5 = vpop.f32.mrb[9].mxu1  ;;  %v1182_v6 = vpop.f32.mrb[10].mxu0 }
 0x119   :  { %v1181_v4 = vadd.f32 %v1180_v3, %v1179_v62  ;;  %v1210_v10 = vpop.f32.mrb[10].mxu1  ;;  %v1183_v11 = vpop.f32.mrb[11].mxu0  ;;  %v1209_v13 = vadd.f32 %v1208_v5, %v1207_v2  ;;  %v896_v2 = vld [vmem:[%s1698_s2] sm:$0x1] }
 0x11a   :  { %v860_v63 = vmul.f32 %v852_v58, %v852_v58  ;;  %v861_v0 = vmul.f32 %v853_v59, %v853_v59  ;;  %v862_v1 = vmul.f32 %v854_v60, %v854_v60  ;;  %v863_v7 = vmul.f32 %v855_v61, %v855_v61  ;;  %v1211_v15 = vpop.f32.mrb[11].mxu1 }
 0x11b   :  { %v1184_v14 = vadd.f32 %v1183_v11, %v1182_v6  ;;  %v1212_v17 = vadd.f32 %v1211_v15, %v1210_v10  ;;  %v1605_v19 = vadd.f32 %v1209_v13, %v1181_v4  ;;  %v912_v61 = vlaneseq  ;;  %v904_v13 = vld [vmem:[%s1699_s3] sm:$0x1] }
 0x11c   :  { %v868_v8 = vsel %vm822_vm0, %v860_v63, 0.0  ;;  %v869_v9 = vsel %vm822_vm0, %v861_v0, 0.0  ;;  %v871_v16 = vsel %vm822_vm0, %v862_v1, 0.0  ;;  %v873_v20 = vsel %vm822_vm0, %v863_v7, 0.0 }
 0x11d   :  { %v870_v12 = vadd.f32 %v869_v9, %v868_v8  ;;  %v1608_v21 = vadd.f32 %v1212_v17, %v1184_v14  ;;  %v836_v39 = vsel %vm822_vm0, %v1605_v19, 0.0  ;;  %v913_v0 = vshrl.u32 %v912_v61, 7  ;;  %v905_v61 = vld [vmem:[%s1699_s3 + $0x1] sm:$0x1] }
 0x11e   :  { %v1185_v23 = vpop.f32.mrb[12].mxu0 }
 0x11f   :  { %v872_v18 = vadd.f32 %v871_v16, %v870_v12  ;;  %v1213_v24 = vpop.f32.mrb[12].mxu1  ;;  %v1186_v25 = vpop.f32.mrb[13].mxu0  ;;  %v837_v32 = vsel %vm822_vm0, %v1608_v21, 0.0  ;;  %v1635_v7 = vsub.s32 0, %v913_v0 }
 0x120   :  { %v1187_v28 = vadd.f32 %v1186_v25, %v1185_v23  ;;  %v1214_v30 = vpop.f32.mrb[13].mxu1  ;;  %v1188_v31 = vpop.f32.mrb[14].mxu0  ;;  %v838_v44 = vadd.f32 %v837_v32, %v836_v39 }
 0x121   :  { %v874_v22 = vadd.f32 %v873_v20, %v872_v18  ;;  %v1215_v33 = vadd.f32 %v1214_v30, %v1213_v24  ;;  %v1216_v34 = vpop.f32.mrb[14].mxu1  ;;  %v1189_v35 = vpop.f32.mrb[15].mxu0 }
 0x122   :  { %v1190_v37 = vadd.f32 %v1189_v35, %v1188_v31  ;;  %v1217_v38 = vpop.f32.mrb[15].mxu1 }
 0x123   :  { %v875_v26 = vrot.slane %v874_v22, 4  ;;  %v1614_v40 = vadd.f32 %v1215_v33, %v1187_v28  ;;  %v1218_v41 = vadd.f32 %v1217_v38, %v1216_v34 }
 0x125   :  { %v876_v36 = vadd.f32 %v875_v26, %v874_v22  ;;  %v839_v45 = vsel %vm822_vm0, %v1614_v40, 0.0  ;;  %v1618_v46 = vadd.f32 %v1218_v41, %v1190_v37 }
 0x126   :  { %v840_v49 = vadd.f32 %v839_v45, %v838_v44 }
 0x127   :  { %v877_v42 = vrot.slane %v876_v36, 2  ;;  %v841_v50 = vsel %vm822_vm0, %v1618_v46, 0.0 }
 0x128   :  { %v842_v52 = vadd.f32 %v841_v50, %v840_v49 }
 0x129   :  { %v878_v48 = vadd.f32 %v877_v42, %v876_v36 }
 0x12a   :  { %v843_v54 = vrot.slane %v842_v52, 4 }
 0x12b   :  { %v879_v51 = vrot.slane %v878_v48, 1 }
 0x12c   :  { %v844_v56 = vadd.f32 %v843_v54, %v842_v52 }
 0x12d   :  { %v880_v53 = vadd.f32 %v879_v51, %v878_v48 }
 0x12e   :  { %v845_v59 = vrot.slane %v844_v56, 2 }
 0x12f   :  { %v894_v55 = vmul.f32 0.03125, %v880_v53 }
 0x130   :  { %v846_v60 = vadd.f32 %v845_v59, %v844_v56 }
 0x131   :  { %v898_v58 = vadd.f32 1e-05, %v894_v55 }
 0x132   :  { %v847_v62 = vrot.slane %v846_v60, 1 }
 0x133   :  { %1307 = vrsqrt.f32 %v898_v58  ;;  %v897_v58 = vld [vmem:[%s1698_s2 + $0x1] sm:$0x1] }
 0x134   :  { %v848_v63 = vadd.f32 %v847_v62, %v846_v60 }
 0x136   :  { %v1622_v1 = vmul.f32 0.03125, %v848_v63 }
 0x138   :  { %v856_v3 = vsub.f32 %v1605_v19, %v1622_v1  ;;  %v857_v4 = vsub.f32 %v1608_v21, %v1622_v1  ;;  %v858_v5 = vsub.f32 %v1614_v40, %v1622_v1  ;;  %v859_v6 = vsub.f32 %v1618_v46, %v1622_v1 }
 0x13a   :  { %v864_v9 = vmul.f32 %v856_v3, %v856_v3  ;;  %v865_v10 = vmul.f32 %v857_v4, %v857_v4  ;;  %v866_v12 = vmul.f32 %v858_v5, %v858_v5  ;;  %v867_v18 = vmul.f32 %v859_v6, %v859_v6 }
 0x13c   :  { %v881_v14 = vsel %vm822_vm0, %v864_v9, 0.0  ;;  %v882_v15 = vsel %vm822_vm0, %v865_v10, 0.0  ;;  %v884_v24 = vsel %vm822_vm0, %v866_v12, 0.0 }
 0x13d   :  { %v1308_v8 = vpop.eup %1307  ;;  %v883_v20 = vadd.f32 %v882_v15, %v881_v14 }
 0x13e   :  { %v902_v11 = vmul.f32 %v1308_v8, %v896_v2 }
 0x13f   :  { %v885_v26 = vadd.f32 %v884_v24, %v883_v20 }
 0x140   :  { %v906_v16 = vmul.f32 %v902_v11, %v1592_v57  ;;  %v915_v17 = vrot.slane %v902_v11, %v1635_v7  ;;  %v886_v57 = vsel %vm822_vm0, %v867_v18, 0.0 }
 0x141   :  { %v887_v32 = vadd.f32 %v886_v57, %v885_v26 }
 0x142   :  { %v908_v22 = vsub.f32 %v904_v13, %v906_v16  ;;  %v924_v23 = vmul.f32 %v915_v17, %v1584_v43  ;;  %v925_v25 = vmul.f32 %v915_v17, %v1588_v47  ;;  %v922_v28 = vmul.f32 %v915_v17, %v1576_v27 }
 0x143   :  { %v923_v30 = vmul.f32 %v915_v17, %v1578_v29  ;;  %v888_v37 = vrot.slane %v887_v32, 4 }
 0x144   :  { %v935_v31 = vrot.slane %v908_v22, %v1635_v7 }
 0x145   :  { %v889_v47 = vadd.f32 %v888_v37, %v887_v32 }
 0x146   :  { %v942_v33 = vadd.f32 %v935_v31, %v922_v28  ;;  %v943_v34 = vadd.f32 %v935_v31, %v923_v30  ;;  %v944_v35 = vadd.f32 %v935_v31, %v924_v23  ;;  %v945_v36 = vadd.f32 %v935_v31, %v925_v25 }
 0x147   :  { %v890_v29 = vrot.slane %v889_v47, 2 }
 0x148   :  { %v950_v43 = vmul.f32 0.2, %v942_v33  ;;  %v951_v38 = vmul.f32 0.2, %v943_v34  ;;  %v952_v39 = vmul.f32 0.2, %v944_v35 }
 0x149   :  { %v953_v41 = vmul.f32 0.2, %v945_v36  ;;  %v891_v52 = vadd.f32 %v890_v29, %v889_v47 }
 0x14a   :  { %v958_v42 = vmax.f32 %v942_v33, %v950_v43  ;;  %v959_v44 = vmax.f32 %v943_v34, %v951_v38  ;;  %v960_v27 = vmax.f32 %v944_v35, %v952_v39 }
 0x14b   :  { %v961_v45 = vmax.f32 %v945_v36, %v953_v41  ;;  %v892_v53 = vrot.slane %v891_v52, 1 }
 0x14c   :  { %v1099_v48 = vpack.c.bf16 %v958_v42, %v958_v42  ;;  %v1100_v49 = vpack.c.bf16 %v959_v44, %v959_v44  ;;  %v1101_v50 = vpack.c.bf16 %v960_v27, %v960_v27 }
 0x14d   :  { %v1102_v51 = vpack.c.bf16 %v961_v45, %v961_v45  ;;  %v893_v54 = vadd.f32 %v892_v53, %v891_v52 }
 0x14e   :  { %999 = vst.msk [vmem:[%s1700_s4] sm:$0xf] %vm998_vm1, %v1099_v48  ;;  %1000 = vst.msk [vmem:[%s1700_s4 + $0x4] sm:$0xf] %vm998_vm1, %v1100_v49 }
 0x14f   :  { %1001 = vst.msk [vmem:[%s1700_s4 + $0x8] sm:$0xf] %vm998_vm1, %v1101_v50  ;;  %1002 = vst.msk [vmem:[%s1700_s4 + $0xc] sm:$0xf] %vm998_vm1, %v1102_v51  ;;  %v895_v55 = vmul.f32 0.03125, %v893_v54 }
 0x151   :  { %v899_v56 = vadd.f32 1e-05, %v895_v55 }
 0x153   :  { %1309 = vrsqrt.f32 %v899_v56 }
 0x15d   :  { %v1310_v59 = vpop.eup %1309 }
 0x15e   :  { %v903_v60 = vmul.f32 %v1310_v59, %v897_v58 }
 0x160   :  { %v907_v62 = vmul.f32 %v903_v60, %v1622_v1  ;;  %v919_v63 = vrot.slane %v903_v60, %v1635_v7 }
 0x162   :  { %v909_v0 = vsub.f32 %v905_v61, %v907_v62  ;;  %v928_v2 = vmul.f32 %v919_v63, %v1614_v40  ;;  %v929_v3 = vmul.f32 %v919_v63, %v1618_v46  ;;  %v926_v4 = vmul.f32 %v919_v63, %v1605_v19 }
 0x163   :  { %v927_v5 = vmul.f32 %v919_v63, %v1608_v21 }
 0x164   :  { %v939_v6 = vrot.slane %v909_v0, %v1635_v7 }
 0x166   :  { %v946_v8 = vadd.f32 %v939_v6, %v926_v4  ;;  %v947_v9 = vadd.f32 %v939_v6, %v927_v5  ;;  %v948_v10 = vadd.f32 %v939_v6, %v928_v2  ;;  %v949_v11 = vadd.f32 %v939_v6, %v929_v3 }
 0x168   :  { %v954_v12 = vmul.f32 0.2, %v946_v8  ;;  %v955_v13 = vmul.f32 0.2, %v947_v9  ;;  %v956_v1 = vmul.f32 0.2, %v948_v10 }
 0x169   :  { %v957_v14 = vmul.f32 0.2, %v949_v11 }
 0x16a   :  { %v962_v15 = vmax.f32 %v946_v8, %v954_v12  ;;  %v963_v16 = vmax.f32 %v947_v9, %v955_v13  ;;  %v964_v17 = vmax.f32 %v948_v10, %v956_v1 }
 0x16b   :  { %v965_v40 = vmax.f32 %v949_v11, %v957_v14 }
 0x16c   :  { %v1103_v18 = vpack.c.bf16 %v962_v15, %v962_v15  ;;  %v1104_v46 = vpack.c.bf16 %v963_v16, %v963_v16  ;;  %v1105_v20 = vpack.c.bf16 %v964_v17, %v964_v17 }
 0x16d   :  { %v1106_v19 = vpack.c.bf16 %v965_v40, %v965_v40 }
 0x16e   :  { %1003 = vst.msk [vmem:[%s1700_s4 + $0x10] sm:$0xf] %vm998_vm1, %v1103_v18  ;;  %1004 = vst.msk [vmem:[%s1700_s4 + $0x14] sm:$0xf] %vm998_vm1, %v1104_v46 }
 0x16f   :  { %1005 = vst.msk [vmem:[%s1700_s4 + $0x18] sm:$0xf] %vm998_vm1, %v1105_v20  ;;  %1006 = vst.msk [vmem:[%s1700_s4 + $0x1c] sm:$0xf] %vm998_vm1, %v1106_v19 }

// kernel: _lambda_.8
= control target key start
LH: loop header
LB: loop body
LE: loop exit
PB: predicated region body
PF: predicated region fallthrough
CT: control target
= control target key end

     0   :  { %vm1587_vm0 = vcmask 1041408   ;;  %s2825_s1 = inlined_call_operand.vmem [shape: bf16[2,1024,128], index: 1, kind: input, shape index: {}]   ;;  %s2826_s0 = inlined_call_operand.vmem [shape: bf16[2,18,1024], index: 0, kind: input, shape index: {}]   ;;  %s2827_s2 = inlined_call_operand.vmem [shape: f32[2,1,128], index: 2, kind: input, shape index: {}]   ;;  %s2828_s3 = inlined_call_operand.vmem [shape: f32[2,1,128], index: 3, kind: input, shape index: {}]   ;;  %s2829_s4 = inlined_call_operand.vmem [shape: bf16[2,18,128], index: 4, kind: output, shape index: {}]  }
   0x1   :  { %v2139_v0 = vld [vmem:[%s2825_s1 + $0x40] sm:$0xff]   ;;  %v2143_v4 = vld [vmem:[%s2825_s1 + $0x48] sm:$0xff]   ;;  %v2147_v8 = vld [vmem:[%s2825_s1 + $0x50] sm:$0xff]  }
   0x2   :  { %v2140_v1 = vld [vmem:[%s2825_s1 + $0xc0] sm:$0xff]   ;;  %1915 = vmatprep.subr.bf16.mxu0 %v2139_v0  ;;  %v2144_v5 = vld [vmem:[%s2825_s1 + $0xc8] sm:$0xff]   ;;  %v2148_v9 = vld [vmem:[%s2825_s1 + $0xd0] sm:$0xff]  }
   0x3   :  { %v2141_v2 = vld [vmem:[%s2825_s1] sm:$0xff]   ;;  %1943 = vmatprep.subr.bf16.mxu1 %v2140_v1  ;;  %v2145_v6 = vld [vmem:[%s2825_s1 + $0x8] sm:$0xff]   ;;  %v2149_v10 = vld [vmem:[%s2825_s1 + $0x10] sm:$0xff]  }
   0x4   :  { %v2142_v3 = vld [vmem:[%s2825_s1 + $0x80] sm:$0xff]   ;;  %1916 = vmatpush3.bf16.msra.mxu0 %v2141_v2  ;;  %v2146_v7 = vld [vmem:[%s2825_s1 + $0x88] sm:$0xff]   ;;  %v2150_v11 = vld [vmem:[%s2825_s1 + $0x90] sm:$0xff]  }
   0x5   :  { %1944 = vmatpush3.bf16.msra.mxu1 %v2142_v3  ;;  %1917 = vmatprep.subr.bf16.mxu0 %v2143_v4  ;;  %v2151_v12 = vld [vmem:[%s2825_s1 + $0x58] sm:$0xff]   ;;  %v2155_v16 = vld [vmem:[%s2825_s1 + $0x60] sm:$0xff]   ;;  %v2159_v20 = vld [vmem:[%s2825_s1 + $0x68] sm:$0xff]  }
   0x6   :  { %1945 = vmatprep.subr.bf16.mxu1 %v2144_v5  ;;  %v2152_v13 = vld [vmem:[%s2825_s1 + $0xd8] sm:$0xff]   ;;  %v2156_v17 = vld [vmem:[%s2825_s1 + $0xe0] sm:$0xff]   ;;  %v2160_v21 = vld [vmem:[%s2825_s1 + $0xe8] sm:$0xff]  }
   0x7   :  { %v2153_v14 = vld [vmem:[%s2825_s1 + $0x18] sm:$0xff]   ;;  %v2157_v18 = vld [vmem:[%s2825_s1 + $0x20] sm:$0xff]   ;;  %v2161_v22 = vld [vmem:[%s2825_s1 + $0x28] sm:$0xff]  }
   0x8   :  { %1918 = vmatpush3.bf16.msra.mxu0 %v2145_v6  ;;  %v2154_v15 = vld [vmem:[%s2825_s1 + $0x98] sm:$0xff]   ;;  %v2158_v19 = vld [vmem:[%s2825_s1 + $0xa0] sm:$0xff]   ;;  %v2162_v23 = vld [vmem:[%s2825_s1 + $0xa8] sm:$0xff]  }
   0x9   :  { %1946 = vmatpush3.bf16.msra.mxu1 %v2146_v7  ;;  %1919 = vmatprep.subr.bf16.mxu0 %v2147_v8  ;;  %v2163_v24 = vld [vmem:[%s2825_s1 + $0x70] sm:$0xff]   ;;  %v2167_v28 = vld [vmem:[%s2825_s1 + $0x78] sm:$0xff]   ;;  %v18_v32 = vld [vmem:[%s2826_s0] sm:$0xff] }
   0xa   :  { %1947 = vmatprep.subr.bf16.mxu1 %v2148_v9  ;;  %v2164_v25 = vld [vmem:[%s2825_s1 + $0xf0] sm:$0xff]   ;;  %v2168_v29 = vld [vmem:[%s2825_s1 + $0xf8] sm:$0xff]   ;;  %v22_v33 = vld [vmem:[%s2826_s0 + $0x20] sm:$0xff] }
   0xb   :  { %v2165_v26 = vld [vmem:[%s2825_s1 + $0x30] sm:$0xff]   ;;  %v2169_v30 = vld [vmem:[%s2825_s1 + $0x38] sm:$0xff]   ;;  %v19_v34 = vld [vmem:[%s2826_s0 + $0x8] sm:$0xff]  ;;  %v1738_v35 = vcombine.low %v18_v32, %v22_v33  ;;  %v1739_v36 = vcombine.high %v18_v32, %v22_v33 }
   0xc   :  { %1920 = vmatpush3.bf16.msra.mxu0 %v2149_v10  ;;  %v2166_v27 = vld [vmem:[%s2825_s1 + $0xb0] sm:$0xff]   ;;  %v2170_v31 = vld [vmem:[%s2825_s1 + $0xb8] sm:$0xff]   ;;  %v23_v37 = vld [vmem:[%s2826_s0 + $0x28] sm:$0xff] }
   0xd   :  { %1948 = vmatpush3.bf16.msra.mxu1 %v2150_v11  ;;  %1921 = vmatprep.subr.bf16.mxu0 %v2151_v12  ;;  %v1740_v38 = vcombine.low %v19_v34, %v23_v37  ;;  %v1741_v39 = vcombine.high %v19_v34, %v23_v37  ;;  %v2171_v40 = vld [vmem:[%s2825_s1 + $0x140] sm:$0xff]   ;;  %v2175_v44 = vld [vmem:[%s2825_s1 + $0x148] sm:$0xff]   ;;  %v2179_v48 = vld [vmem:[%s2825_s1 + $0x150] sm:$0xff]  }
   0xe   :  { %1949 = vmatprep.subr.bf16.mxu1 %v2152_v13  ;;  %782 = vmatprep.mubr.bf16.mxu0 %v1739_v36  ;;  %v2172_v41 = vld [vmem:[%s2825_s1 + $0x1c0] sm:$0xff]   ;;  %v2176_v45 = vld [vmem:[%s2825_s1 + $0x1c8] sm:$0xff]   ;;  %v2180_v49 = vld [vmem:[%s2825_s1 + $0x1d0] sm:$0xff]  }
   0xf   :  { %830 = vmatprep.mubr.bf16.mxu1 %v1741_v39  ;;  %v2173_v42 = vld [vmem:[%s2825_s1 + $0x100] sm:$0xff]   ;;  %v2177_v46 = vld [vmem:[%s2825_s1 + $0x108] sm:$0xff]   ;;  %v2181_v50 = vld [vmem:[%s2825_s1 + $0x110] sm:$0xff]  }
  0x10   :  { %1922 = vmatpush3.bf16.msra.mxu0 %v2153_v14  ;;  %v2174_v43 = vld [vmem:[%s2825_s1 + $0x180] sm:$0xff]   ;;  %v2178_v47 = vld [vmem:[%s2825_s1 + $0x188] sm:$0xff]   ;;  %v2182_v51 = vld [vmem:[%s2825_s1 + $0x190] sm:$0xff]  }
  0x11   :  { %1950 = vmatpush3.bf16.msra.mxu1 %v2154_v15  ;;  %1923 = vmatprep.subr.bf16.mxu0 %v2155_v16  ;;  %v2183_v52 = vld [vmem:[%s2825_s1 + $0x158] sm:$0xff]   ;;  %v2187_v56 = vld [vmem:[%s2825_s1 + $0x160] sm:$0xff]   ;;  %v2191_v60 = vld [vmem:[%s2825_s1 + $0x168] sm:$0xff]  }
  0x12   :  { %1951 = vmatprep.subr.bf16.mxu1 %v2156_v17  ;;  %v2184_v53 = vld [vmem:[%s2825_s1 + $0x1d8] sm:$0xff]   ;;  %v2188_v57 = vld [vmem:[%s2825_s1 + $0x1e0] sm:$0xff]   ;;  %v2192_v61 = vld [vmem:[%s2825_s1 + $0x1e8] sm:$0xff]  }
  0x13   :  { %v2185_v54 = vld [vmem:[%s2825_s1 + $0x118] sm:$0xff]   ;;  %v2189_v58 = vld [vmem:[%s2825_s1 + $0x120] sm:$0xff]   ;;  %v2194_v0 = vld [vmem:[%s2825_s1 + $0x128] sm:$0xff]  }
  0x14   :  { %1924 = vmatpush3.bf16.msra.mxu0 %v2157_v18  ;;  %v2186_v55 = vld [vmem:[%s2825_s1 + $0x198] sm:$0xff]   ;;  %v2190_v59 = vld [vmem:[%s2825_s1 + $0x1a0] sm:$0xff]   ;;  %v2195_v2 = vld [vmem:[%s2825_s1 + $0x1a8] sm:$0xff]  }
  0x15   :  { %1952 = vmatpush3.bf16.msra.mxu1 %v2158_v19  ;;  %1925 = vmatprep.subr.bf16.mxu0 %v2159_v20  ;;  %v26_v62 = vld [vmem:[%s2826_s0 + $0x40] sm:$0x11]  ;;  %v27_v3 = vld [vmem:[%s2826_s0 + $0x48] sm:$0x11]  ;;  %v2199_v6 = vld [vmem:[%s2825_s1 + $0x170] sm:$0xff]  }
  0x16   :  { %1953 = vmatprep.subr.bf16.mxu1 %v2160_v21  ;;  %v1747_v63 = vcombine.high %v26_v62, %v26_v62  ;;  %v1746_v1 = vcombine.low %v26_v62, %v26_v62  ;;  %v1749_v4 = vcombine.high %v27_v3, %v27_v3  ;;  %v1748_v5 = vcombine.low %v27_v3, %v27_v3  ;;  %v2200_v7 = vld [vmem:[%s2825_s1 + $0x1f0] sm:$0xff]   ;;  %v2203_v10 = vld [vmem:[%s2825_s1 + $0x178] sm:$0xff]   ;;  %v31_v62 = vld [vmem:[%s2826_s0 + $0x68] sm:$0xff] }
  0x17   :  { %v2201_v8 = vld [vmem:[%s2825_s1 + $0x130] sm:$0xff]   ;;  %v2204_v11 = vld [vmem:[%s2825_s1 + $0x1f8] sm:$0xff]  }
  0x18   :  { %1926 = vmatpush3.bf16.msra.mxu0 %v2161_v22  ;;  %v2202_v9 = vld [vmem:[%s2825_s1 + $0x1b0] sm:$0xff]   ;;  %v2205_v12 = vld [vmem:[%s2825_s1 + $0x138] sm:$0xff]   ;;  %v2207_v22 = vld [vmem:[%s2825_s1 + $0x240] sm:$0xff]  }
  0x19   :  { %1954 = vmatpush3.bf16.msra.mxu1 %v2162_v23  ;;  %1927 = vmatprep.subr.bf16.mxu0 %v2163_v24  ;;  %v2206_v13 = vld [vmem:[%s2825_s1 + $0x1b8] sm:$0xff]   ;;  %v20_v14 = vld [vmem:[%s2826_s0 + $0x10] sm:$0xff]  ;;  %v2208_v23 = vld [vmem:[%s2825_s1 + $0x2c0] sm:$0xff]  }
  0x1a   :  { %1955 = vmatprep.subr.bf16.mxu1 %v2164_v25  ;;  %v24_v15 = vld [vmem:[%s2826_s0 + $0x30] sm:$0xff]  ;;  %v21_v16 = vld [vmem:[%s2826_s0 + $0x18] sm:$0xff]  ;;  %v2209_v24 = vld [vmem:[%s2825_s1 + $0x200] sm:$0xff]  }
  0x1b   :  { %v1742_v17 = vcombine.low %v20_v14, %v24_v15  ;;  %v1743_v18 = vcombine.high %v20_v14, %v24_v15  ;;  %v25_v19 = vld [vmem:[%s2826_s0 + $0x38] sm:$0xff]  ;;  %v2210_v25 = vld [vmem:[%s2825_s1 + $0x280] sm:$0xff]   ;;  %v2217_v33 = vld [vmem:[%s2825_s1 + $0x250] sm:$0xff]  }
  0x1c   :  { %1928 = vmatpush3.bf16.msra.mxu0 %v2165_v26  ;;  %v1744_v20 = vcombine.low %v21_v16, %v25_v19  ;;  %v1745_v21 = vcombine.high %v21_v16, %v25_v19  ;;  %v2211_v26 = vld [vmem:[%s2825_s1 + $0x248] sm:$0xff]   ;;  %v2218_v34 = vld [vmem:[%s2825_s1 + $0x2d0] sm:$0xff]   ;;  %v2255_v16 = vld [vmem:[%s2825_s1 + $0x358] sm:$0xff]  }
  0x1d   :  { %1956 = vmatpush3.bf16.msra.mxu1 %v2166_v27  ;;  %1929 = vmatprep.subr.bf16.mxu0 %v2167_v28  ;;  %v2212_v27 = vld [vmem:[%s2825_s1 + $0x2c8] sm:$0xff]   ;;  %v2220_v37 = vld [vmem:[%s2825_s1 + $0x210] sm:$0xff]   ;;  %v2258_v19 = vld [vmem:[%s2825_s1 + $0x398] sm:$0xff]  }
  0x1e   :  { %1957 = vmatprep.subr.bf16.mxu1 %v2168_v29  ;;  %v2213_v28 = vld [vmem:[%s2825_s1 + $0x208] sm:$0xff]   ;;  %v2221_v39 = vld [vmem:[%s2825_s1 + $0x290] sm:$0xff]  }
  0x1f   :  { %v2214_v29 = vld [vmem:[%s2825_s1 + $0x288] sm:$0xff]   ;;  %v2253_v14 = vld [vmem:[%s2825_s1 + $0x310] sm:$0xff]  }
  0x20   :  { %1930 = vmatpush3.bf16.msra.mxu0 %v2169_v30  ;;  %v28_v30 = vld [vmem:[%s2826_s0 + $0x50] sm:$0x11] }
  0x21   :  { %1958 = vmatpush3.bf16.msra.mxu1 %v2170_v31  ;;  %1971 = vmatprep.subr.bf16.mxu0 %v2171_v40  ;;  %v1751_v31 = vcombine.high %v28_v30, %v28_v30  ;;  %v1750_v32 = vcombine.low %v28_v30, %v28_v30  ;;  %v2223_v40 = vld [vmem:[%s2825_s1 + $0x258] sm:$0xff]   ;;  %v2254_v15 = vld [vmem:[%s2825_s1 + $0x390] sm:$0xff]   ;;  %v2268_v30 = vld [vmem:[%s2825_s1 + $0x3a8] sm:$0xff]  }
  0x22   :  { %1999 = vmatprep.subr.bf16.mxu1 %v2172_v41  ;;  %v2224_v41 = vld [vmem:[%s2825_s1 + $0x2d8] sm:$0xff]  }
  0x23   :  { %783 = vmatmul.mubr.bf16.vlgmr.msra.gmra.mrb[0].mxu0 %v1738_v35  ;;  %v29_v35 = vld [vmem:[%s2826_s0 + $0x58] sm:$0x11] }
  0x24   :  { %831 = vmatmul.mubr.bf16.vlgmr.msra.gmra.mrb[0].mxu1 %v1740_v38  ;;  %1972 = vmatpush3.bf16.msra.mxu0 %v2173_v42  ;;  %v1753_v36 = vcombine.high %v29_v35, %v29_v35  ;;  %v1752_v38 = vcombine.low %v29_v35, %v29_v35  ;;  %v2225_v42 = vld [vmem:[%s2825_s1 + $0x218] sm:$0xff]   ;;  %v2272_v35 = vld [vmem:[%s2825_s1 + $0x3f0] sm:$0xff]  }
  0x25   :  { %2000 = vmatpush3.bf16.msra.mxu1 %v2174_v43  ;;  %1973 = vmatprep.subr.bf16.mxu0 %v2175_v44  ;;  %v2226_v43 = vld [vmem:[%s2825_s1 + $0x298] sm:$0xff]   ;;  %v2227_v44 = vld [vmem:[%s2825_s1 + $0x260] sm:$0xff]  }
  0x26   :  { %2001 = vmatprep.subr.bf16.mxu1 %v2176_v45  ;;  %790 = vmatprep.mubr.bf16.mxu0 %v1747_v63  ;;  %v2228_v45 = vld [vmem:[%s2825_s1 + $0x2e0] sm:$0xff]  }
  0x27   :  { %838 = vmatprep.mubr.bf16.mxu1 %v1749_v4  ;;  %v2243_v4 = vld [vmem:[%s2825_s1 + $0x340] sm:$0xff]  }
  0x28   :  { %1974 = vmatpush3.bf16.msra.mxu0 %v2177_v46  ;;  %v2229_v46 = vld [vmem:[%s2825_s1 + $0x220] sm:$0xff]  }
  0x29   :  { %2002 = vmatpush3.bf16.msra.mxu1 %v2178_v47  ;;  %1975 = vmatprep.subr.bf16.mxu0 %v2179_v48  ;;  %v2230_v47 = vld [vmem:[%s2825_s1 + $0x2a0] sm:$0xff]   ;;  %v2231_v48 = vld [vmem:[%s2825_s1 + $0x268] sm:$0xff]  }
  0x2a   :  { %2003 = vmatprep.subr.bf16.mxu1 %v2180_v49  ;;  %v2232_v49 = vld [vmem:[%s2825_s1 + $0x2e8] sm:$0xff]  }
  0x2b   :  { %791 = vmatmul.mubr.bf16.gmra.mrb[4].mxu0 %v1746_v1  ;;  %v35_v1 = vld [vmem:[%s2826_s0 + $0x88] sm:$0xff] }
  0x2c   :  { %1976 = vmatpush3.bf16.msra.mxu0 %v2181_v50  ;;  %839 = vmatmul.mubr.bf16.gmra.mrb[4].mxu1 %v1748_v5  ;;  %v2233_v50 = vld [vmem:[%s2825_s1 + $0x228] sm:$0xff]   ;;  %v1821_v3 = vcombine.high %v31_v62, %v35_v1  ;;  %v2244_v5 = vld [vmem:[%s2825_s1 + $0x3c0] sm:$0xff]  }
  0x2d   :  { %2004 = vmatpush3.bf16.msra.mxu1 %v2182_v51  ;;  %1977 = vmatprep.subr.bf16.mxu0 %v2183_v52  ;;  %v2234_v51 = vld [vmem:[%s2825_s1 + $0x2a8] sm:$0xff]   ;;  %v2235_v52 = vld [vmem:[%s2825_s1 + $0x270] sm:$0xff]  }
  0x2e   :  { %2005 = vmatprep.subr.bf16.mxu1 %v2184_v53  ;;  %878 = vmatprep.mubr.bf16.mxu0 %v1743_v18  ;;  %v2236_v53 = vld [vmem:[%s2825_s1 + $0x2f0] sm:$0xff]   ;;  %v2257_v18 = vld [vmem:[%s2825_s1 + $0x318] sm:$0xff]  }
  0x2f   :  { %926 = vmatprep.mubr.bf16.mxu1 %v1745_v21  ;;  %v2260_v21 = vld [vmem:[%s2825_s1 + $0x3e0] sm:$0xff]  }
  0x30   :  { %1978 = vmatpush3.bf16.msra.mxu0 %v2185_v54  ;;  %v2237_v54 = vld [vmem:[%s2825_s1 + $0x230] sm:$0xff]  }
  0x31   :  { %2006 = vmatpush3.bf16.msra.mxu1 %v2186_v55  ;;  %1979 = vmatprep.subr.bf16.mxu0 %v2187_v56  ;;  %v2238_v55 = vld [vmem:[%s2825_s1 + $0x2b0] sm:$0xff]   ;;  %v2239_v56 = vld [vmem:[%s2825_s1 + $0x278] sm:$0xff]  }
  0x32   :  { %2007 = vmatprep.subr.bf16.mxu1 %v2188_v57  ;;  %v2240_v57 = vld [vmem:[%s2825_s1 + $0x2f8] sm:$0xff]  }
  0x34   :  { %1980 = vmatpush3.bf16.msra.mxu0 %v2189_v58  ;;  %v2241_v58 = vld [vmem:[%s2825_s1 + $0x238] sm:$0xff]  }
  0x35   :  { %2008 = vmatpush3.bf16.msra.mxu1 %v2190_v59  ;;  %1981 = vmatprep.subr.bf16.mxu0 %v2191_v60  ;;  %v2242_v59 = vld [vmem:[%s2825_s1 + $0x2b8] sm:$0xff]   ;;  %v30_v60 = vld [vmem:[%s2826_s0 + $0x60] sm:$0xff] }
  0x36   :  { %2009 = vmatprep.subr.bf16.mxu1 %v2192_v61  ;;  %v34_v61 = vld [vmem:[%s2826_s0 + $0x80] sm:$0xff] }
  0x37   :  { %v1818_v63 = vcombine.low %v30_v60, %v34_v61 }
  0x38   :  { %1982 = vmatpush3.bf16.msra.mxu0 %v2194_v0  ;;  %v1819_v0 = vcombine.high %v30_v60, %v34_v61 }
  0x39   :  { %2010 = vmatpush3.bf16.msra.mxu1 %v2195_v2  ;;  %1983 = vmatprep.subr.bf16.mxu0 %v2199_v6  ;;  %v1820_v2 = vcombine.low %v31_v62, %v35_v1  ;;  %v2245_v6 = vld [vmem:[%s2825_s1 + $0x300] sm:$0xff]  }
  0x3a   :  { %2011 = vmatprep.subr.bf16.mxu1 %v2200_v7  ;;  %v2246_v7 = vld [vmem:[%s2825_s1 + $0x380] sm:$0xff]  }
  0x3c   :  { %1984 = vmatpush3.bf16.msra.mxu0 %v2201_v8  ;;  %v2247_v8 = vld [vmem:[%s2825_s1 + $0x348] sm:$0xff]  }
  0x3d   :  { %2012 = vmatpush3.bf16.msra.mxu1 %v2202_v9  ;;  %1985 = vmatprep.subr.bf16.mxu0 %v2203_v10  ;;  %v2248_v9 = vld [vmem:[%s2825_s1 + $0x3c8] sm:$0xff]  }
  0x3e   :  { %2013 = vmatprep.subr.bf16.mxu1 %v2204_v11  ;;  %v2249_v10 = vld [vmem:[%s2825_s1 + $0x308] sm:$0xff]  }
  0x3f   :  { %v2250_v11 = vld [vmem:[%s2825_s1 + $0x388] sm:$0xff]  }
  0x40   :  { %1986 = vmatpush3.bf16.msra.mxu0 %v2205_v12  ;;  %v2251_v12 = vld [vmem:[%s2825_s1 + $0x350] sm:$0xff]  }
  0x41   :  { %2014 = vmatpush3.bf16.msra.mxu1 %v2206_v13  ;;  %2027 = vmatprep.subr.bf16.mxu0 %v2207_v22  ;;  %v2252_v13 = vld [vmem:[%s2825_s1 + $0x3d0] sm:$0xff]   ;;  %v2261_v22 = vld [vmem:[%s2825_s1 + $0x320] sm:$0xff]  }
  0x42   :  { %2055 = vmatprep.subr.bf16.mxu1 %v2208_v23  ;;  %v2262_v23 = vld [vmem:[%s2825_s1 + $0x3a0] sm:$0xff]  }
  0x43   :  { %879 = vmatmul.mubr.bf16.vlgmr.msra.gmra.mrb[8].mxu0 %v1742_v17  ;;  %v2256_v17 = vld [vmem:[%s2825_s1 + $0x3d8] sm:$0xff]  }
  0x44   :  { %927 = vmatmul.mubr.bf16.vlgmr.msra.gmra.mrb[8].mxu1 %v1744_v20  ;;  %2028 = vmatpush3.bf16.msra.mxu0 %v2209_v24  ;;  %v2259_v20 = vld [vmem:[%s2825_s1 + $0x360] sm:$0xff]  }
  0x45   :  { %2056 = vmatpush3.bf16.msra.mxu1 %v2210_v25  ;;  %2029 = vmatprep.subr.bf16.mxu0 %v2211_v26  ;;  %v38_v24 = vld [vmem:[%s2826_s0 + $0xa0] sm:$0x11]  ;;  %v2264_v26 = vld [vmem:[%s2825_s1 + $0x368] sm:$0xff]  }
  0x46   :  { %2057 = vmatprep.subr.bf16.mxu1 %v2212_v27  ;;  %886 = vmatprep.mubr.bf16.mxu0 %v1751_v31  ;;  %v1827_v25 = vcombine.high %v38_v24, %v38_v24  ;;  %v1826_v27 = vcombine.low %v38_v24, %v38_v24  ;;  %v39_v31 = vld [vmem:[%s2826_s0 + $0xa8] sm:$0x11] }
  0x47   :  { %934 = vmatprep.mubr.bf16.mxu1 %v1753_v36  ;;  %v2273_v36 = vld [vmem:[%s2825_s1 + $0x330] sm:$0xff]  }
  0x48   :  { %2030 = vmatpush3.bf16.msra.mxu0 %v2213_v28  ;;  %v2265_v28 = vld [vmem:[%s2825_s1 + $0x3e8] sm:$0xff]  }
  0x49   :  { %2058 = vmatpush3.bf16.msra.mxu1 %v2214_v29  ;;  %2031 = vmatprep.subr.bf16.mxu0 %v2217_v33  ;;  %v2267_v29 = vld [vmem:[%s2825_s1 + $0x328] sm:$0xff]   ;;  %v1828_v33 = vcombine.low %v39_v31, %v39_v31 }
  0x4a   :  { %2059 = vmatprep.subr.bf16.mxu1 %v2218_v34  ;;  %v2271_v34 = vld [vmem:[%s2825_s1 + $0x370] sm:$0xff]  }
  0x4b   :  { %887 = vmatmul.mubr.bf16.gmra.mrb[12].mxu0 %v1750_v32  ;;  %v1829_v32 = vcombine.high %v39_v31, %v39_v31 }
  0x4c   :  { %2032 = vmatpush3.bf16.msra.mxu0 %v2220_v37  ;;  %935 = vmatmul.mubr.bf16.gmra.mrb[12].mxu1 %v1752_v38  ;;  %v2274_v37 = vld [vmem:[%s2825_s1 + $0x3b0] sm:$0xff]   ;;  %v2275_v38 = vld [vmem:[%s2825_s1 + $0x378] sm:$0xff]  }
  0x4d   :  { %2060 = vmatpush3.bf16.msra.mxu1 %v2221_v39  ;;  %2033 = vmatprep.subr.bf16.mxu0 %v2223_v40  ;;  %v2276_v39 = vld [vmem:[%s2825_s1 + $0x3f8] sm:$0xff]  }
  0x4e   :  { %2061 = vmatprep.subr.bf16.mxu1 %v2224_v41  ;;  %1426 = vmatprep.mubr.bf16.mxu0 %v1819_v0  ;;  %v2277_v40 = vld [vmem:[%s2825_s1 + $0x338] sm:$0xff]  }
  0x4f   :  { %1474 = vmatprep.mubr.bf16.mxu1 %v1821_v3  ;;  %v2278_v41 = vld [vmem:[%s2825_s1 + $0x3b8] sm:$0xff]  }
  0x50   :  { %2034 = vmatpush3.bf16.msra.mxu0 %v2225_v42  ;;  %v32_v42 = vld [vmem:[%s2826_s0 + $0x70] sm:$0xff] }
  0x51   :  { %2062 = vmatpush3.bf16.msra.mxu1 %v2226_v43  ;;  %2035 = vmatprep.subr.bf16.mxu0 %v2227_v44  ;;  %v36_v43 = vld [vmem:[%s2826_s0 + $0x90] sm:$0xff]  ;;  %v33_v44 = vld [vmem:[%s2826_s0 + $0x78] sm:$0xff] }
  0x52   :  { %2063 = vmatprep.subr.bf16.mxu1 %v2228_v45  ;;  %v1822_v45 = vcombine.low %v32_v42, %v36_v43 }
  0x54   :  { %2036 = vmatpush3.bf16.msra.mxu0 %v2229_v46  ;;  %v1823_v46 = vcombine.high %v32_v42, %v36_v43 }
  0x55   :  { %2064 = vmatpush3.bf16.msra.mxu1 %v2230_v47  ;;  %2037 = vmatprep.subr.bf16.mxu0 %v2231_v48  ;;  %v37_v47 = vld [vmem:[%s2826_s0 + $0x98] sm:$0xff]  ;;  %v40_v48 = vld [vmem:[%s2826_s0 + $0xb0] sm:$0x11] }
  0x56   :  { %2065 = vmatprep.subr.bf16.mxu1 %v2232_v49  ;;  %v41_v49 = vld [vmem:[%s2826_s0 + $0xb8] sm:$0x11] }
  0x58   :  { %2038 = vmatpush3.bf16.msra.mxu0 %v2233_v50  ;;  %v1824_v50 = vcombine.low %v33_v44, %v37_v47 }
  0x59   :  { %2066 = vmatpush3.bf16.msra.mxu1 %v2234_v51  ;;  %2039 = vmatprep.subr.bf16.mxu0 %v2235_v52  ;;  %v1825_v51 = vcombine.high %v33_v44, %v37_v47  ;;  %v1831_v52 = vcombine.high %v40_v48, %v40_v48 }
  0x5a   :  { %2067 = vmatprep.subr.bf16.mxu1 %v2236_v53  ;;  %v1833_v53 = vcombine.high %v41_v49, %v41_v49 }
  0x5c   :  { %2040 = vmatpush3.bf16.msra.mxu0 %v2237_v54  ;;  %v1830_v54 = vcombine.low %v40_v48, %v40_v48 }
  0x5d   :  { %2068 = vmatpush3.bf16.msra.mxu1 %v2238_v55  ;;  %2041 = vmatprep.subr.bf16.mxu0 %v2239_v56  ;;  %v1832_v55 = vcombine.low %v41_v49, %v41_v49 }
  0x5e   :  { %2069 = vmatprep.subr.bf16.mxu1 %v2240_v57 }
  0x60   :  { %2042 = vmatpush3.bf16.msra.mxu0 %v2241_v58 }
  0x61   :  { %2070 = vmatpush3.bf16.msra.mxu1 %v2242_v59  ;;  %2083 = vmatprep.subr.bf16.mxu0 %v2243_v4 }
  0x62   :  { %2111 = vmatprep.subr.bf16.mxu1 %v2244_v5 }
  0x63   :  { %1427 = vmatmul.mubr.bf16.vlgmr.msra.gmra.mrb[16].mxu0 %v1818_v63 }
  0x64   :  { %1475 = vmatmul.mubr.bf16.vlgmr.msra.gmra.mrb[16].mxu1 %v1820_v2  ;;  %2084 = vmatpush3.bf16.msra.mxu0 %v2245_v6 }
  0x65   :  { %2112 = vmatpush3.bf16.msra.mxu1 %v2246_v7  ;;  %2085 = vmatprep.subr.bf16.mxu0 %v2247_v8 }
  0x66   :  { %2113 = vmatprep.subr.bf16.mxu1 %v2248_v9  ;;  %1434 = vmatprep.mubr.bf16.mxu0 %v1827_v25 }
  0x67   :  { %1482 = vmatprep.mubr.bf16.mxu1 %v1829_v32 }
  0x68   :  { %2086 = vmatpush3.bf16.msra.mxu0 %v2249_v10 }
  0x69   :  { %2114 = vmatpush3.bf16.msra.mxu1 %v2250_v11  ;;  %2087 = vmatprep.subr.bf16.mxu0 %v2251_v12 }
  0x6a   :  { %2115 = vmatprep.subr.bf16.mxu1 %v2252_v13 }
  0x6b   :  { %1435 = vmatmul.mubr.bf16.gmra.mrb[20].mxu0 %v1826_v27 }
  0x6c   :  { %2088 = vmatpush3.bf16.msra.mxu0 %v2253_v14  ;;  %1483 = vmatmul.mubr.bf16.gmra.mrb[20].mxu1 %v1828_v33 }
  0x6d   :  { %2116 = vmatpush3.bf16.msra.mxu1 %v2254_v15  ;;  %2089 = vmatprep.subr.bf16.mxu0 %v2255_v16 }
  0x6e   :  { %2117 = vmatprep.subr.bf16.mxu1 %v2256_v17  ;;  %1522 = vmatprep.mubr.bf16.mxu0 %v1823_v46 }
  0x6f   :  { %1570 = vmatprep.mubr.bf16.mxu1 %v1825_v51 }
  0x70   :  { %2090 = vmatpush3.bf16.msra.mxu0 %v2257_v18 }
  0x71   :  { %2118 = vmatpush3.bf16.msra.mxu1 %v2258_v19  ;;  %2091 = vmatprep.subr.bf16.mxu0 %v2259_v20 }
  0x72   :  { %2119 = vmatprep.subr.bf16.mxu1 %v2260_v21 }
  0x74   :  { %2092 = vmatpush3.bf16.msra.mxu0 %v2261_v22 }
  0x75   :  { %2120 = vmatpush3.bf16.msra.mxu1 %v2262_v23  ;;  %2093 = vmatprep.subr.bf16.mxu0 %v2264_v26 }
  0x76   :  { %2121 = vmatprep.subr.bf16.mxu1 %v2265_v28 }
  0x78   :  { %2094 = vmatpush3.bf16.msra.mxu0 %v2267_v29 }
  0x79   :  { %2122 = vmatpush3.bf16.msra.mxu1 %v2268_v30  ;;  %2095 = vmatprep.subr.bf16.mxu0 %v2271_v34 }
  0x7a   :  { %2123 = vmatprep.subr.bf16.mxu1 %v2272_v35 }
  0x7c   :  { %2096 = vmatpush3.bf16.msra.mxu0 %v2273_v36 }
  0x7d   :  { %2124 = vmatpush3.bf16.msra.mxu1 %v2274_v37  ;;  %2097 = vmatprep.subr.bf16.mxu0 %v2275_v38 }
  0x7e   :  { %2125 = vmatprep.subr.bf16.mxu1 %v2276_v39 }
  0x80   :  { %2098 = vmatpush3.bf16.msra.mxu0 %v2277_v40 }
  0x81   :  { %2126 = vmatpush3.bf16.msra.mxu1 %v2278_v41 }
  0x83   :  { %1523 = vmatmul.mubr.bf16.vlgmr.msra.gmra.mrb[24].mxu0 %v1822_v45 }
  0x84   :  { %1571 = vmatmul.mubr.bf16.vlgmr.msra.gmra.mrb[24].mxu1 %v1824_v50  ;;  %1530 = vmatprep.mubr.bf16.mxu0 %v1831_v52 }
  0x85   :  { %1578 = vmatprep.mubr.bf16.mxu1 %v1833_v53 }
  0x8b   :  { %1531 = vmatmul.mubr.bf16.gmra.mrb[28].mxu0 %v1830_v54 }
  0x8c   :  { %1579 = vmatmul.mubr.bf16.gmra.mrb[28].mxu1 %v1832_v55 }
  0xf6   :  { %v1931_v56 = vpop.f32.mrb[0].mxu0 }
  0xf7   :  { %v1959_v57 = vpop.f32.mrb[0].mxu1  ;;  %v1932_v58 = vpop.f32.mrb[1].mxu0 }
  0xf8   :  { %v1933_v59 = vadd.f32 %v1932_v58, %v1931_v56  ;;  %v1960_v60 = vpop.f32.mrb[1].mxu1  ;;  %v1934_v61 = vpop.f32.mrb[2].mxu0 }
  0xf9   :  { %v1961_v62 = vadd.f32 %v1960_v60, %v1959_v57  ;;  %v1962_v63 = vpop.f32.mrb[2].mxu1  ;;  %v1935_v0 = vpop.f32.mrb[3].mxu0 }
  0xfa   :  { %v1936_v1 = vadd.f32 %v1935_v0, %v1934_v61  ;;  %v1963_v2 = vpop.f32.mrb[3].mxu1 }
  0xfb   :  { %v833_v3 = vadd.f32 %v1961_v62, %v1933_v59  ;;  %v1964_v4 = vadd.f32 %v1963_v2, %v1962_v63 }
  0xfd   :  { %v836_v5 = vadd.f32 %v1964_v4, %v1936_v1 }
  0xfe   :  { %v1937_v6 = vpop.f32.mrb[4].mxu0 }
  0xff   :  { %v1938_v7 = vpop.f32.mrb[5].mxu0  ;;  %v1965_v10 = vpop.f32.mrb[4].mxu1 }
 0x100   :  { %v1939_v8 = vadd.f32 %v1938_v7, %v1937_v6  ;;  %v1940_v9 = vpop.f32.mrb[6].mxu0  ;;  %v1966_v12 = vpop.f32.mrb[5].mxu1 }
 0x101   :  { %v1941_v11 = vpop.f32.mrb[7].mxu0  ;;  %v1967_v13 = vadd.f32 %v1966_v12, %v1965_v10  ;;  %v1968_v14 = vpop.f32.mrb[6].mxu1 }
 0x102   :  { %v1969_v15 = vpop.f32.mrb[7].mxu1 }
 0x103   :  { %v841_v16 = vadd.f32 %v1967_v13, %v1939_v8 }
 0x116   :  { %v1987_v17 = vpop.f32.mrb[8].mxu0 }
 0x117   :  { %v2015_v18 = vpop.f32.mrb[8].mxu1  ;;  %v1988_v19 = vpop.f32.mrb[9].mxu0 }
 0x118   :  { %v1989_v20 = vadd.f32 %v1988_v19, %v1987_v17  ;;  %v2016_v21 = vpop.f32.mrb[9].mxu1  ;;  %v1990_v22 = vpop.f32.mrb[10].mxu0 }
 0x119   :  { %v2017_v23 = vadd.f32 %v2016_v21, %v2015_v18  ;;  %v2018_v24 = vpop.f32.mrb[10].mxu1  ;;  %v1991_v25 = vpop.f32.mrb[11].mxu0 }
 0x11a   :  { %v881_v26 = vadd.f32 %v1989_v20, %v833_v3  ;;  %v1992_v27 = vadd.f32 %v1991_v25, %v1990_v22  ;;  %v2019_v28 = vpop.f32.mrb[11].mxu1 }
 0x11b   :  { %v2020_v29 = vadd.f32 %v2019_v28, %v2018_v24  ;;  %v1656_v28 = vlaneseq }
 0x11c   :  { %v2768_v30 = vadd.f32 %v2017_v23, %v881_v26  ;;  %v884_v31 = vadd.f32 %v1992_v27, %v836_v5 }
 0x11e   :  { %v2770_v32 = vadd.f32 %v2020_v29, %v884_v31  ;;  %v1993_v33 = vpop.f32.mrb[12].mxu0 }
 0x11f   :  { %v1994_v35 = vpop.f32.mrb[13].mxu0  ;;  %v2021_v38 = vpop.f32.mrb[12].mxu1 }
 0x120   :  { %v1586_v34 = vadd.f32 %v2770_v32, %v2768_v30  ;;  %v1995_v36 = vadd.f32 %v1994_v35, %v1993_v33  ;;  %v1996_v37 = vpop.f32.mrb[14].mxu0  ;;  %v2022_v41 = vpop.f32.mrb[13].mxu1 }
 0x121   :  { %v1997_v39 = vpop.f32.mrb[15].mxu0  ;;  %v2023_v42 = vadd.f32 %v2022_v41, %v2021_v38  ;;  %v2024_v43 = vpop.f32.mrb[14].mxu1  ;;  %v1640_v37 = vld [vmem:[%s2827_s2] sm:$0x1] }
 0x122   :  { %v889_v40 = vadd.f32 %v1995_v36, %v841_v16  ;;  %v2025_v44 = vpop.f32.mrb[15].mxu1  ;;  %v1657_v36 = vshrl.u32 %v1656_v28, 7 }
 0x124   :  { %v2774_v45 = vadd.f32 %v2023_v42, %v889_v40  ;;  %v2785_v38 = vsub.s32 0, %v1657_v36 }
 0x126   :  { %v1588_v46 = vsel %vm1587_vm0, %v2774_v45, 0.0 }
 0x127   :  { %v1589_v47 = vadd.f32 %v1588_v46, %v1586_v34 }
 0x129   :  { %v1590_v48 = vrot.slane %v1589_v47, 4 }
 0x12b   :  { %v1591_v49 = vadd.f32 %v1590_v48, %v1589_v47  ;;  %v1648_v48 = vld [vmem:[%s2828_s3] sm:$0x1] }
 0x12d   :  { %v1592_v50 = vrot.slane %v1591_v49, 2 }
 0x12f   :  { %v1593_v51 = vadd.f32 %v1592_v50, %v1591_v49 }
 0x131   :  { %v1594_v52 = vrot.slane %v1593_v51, 1 }
 0x133   :  { %v1595_v53 = vadd.f32 %v1594_v52, %v1593_v51 }
 0x135   :  { %v1606_v54 = vmul.f32 0.055555556, %v1595_v53 }
 0x136   :  { %v2043_v55 = vpop.f32.mrb[16].mxu0 }
 0x137   :  { %v1608_v56 = vsub.f32 %v2768_v30, %v1606_v54  ;;  %v1609_v57 = vsub.f32 %v2770_v32, %v1606_v54  ;;  %v1610_v58 = vsub.f32 %v2774_v45, %v1606_v54  ;;  %v2071_v59 = vpop.f32.mrb[16].mxu1  ;;  %v2044_v60 = vpop.f32.mrb[17].mxu0 }
 0x138   :  { %v2045_v61 = vadd.f32 %v2044_v60, %v2043_v55  ;;  %v2072_v62 = vpop.f32.mrb[17].mxu1  ;;  %v2046_v63 = vpop.f32.mrb[18].mxu0 }
 0x139   :  { %v1614_v0 = vmul.f32 %v1608_v56, %v1608_v56  ;;  %v1615_v1 = vmul.f32 %v1609_v57, %v1609_v57  ;;  %v1616_v2 = vmul.f32 %v1610_v58, %v1610_v58  ;;  %v2073_v3 = vadd.f32 %v2072_v62, %v2071_v59  ;;  %v2074_v4 = vpop.f32.mrb[18].mxu1  ;;  %v2047_v5 = vpop.f32.mrb[19].mxu0 }
 0x13a   :  { %v2048_v6 = vadd.f32 %v2047_v5, %v2046_v63  ;;  %v2075_v7 = vpop.f32.mrb[19].mxu1 }
 0x13b   :  { %v1620_v8 = vadd.f32 %v1615_v1, %v1614_v0  ;;  %v1621_v9 = vsel %vm1587_vm0, %v1616_v2, 0.0  ;;  %v1477_v10 = vadd.f32 %v2073_v3, %v2045_v61  ;;  %v2076_v11 = vadd.f32 %v2075_v7, %v2074_v4 }
 0x13d   :  { %v1622_v12 = vadd.f32 %v1621_v9, %v1620_v8  ;;  %v1480_v13 = vadd.f32 %v2076_v11, %v2048_v6 }
 0x13e   :  { %v2049_v21 = vpop.f32.mrb[20].mxu0 }
 0x13f   :  { %v1623_v14 = vrot.slane %v1622_v12, 4  ;;  %v2050_v22 = vpop.f32.mrb[21].mxu0  ;;  %v2077_v27 = vpop.f32.mrb[20].mxu1 }
 0x140   :  { %v2051_v24 = vadd.f32 %v2050_v22, %v2049_v21  ;;  %v2052_v25 = vpop.f32.mrb[22].mxu0  ;;  %v2078_v29 = vpop.f32.mrb[21].mxu1 }
 0x141   :  { %v1624_v15 = vadd.f32 %v1623_v14, %v1622_v12  ;;  %v2053_v26 = vpop.f32.mrb[23].mxu0  ;;  %v2079_v31 = vadd.f32 %v2078_v29, %v2077_v27  ;;  %v2080_v33 = vpop.f32.mrb[22].mxu1 }
 0x142   :  { %v2081_v34 = vpop.f32.mrb[23].mxu1 }
 0x143   :  { %v1625_v16 = vrot.slane %v1624_v15, 2  ;;  %v1485_v35 = vadd.f32 %v2079_v31, %v2051_v24 }
 0x145   :  { %v1626_v17 = vadd.f32 %v1625_v16, %v1624_v15 }
 0x147   :  { %v1627_v18 = vrot.slane %v1626_v17, 1 }
 0x149   :  { %v1628_v19 = vadd.f32 %v1627_v18, %v1626_v17 }
 0x14b   :  { %v1638_v20 = vmul.f32 0.055555556, %v1628_v19 }
 0x14d   :  { %v1642_v23 = vadd.f32 1e-05, %v1638_v20 }
 0x14f   :  { %2283 = vrsqrt.f32 %v1642_v23 }
 0x156   :  { %v2099_v39 = vpop.f32.mrb[24].mxu0 }
 0x157   :  { %v2127_v41 = vpop.f32.mrb[24].mxu1  ;;  %v2100_v42 = vpop.f32.mrb[25].mxu0 }
 0x158   :  { %v2101_v44 = vadd.f32 %v2100_v42, %v2099_v39  ;;  %v2128_v46 = vpop.f32.mrb[25].mxu1  ;;  %v2102_v47 = vpop.f32.mrb[26].mxu0 }
 0x159   :  { %v2284_v40 = vpop.eup %2283  ;;  %v2129_v49 = vadd.f32 %v2128_v46, %v2127_v41  ;;  %v2130_v50 = vpop.f32.mrb[26].mxu1 }
 0x15a   :  { %v1646_v43 = vmul.f32 %v2284_v40, %v1640_v37  ;;  %v2103_v51 = vpop.f32.mrb[27].mxu0  ;;  %v1525_v55 = vadd.f32 %v2101_v44, %v1477_v10  ;;  %v2131_v57 = vpop.f32.mrb[27].mxu1 }
 0x15b   :  { %v2104_v56 = vadd.f32 %v2103_v51, %v2102_v47  ;;  %v2132_v58 = vadd.f32 %v2131_v57, %v2130_v50  ;;  %v1649_v57 = vld [vmem:[%s2828_s3 + $0x1] sm:$0x1] }
 0x15c   :  { %v1650_v52 = vmul.f32 %v1646_v43, %v1606_v54  ;;  %v1659_v53 = vrot.slane %v1646_v43, %v2785_v38  ;;  %v2794_v63 = vadd.f32 %v2129_v49, %v1525_v55 }
 0x15d   :  { %v1528_v0 = vadd.f32 %v2104_v56, %v1480_v13 }
 0x15e   :  { %v1652_v59 = vsub.f32 %v1648_v48, %v1650_v52  ;;  %v1666_v60 = vmul.f32 %v1659_v53, %v2768_v30  ;;  %v1667_v61 = vmul.f32 %v1659_v53, %v2770_v32  ;;  %v1668_v62 = vmul.f32 %v1659_v53, %v2774_v45  ;;  %v2105_v2 = vpop.f32.mrb[28].mxu0  ;;  %v1641_v53 = vld [vmem:[%s2827_s2 + $0x1] sm:$0x1] }
 0x15f   :  { %v1576_v54 = vadd.f32 %v2132_v58, %v1528_v0  ;;  %v2133_v3 = vpop.f32.mrb[28].mxu1  ;;  %v2106_v4 = vpop.f32.mrb[29].mxu0 }
 0x160   :  { %v1677_v1 = vrot.slane %v1652_v59, %v2785_v38  ;;  %v2107_v8 = vadd.f32 %v2106_v4, %v2105_v2  ;;  %v2134_v9 = vpop.f32.mrb[29].mxu1  ;;  %v2108_v10 = vpop.f32.mrb[30].mxu0 }
 0x161   :  { %v1596_v30 = vadd.f32 %v1576_v54, %v2794_v63  ;;  %v2135_v32 = vadd.f32 %v2134_v9, %v2133_v3  ;;  %v2136_v11 = vpop.f32.mrb[30].mxu1  ;;  %v2109_v45 = vpop.f32.mrb[31].mxu0 }
 0x162   :  { %v1684_v5 = vadd.f32 %v1677_v1, %v1666_v60  ;;  %v1685_v6 = vadd.f32 %v1677_v1, %v1667_v61  ;;  %v1686_v7 = vadd.f32 %v1677_v1, %v1668_v62  ;;  %v1533_v15 = vadd.f32 %v2107_v8, %v1485_v35  ;;  %v2137_v16 = vpop.f32.mrb[31].mxu1 }
 0x164   :  { %v1690_v12 = vmul.f32 0.2, %v1684_v5  ;;  %v1691_v14 = vmul.f32 0.2, %v1685_v6  ;;  %v1692_v13 = vmul.f32 0.2, %v1686_v7  ;;  %v1581_v20 = vadd.f32 %v2135_v32, %v1533_v15 }
 0x166   :  { %v1696_v17 = vmax.f32 %v1684_v5, %v1690_v12  ;;  %v1697_v18 = vmax.f32 %v1685_v6, %v1691_v14  ;;  %v1698_v19 = vmax.f32 %v1686_v7, %v1692_v13  ;;  %v1597_v23 = vsel %vm1587_vm0, %v1581_v20, 0.0 }
 0x167   :  { %v1598_v24 = vadd.f32 %v1597_v23, %v1596_v30 }
 0x168   :  { %v1906_v21 = vpack.c.bf16 %v1698_v19, %v1698_v19  ;;  %v1913_v22 = vpack.c.bf16 %v1697_v18, %v1696_v17 }
 0x169   :  { %v1599_v25 = vrot.slane %v1598_v24, 4 }
 0x16a   :  { %1914 = vst [vmem:[%s2829_s4] sm:$0xff] %v1913_v22   ;;  %1730 = vst [vmem:[%s2829_s4 + $0x8] sm:$0x1] %v1906_v21 }
 0x16b   :  { %v1600_v26 = vadd.f32 %v1599_v25, %v1598_v24 }
 0x16d   :  { %v1601_v27 = vrot.slane %v1600_v26, 2 }
 0x16f   :  { %v1602_v28 = vadd.f32 %v1601_v27, %v1600_v26 }
 0x171   :  { %v1603_v29 = vrot.slane %v1602_v28, 1 }
 0x173   :  { %v1604_v31 = vadd.f32 %v1603_v29, %v1602_v28 }
 0x175   :  { %v1607_v33 = vmul.f32 0.055555556, %v1604_v31 }
 0x177   :  { %v1611_v34 = vsub.f32 %v2794_v63, %v1607_v33  ;;  %v1612_v35 = vsub.f32 %v1576_v54, %v1607_v33  ;;  %v1613_v36 = vsub.f32 %v1581_v20, %v1607_v33 }
 0x179   :  { %v1617_v37 = vmul.f32 %v1611_v34, %v1611_v34  ;;  %v1618_v39 = vmul.f32 %v1612_v35, %v1612_v35  ;;  %v1619_v40 = vmul.f32 %v1613_v36, %v1613_v36 }
 0x17b   :  { %v1629_v41 = vadd.f32 %v1618_v39, %v1617_v37  ;;  %v1630_v42 = vsel %vm1587_vm0, %v1619_v40, 0.0 }
 0x17d   :  { %v1631_v43 = vadd.f32 %v1630_v42, %v1629_v41 }
 0x17f   :  { %v1632_v44 = vrot.slane %v1631_v43, 4 }
 0x181   :  { %v1633_v46 = vadd.f32 %v1632_v44, %v1631_v43 }
 0x183   :  { %v1634_v47 = vrot.slane %v1633_v46, 2 }
 0x185   :  { %v1635_v48 = vadd.f32 %v1634_v47, %v1633_v46 }
 0x187   :  { %v1636_v49 = vrot.slane %v1635_v48, 1 }
 0x189   :  { %v1637_v50 = vadd.f32 %v1636_v49, %v1635_v48 }
 0x18b   :  { %v1639_v51 = vmul.f32 0.055555556, %v1637_v50 }
 0x18d   :  { %v1643_v52 = vadd.f32 1e-05, %v1639_v51 }
 0x18f   :  { %2285 = vrsqrt.f32 %v1643_v52 }
 0x199   :  { %v2286_v55 = vpop.eup %2285 }
 0x19a   :  { %v1647_v56 = vmul.f32 %v2286_v55, %v1641_v53 }
 0x19c   :  { %v1651_v58 = vmul.f32 %v1647_v56, %v1607_v33  ;;  %v1663_v59 = vrot.slane %v1647_v56, %v2785_v38 }
 0x19e   :  { %v1653_v60 = vsub.f32 %v1649_v57, %v1651_v58  ;;  %v1669_v61 = vmul.f32 %v1663_v59, %v2794_v63  ;;  %v1670_v62 = vmul.f32 %v1663_v59, %v1576_v54  ;;  %v1671_v0 = vmul.f32 %v1663_v59, %v1581_v20 }
 0x1a0   :  { %v1681_v1 = vrot.slane %v1653_v60, %v2785_v38 }
 0x1a2   :  { %v1687_v2 = vadd.f32 %v1681_v1, %v1669_v61  ;;  %v1688_v3 = vadd.f32 %v1681_v1, %v1670_v62  ;;  %v1689_v4 = vadd.f32 %v1681_v1, %v1671_v0 }
 0x1a4   :  { %v1693_v5 = vmul.f32 0.2, %v1687_v2  ;;  %v1694_v6 = vmul.f32 0.2, %v1688_v3  ;;  %v1695_v7 = vmul.f32 0.2, %v1689_v4 }
 0x1a6   :  { %v1699_v8 = vmax.f32 %v1687_v2, %v1693_v5  ;;  %v1700_v9 = vmax.f32 %v1688_v3, %v1694_v6  ;;  %v1701_v10 = vmax.f32 %v1689_v4, %v1695_v7 }
 0x1a8   :  { %v1907_v30 = vpack.c.bf16 %v1699_v8, %v1699_v8  ;;  %v1908_v32 = vpack.c.bf16 %v1700_v9, %v1700_v9  ;;  %v1909_v11 = vpack.c.bf16 %v1701_v10, %v1701_v10 }
 0x1aa   :  { %1731 = vst [vmem:[%s2829_s4 + $0xc] sm:$0xf] %v1907_v30  ;;  %1732 = vst [vmem:[%s2829_s4 + $0x10] sm:$0xf] %v1908_v32 }
 0x1ab   :  { %1733 = vst [vmem:[%s2829_s4 + $0x14] sm:$0x1] %v1909_v11 }

// kernel: squeeze.2
= control target key start
LH: loop header
LB: loop body
LE: loop exit
PB: predicated region body
PF: predicated region fallthrough
CT: control target
= control target key end

     0   :  { %s110_s0 = inlined_call_operand.vmem [shape: f32[8], index: 0, kind: input, shape index: {}]   ;;  %s111_s1 = inlined_call_operand.hbm [shape: f32[2,1,2,2], index: 1, kind: output, shape index: {}]  }
   0x1   :  { %v5_v0 = vld [vmem:[%s110_s0] sm:$0x1] }
   0x2   :  { %6 = vst [vmem:[#allocation3] sm:$0x1] %v5_v0 }
   0x3   :  { %2 = vsyncpa [#allocation1], 0  ;;  %vm8_vm0 = vcmask 15360   ;;  %s77_s0 = smov 126   ;;  %s78_s8 = smov 122  }
   0x4   :  { %s79_s9 = smov 124   ;;  %s80_s10 = smov [#allocation0]  }
   0x5   :  { %s43_s11 = sshll.u32 %s80_s10, 4  ;;  %s44_s11 = int_to_ptr.vmem [resolvable:$true] %s43_s11 }
   0x6   :  { %s53_s12 = scalar_lea.vmem %s44_s11, 64  ;;  %p58_p1 = scmp.lt.s32.totalorder %s44_s11, %s44_s11 }
   0x7   :  { %p54_p0 = scmp.ne.s32.totalorder %s44_s11, %s53_s12  ;;  %p59_p2 = scmp.lt.s32.totalorder %s53_s12, %s53_s12 }
   0x9   :  { %v10_v1 = vld [vmem:[#allocation3] sm:$0x1]   ;;  %p60_p3 = por %p59_p2, %p58_p1 }
   0xa   :  { %v22_v2 = vld [vmem:[#allocation3] sm:$0x1]   ;;  %11 = vrot.lane.b32.xlu0 %v10_v1, %s77_s0 }
   0xb   :  { %23 = vrot.lane.b32.xlu1 %v22_v2, %s78_s8  ;;  %v7_v3 = vld [vmem:[#allocation3] sm:$0x1]   ;;  %p61_p4 = pnand %p60_p3, %p54_p0 }
   0xc   :  { %v16_v4 = vld [vmem:[#allocation3] sm:$0x1]   ;;  %9 = vst.msk [vmem:[#allocation2] sm:$0x1] %vm8_vm0, %v7_v3  }
   0xe   :  { %17 = vrot.lane.b32.xlu0 %v16_v4, %s79_s9 }
  0x7c   :  { %v12_v5 = vpop.permute.xlu0 %11  }
  0x7d   :  { %v24_v6 = vpop.permute.xlu1 %23   ;;  %15 = vst.msk [vmem:[#allocation2 + $0x1] sm:$0x1] %vm8_vm0, %v12_v5  }
  0x7e   :  { %27 = vst.msk [vmem:[#allocation2 + $0x9] sm:$0x1] %vm8_vm0, %v24_v6  }
  0x80   :  { %v18_v7 = vpop.permute.xlu0 %17  }
  0x81   :  { %21 = vst.msk [vmem:[#allocation2 + $0x8] sm:$0x1] %vm8_vm0, %v18_v7  }
  0x84   :  { %v31_v8 = vld [vmem:[#allocation2] sm:$0x3] }
  0x85   :  { %33 = vst [vmem:[#allocation0] sm:$0x3] %v31_v8 }
  0x88   :  { %v35_v9 = vld [vmem:[#allocation2 + $0x8] sm:$0x3] }
  0x89   :  { %38 = vst [vmem:[#allocation0 + $0x2] sm:$0x3] %v35_v9 }
  0x8a   :  { %64 = shalt.err (!%p61_p4)
}
  0x8b   :  { %s65_s15 = scalar_lea.hbm %s111_s1, 64 }
  0x8c   :  { %p66_p5 = scmp.ne.s32.totalorder %s111_s1, %s65_s15  ;;  %p69_p6 = scmp.lt.u32.totalorder %s65_s15, %s111_s1 }
  0x8e   :  { %p71_p7 = pnand %p69_p6, %p66_p5 }
  0x90   :  { %74 = shalt.err (!%p71_p7)
}
  0x91   :  { %46 = dma.vmem_to_hbm [thread:$0]  %s44_s11, 64, %s111_s1, [#allocation1]  }
  0x92   :  { %75 = dma.done.wait [#allocation1], 64  }
  0x93   :  { %76 = vsyncadd [#allocation1], 4294967232 }
  0x94   :  { %48 = vsyncpa [#allocation1], 1 }

// kernel: _lambda_.9
= control target key start
LH: loop header
LB: loop body
LE: loop exit
PB: predicated region body
PF: predicated region fallthrough
CT: control target
= control target key end

     0   :  { %vm2845_vm0 = vcmask 7168   ;;  %s4632_s1 = inlined_call_operand.vmem [shape: bf16[2,2048,1], index: 1, kind: input, shape index: {}]   ;;  %s4633_s0 = inlined_call_operand.vmem [shape: bf16[2,8,2048], index: 0, kind: input, shape index: {}]   ;;  %s4634_s2 = inlined_call_operand.vmem [shape: f32[2,1,1], index: 2, kind: input, shape index: {}]   ;;  %s4635_s3 = inlined_call_operand.vmem [shape: f32[2,8,1], index: 3, kind: output, shape index: {}]  }
   0x1   :  { %v3494_v0 = vld [vmem:[%s4632_s1 + $0x40] sm:$0xff]   ;;  %v3498_v4 = vld [vmem:[%s4632_s1 + $0x48] sm:$0xff]   ;;  %v3502_v8 = vld [vmem:[%s4632_s1 + $0x50] sm:$0xff]  }
   0x2   :  { %v3495_v1 = vld [vmem:[%s4632_s1 + $0xc0] sm:$0xff]   ;;  %3142 = vmatprep.subr.bf16.mxu0 %v3494_v0  ;;  %v3499_v5 = vld [vmem:[%s4632_s1 + $0xc8] sm:$0xff]   ;;  %v3503_v9 = vld [vmem:[%s4632_s1 + $0xd0] sm:$0xff]  }
   0x3   :  { %v3496_v2 = vld [vmem:[%s4632_s1] sm:$0xff]   ;;  %3164 = vmatprep.subr.bf16.mxu1 %v3495_v1  ;;  %v3500_v6 = vld [vmem:[%s4632_s1 + $0x8] sm:$0xff]   ;;  %v3504_v10 = vld [vmem:[%s4632_s1 + $0x10] sm:$0xff]  }
   0x4   :  { %v3497_v3 = vld [vmem:[%s4632_s1 + $0x80] sm:$0xff]   ;;  %3143 = vmatpush3.bf16.msra.mxu0 %v3496_v2  ;;  %v3501_v7 = vld [vmem:[%s4632_s1 + $0x88] sm:$0xff]   ;;  %v3505_v11 = vld [vmem:[%s4632_s1 + $0x90] sm:$0xff]  }
   0x5   :  { %3165 = vmatpush3.bf16.msra.mxu1 %v3497_v3  ;;  %3144 = vmatprep.subr.bf16.mxu0 %v3498_v4  ;;  %v3506_v12 = vld [vmem:[%s4632_s1 + $0x58] sm:$0xff]   ;;  %v3510_v16 = vld [vmem:[%s4632_s1 + $0x60] sm:$0xff]   ;;  %v3514_v20 = vld [vmem:[%s4632_s1 + $0x68] sm:$0xff]  }
   0x6   :  { %3166 = vmatprep.subr.bf16.mxu1 %v3499_v5  ;;  %v3507_v13 = vld [vmem:[%s4632_s1 + $0xd8] sm:$0xff]   ;;  %v3511_v17 = vld [vmem:[%s4632_s1 + $0xe0] sm:$0xff]   ;;  %v3515_v21 = vld [vmem:[%s4632_s1 + $0xe8] sm:$0xff]  }
   0x7   :  { %v3508_v14 = vld [vmem:[%s4632_s1 + $0x18] sm:$0xff]   ;;  %v3512_v18 = vld [vmem:[%s4632_s1 + $0x20] sm:$0xff]   ;;  %v3516_v22 = vld [vmem:[%s4632_s1 + $0x28] sm:$0xff]  }
   0x8   :  { %3145 = vmatpush3.bf16.msra.mxu0 %v3500_v6  ;;  %v3509_v15 = vld [vmem:[%s4632_s1 + $0x98] sm:$0xff]   ;;  %v3513_v19 = vld [vmem:[%s4632_s1 + $0xa0] sm:$0xff]   ;;  %v3517_v23 = vld [vmem:[%s4632_s1 + $0xa8] sm:$0xff]  }
   0x9   :  { %3167 = vmatpush3.bf16.msra.mxu1 %v3501_v7  ;;  %3146 = vmatprep.subr.bf16.mxu0 %v3502_v8  ;;  %v3518_v24 = vld [vmem:[%s4632_s1 + $0x70] sm:$0xff]   ;;  %v3522_v28 = vld [vmem:[%s4632_s1 + $0x78] sm:$0xff]   ;;  %v15_v32 = vld [vmem:[%s4633_s0] sm:$0xff] }
   0xa   :  { %3168 = vmatprep.subr.bf16.mxu1 %v3503_v9  ;;  %v3519_v25 = vld [vmem:[%s4632_s1 + $0xf0] sm:$0xff]   ;;  %v3523_v29 = vld [vmem:[%s4632_s1 + $0xf8] sm:$0xff]   ;;  %v16_v33 = vld [vmem:[%s4633_s0 + $0x8] sm:$0xff]  ;;  %v2854_v34 = vcombine.low %v15_v32, %v15_v32  ;;  %v2855_v35 = vcombine.high %v15_v32, %v15_v32 }
   0xb   :  { %v3520_v26 = vld [vmem:[%s4632_s1 + $0x30] sm:$0xff]   ;;  %v3524_v30 = vld [vmem:[%s4632_s1 + $0x38] sm:$0xff]   ;;  %v2856_v36 = vcombine.low %v16_v33, %v16_v33  ;;  %v2857_v37 = vcombine.high %v16_v33, %v16_v33  ;;  %v3530_v38 = vld [vmem:[%s4632_s1 + $0x140] sm:$0xff]  }
   0xc   :  { %3147 = vmatpush3.bf16.msra.mxu0 %v3504_v10  ;;  %v3521_v27 = vld [vmem:[%s4632_s1 + $0xb0] sm:$0xff]   ;;  %v3525_v31 = vld [vmem:[%s4632_s1 + $0xb8] sm:$0xff]   ;;  %v3531_v39 = vld [vmem:[%s4632_s1 + $0x1c0] sm:$0xff]   ;;  %1413 = vmatprep.mubr.bf16.mxu0 %v2855_v35 }
   0xd   :  { %3169 = vmatpush3.bf16.msra.mxu1 %v3505_v11  ;;  %3148 = vmatprep.subr.bf16.mxu0 %v3506_v12  ;;  %v3532_v40 = vld [vmem:[%s4632_s1 + $0x100] sm:$0xff]   ;;  %v3534_v42 = vld [vmem:[%s4632_s1 + $0x148] sm:$0xff]   ;;  %v3538_v46 = vld [vmem:[%s4632_s1 + $0x150] sm:$0xff]  }
   0xe   :  { %3170 = vmatprep.subr.bf16.mxu1 %v3507_v13  ;;  %1453 = vmatprep.mubr.bf16.mxu1 %v2857_v37  ;;  %v3533_v41 = vld [vmem:[%s4632_s1 + $0x180] sm:$0xff]   ;;  %v3535_v43 = vld [vmem:[%s4632_s1 + $0x1c8] sm:$0xff]   ;;  %v3539_v47 = vld [vmem:[%s4632_s1 + $0x1d0] sm:$0xff]  }
   0xf   :  { %v3536_v44 = vld [vmem:[%s4632_s1 + $0x108] sm:$0xff]   ;;  %v3540_v48 = vld [vmem:[%s4632_s1 + $0x110] sm:$0xff]   ;;  %v3542_v50 = vld [vmem:[%s4632_s1 + $0x158] sm:$0xff]  }
  0x10   :  { %3149 = vmatpush3.bf16.msra.mxu0 %v3508_v14  ;;  %v3537_v45 = vld [vmem:[%s4632_s1 + $0x188] sm:$0xff]   ;;  %v3541_v49 = vld [vmem:[%s4632_s1 + $0x190] sm:$0xff]   ;;  %v3543_v51 = vld [vmem:[%s4632_s1 + $0x1d8] sm:$0xff]  }
  0x11   :  { %3171 = vmatpush3.bf16.msra.mxu1 %v3509_v15  ;;  %3150 = vmatprep.subr.bf16.mxu0 %v3510_v16  ;;  %v3544_v52 = vld [vmem:[%s4632_s1 + $0x118] sm:$0xff]   ;;  %v3546_v54 = vld [vmem:[%s4632_s1 + $0x160] sm:$0xff]   ;;  %v3550_v58 = vld [vmem:[%s4632_s1 + $0x168] sm:$0xff]  }
  0x12   :  { %3172 = vmatprep.subr.bf16.mxu1 %v3511_v17  ;;  %v3545_v53 = vld [vmem:[%s4632_s1 + $0x198] sm:$0xff]   ;;  %v3547_v55 = vld [vmem:[%s4632_s1 + $0x1e0] sm:$0xff]   ;;  %v3551_v59 = vld [vmem:[%s4632_s1 + $0x1e8] sm:$0xff]  }
  0x13   :  { %v3548_v56 = vld [vmem:[%s4632_s1 + $0x120] sm:$0xff]   ;;  %v3552_v60 = vld [vmem:[%s4632_s1 + $0x128] sm:$0xff]   ;;  %v3554_v62 = vld [vmem:[%s4632_s1 + $0x170] sm:$0xff]  }
  0x14   :  { %3151 = vmatpush3.bf16.msra.mxu0 %v3512_v18  ;;  %v3549_v57 = vld [vmem:[%s4632_s1 + $0x1a0] sm:$0xff]   ;;  %v3553_v61 = vld [vmem:[%s4632_s1 + $0x1a8] sm:$0xff]   ;;  %v3555_v63 = vld [vmem:[%s4632_s1 + $0x1f0] sm:$0xff]  }
  0x15   :  { %3173 = vmatpush3.bf16.msra.mxu1 %v3513_v19  ;;  %3152 = vmatprep.subr.bf16.mxu0 %v3514_v20  ;;  %v3556_v0 = vld [vmem:[%s4632_s1 + $0x130] sm:$0xff]   ;;  %v3558_v2 = vld [vmem:[%s4632_s1 + $0x178] sm:$0xff]   ;;  %v3566_v12 = vld [vmem:[%s4632_s1 + $0x240] sm:$0xff]  }
  0x16   :  { %3174 = vmatprep.subr.bf16.mxu1 %v3515_v21  ;;  %v3557_v1 = vld [vmem:[%s4632_s1 + $0x1b0] sm:$0xff]   ;;  %v3559_v3 = vld [vmem:[%s4632_s1 + $0x1f8] sm:$0xff]   ;;  %v3567_v13 = vld [vmem:[%s4632_s1 + $0x2c0] sm:$0xff]  }
  0x17   :  { %v3560_v4 = vld [vmem:[%s4632_s1 + $0x138] sm:$0xff]   ;;  %v17_v6 = vld [vmem:[%s4633_s0 + $0x10] sm:$0xff]  ;;  %v3568_v14 = vld [vmem:[%s4632_s1 + $0x200] sm:$0xff]  }
  0x18   :  { %3153 = vmatpush3.bf16.msra.mxu0 %v3516_v22  ;;  %v3561_v5 = vld [vmem:[%s4632_s1 + $0x1b8] sm:$0xff]   ;;  %v2858_v7 = vcombine.low %v17_v6, %v17_v6  ;;  %v2859_v8 = vcombine.high %v17_v6, %v17_v6  ;;  %v3569_v15 = vld [vmem:[%s4632_s1 + $0x280] sm:$0xff]   ;;  %v3570_v16 = vld [vmem:[%s4632_s1 + $0x248] sm:$0xff]  }
  0x19   :  { %3175 = vmatpush3.bf16.msra.mxu1 %v3517_v23  ;;  %3154 = vmatprep.subr.bf16.mxu0 %v3518_v24  ;;  %v18_v9 = vld [vmem:[%s4633_s0 + $0x18] sm:$0xff]  ;;  %v3571_v17 = vld [vmem:[%s4632_s1 + $0x2c8] sm:$0xff]   ;;  %v3574_v20 = vld [vmem:[%s4632_s1 + $0x250] sm:$0xff]  }
  0x1a   :  { %3176 = vmatprep.subr.bf16.mxu1 %v3519_v25  ;;  %v2860_v10 = vcombine.low %v18_v9, %v18_v9  ;;  %v2861_v11 = vcombine.high %v18_v9, %v18_v9  ;;  %v3572_v18 = vld [vmem:[%s4632_s1 + $0x208] sm:$0xff]   ;;  %v3575_v21 = vld [vmem:[%s4632_s1 + $0x2d0] sm:$0xff]   ;;  %v3578_v24 = vld [vmem:[%s4632_s1 + $0x258] sm:$0xff]  }
  0x1b   :  { %v3573_v19 = vld [vmem:[%s4632_s1 + $0x288] sm:$0xff]   ;;  %v3576_v22 = vld [vmem:[%s4632_s1 + $0x210] sm:$0xff]   ;;  %v3579_v25 = vld [vmem:[%s4632_s1 + $0x2d8] sm:$0xff]  }
  0x1c   :  { %3155 = vmatpush3.bf16.msra.mxu0 %v3520_v26  ;;  %v3577_v23 = vld [vmem:[%s4632_s1 + $0x290] sm:$0xff]   ;;  %v3580_v26 = vld [vmem:[%s4632_s1 + $0x218] sm:$0xff]   ;;  %v3586_v32 = vld [vmem:[%s4632_s1 + $0x268] sm:$0xff]  }
  0x1d   :  { %3177 = vmatpush3.bf16.msra.mxu1 %v3521_v27  ;;  %3156 = vmatprep.subr.bf16.mxu0 %v3522_v28  ;;  %v3581_v27 = vld [vmem:[%s4632_s1 + $0x298] sm:$0xff]   ;;  %v3582_v28 = vld [vmem:[%s4632_s1 + $0x260] sm:$0xff]   ;;  %v3587_v33 = vld [vmem:[%s4632_s1 + $0x2e8] sm:$0xff]  }
  0x1e   :  { %3178 = vmatprep.subr.bf16.mxu1 %v3523_v29  ;;  %v3583_v29 = vld [vmem:[%s4632_s1 + $0x2e0] sm:$0xff]   ;;  %v3589_v35 = vld [vmem:[%s4632_s1 + $0x2a8] sm:$0xff]   ;;  %v3591_v37 = vld [vmem:[%s4632_s1 + $0x2f0] sm:$0xff]  }
  0x1f   :  { %v3622_v6 = vld [vmem:[%s4632_s1 + $0x368] sm:$0xff]  }
  0x20   :  { %3157 = vmatpush3.bf16.msra.mxu0 %v3524_v30  ;;  %v3584_v30 = vld [vmem:[%s4632_s1 + $0x220] sm:$0xff]   ;;  %v3625_v9 = vld [vmem:[%s4632_s1 + $0x3a8] sm:$0xff]  }
  0x21   :  { %3179 = vmatpush3.bf16.msra.mxu1 %v3525_v31  ;;  %3186 = vmatprep.subr.bf16.mxu0 %v3530_v38  ;;  %v3585_v31 = vld [vmem:[%s4632_s1 + $0x2a0] sm:$0xff]   ;;  %v3592_v38 = vld [vmem:[%s4632_s1 + $0x230] sm:$0xff]  }
  0x22   :  { %3208 = vmatprep.subr.bf16.mxu1 %v3531_v39  ;;  %v3593_v39 = vld [vmem:[%s4632_s1 + $0x2b0] sm:$0xff]  }
  0x23   :  { %1414 = vmatmul.mubr.bf16.vlgmr.msra.gmra.mrb[0].mxu0 %v2854_v34  ;;  %v3588_v34 = vld [vmem:[%s4632_s1 + $0x228] sm:$0xff]  }
  0x24   :  { %1454 = vmatmul.mubr.bf16.vlgmr.msra.gmra.mrb[0].mxu1 %v2856_v36  ;;  %3187 = vmatpush3.bf16.msra.mxu0 %v3532_v40  ;;  %v3590_v36 = vld [vmem:[%s4632_s1 + $0x270] sm:$0xff]   ;;  %v3594_v40 = vld [vmem:[%s4632_s1 + $0x278] sm:$0xff]  }
  0x25   :  { %3209 = vmatpush3.bf16.msra.mxu1 %v3533_v41  ;;  %3188 = vmatprep.subr.bf16.mxu0 %v3534_v42  ;;  %v3595_v41 = vld [vmem:[%s4632_s1 + $0x2f8] sm:$0xff]  }
  0x26   :  { %3210 = vmatprep.subr.bf16.mxu1 %v3535_v43  ;;  %1493 = vmatprep.mubr.bf16.mxu0 %v2859_v8  ;;  %v3596_v42 = vld [vmem:[%s4632_s1 + $0x238] sm:$0xff]   ;;  %v3624_v8 = vld [vmem:[%s4632_s1 + $0x328] sm:$0xff]  }
  0x27   :  { %1533 = vmatprep.mubr.bf16.mxu1 %v2861_v11  ;;  %v3597_v43 = vld [vmem:[%s4632_s1 + $0x2b8] sm:$0xff]   ;;  %v3627_v11 = vld [vmem:[%s4632_s1 + $0x3f0] sm:$0xff]  }
  0x28   :  { %3189 = vmatpush3.bf16.msra.mxu0 %v3536_v44  ;;  %v19_v44 = vld [vmem:[%s4633_s0 + $0x20] sm:$0xff] }
  0x29   :  { %3211 = vmatpush3.bf16.msra.mxu1 %v3537_v45  ;;  %3190 = vmatprep.subr.bf16.mxu0 %v3538_v46  ;;  %v20_v45 = vld [vmem:[%s4633_s0 + $0x28] sm:$0xff]  ;;  %v2862_v46 = vcombine.low %v19_v44, %v19_v44 }
  0x2a   :  { %3212 = vmatprep.subr.bf16.mxu1 %v3539_v47  ;;  %v2863_v47 = vcombine.high %v19_v44, %v19_v44  ;;  %v3658_v44 = vld [vmem:[%s4632_s1 + $0x468] sm:$0xff]  }
  0x2c   :  { %3191 = vmatpush3.bf16.msra.mxu0 %v3540_v48  ;;  %v2864_v48 = vcombine.low %v20_v45, %v20_v45 }
  0x2d   :  { %3213 = vmatpush3.bf16.msra.mxu1 %v3541_v49  ;;  %3192 = vmatprep.subr.bf16.mxu0 %v3542_v50  ;;  %v2865_v49 = vcombine.high %v20_v45, %v20_v45  ;;  %v3602_v50 = vld [vmem:[%s4632_s1 + $0x340] sm:$0xff]   ;;  %v3659_v45 = vld [vmem:[%s4632_s1 + $0x4e8] sm:$0xff]  }
  0x2e   :  { %3214 = vmatprep.subr.bf16.mxu1 %v3543_v51  ;;  %v3603_v51 = vld [vmem:[%s4632_s1 + $0x3c0] sm:$0xff]  }
  0x30   :  { %3193 = vmatpush3.bf16.msra.mxu0 %v3544_v52  ;;  %v3604_v52 = vld [vmem:[%s4632_s1 + $0x300] sm:$0xff]  }
  0x31   :  { %3215 = vmatpush3.bf16.msra.mxu1 %v3545_v53  ;;  %3194 = vmatprep.subr.bf16.mxu0 %v3546_v54  ;;  %v3605_v53 = vld [vmem:[%s4632_s1 + $0x380] sm:$0xff]   ;;  %v3606_v54 = vld [vmem:[%s4632_s1 + $0x348] sm:$0xff]  }
  0x32   :  { %3216 = vmatprep.subr.bf16.mxu1 %v3547_v55  ;;  %v3607_v55 = vld [vmem:[%s4632_s1 + $0x3c8] sm:$0xff]  }
  0x34   :  { %3195 = vmatpush3.bf16.msra.mxu0 %v3548_v56  ;;  %v3608_v56 = vld [vmem:[%s4632_s1 + $0x308] sm:$0xff]  }
  0x35   :  { %3217 = vmatpush3.bf16.msra.mxu1 %v3549_v57  ;;  %3196 = vmatprep.subr.bf16.mxu0 %v3550_v58  ;;  %v3609_v57 = vld [vmem:[%s4632_s1 + $0x388] sm:$0xff]   ;;  %v3610_v58 = vld [vmem:[%s4632_s1 + $0x350] sm:$0xff]  }
  0x36   :  { %3218 = vmatprep.subr.bf16.mxu1 %v3551_v59  ;;  %v3611_v59 = vld [vmem:[%s4632_s1 + $0x3d0] sm:$0xff]  }
  0x38   :  { %3197 = vmatpush3.bf16.msra.mxu0 %v3552_v60  ;;  %v3612_v60 = vld [vmem:[%s4632_s1 + $0x310] sm:$0xff]  }
  0x39   :  { %3219 = vmatpush3.bf16.msra.mxu1 %v3553_v61  ;;  %3198 = vmatprep.subr.bf16.mxu0 %v3554_v62  ;;  %v3613_v61 = vld [vmem:[%s4632_s1 + $0x390] sm:$0xff]   ;;  %v3614_v62 = vld [vmem:[%s4632_s1 + $0x358] sm:$0xff]  }
  0x3a   :  { %3220 = vmatprep.subr.bf16.mxu1 %v3555_v63  ;;  %v3615_v63 = vld [vmem:[%s4632_s1 + $0x3d8] sm:$0xff]  }
  0x3c   :  { %3199 = vmatpush3.bf16.msra.mxu0 %v3556_v0  ;;  %v3616_v0 = vld [vmem:[%s4632_s1 + $0x318] sm:$0xff]  }
  0x3d   :  { %3221 = vmatpush3.bf16.msra.mxu1 %v3557_v1  ;;  %3200 = vmatprep.subr.bf16.mxu0 %v3558_v2  ;;  %v3617_v1 = vld [vmem:[%s4632_s1 + $0x398] sm:$0xff]   ;;  %v3618_v2 = vld [vmem:[%s4632_s1 + $0x360] sm:$0xff]  }
  0x3e   :  { %3222 = vmatprep.subr.bf16.mxu1 %v3559_v3  ;;  %v3619_v3 = vld [vmem:[%s4632_s1 + $0x3e0] sm:$0xff]  }
  0x40   :  { %3201 = vmatpush3.bf16.msra.mxu0 %v3560_v4  ;;  %v3620_v4 = vld [vmem:[%s4632_s1 + $0x320] sm:$0xff]  }
  0x41   :  { %3223 = vmatpush3.bf16.msra.mxu1 %v3561_v5  ;;  %3230 = vmatprep.subr.bf16.mxu0 %v3566_v12  ;;  %v3621_v5 = vld [vmem:[%s4632_s1 + $0x3a0] sm:$0xff]   ;;  %v3628_v12 = vld [vmem:[%s4632_s1 + $0x330] sm:$0xff]  }
  0x42   :  { %3252 = vmatprep.subr.bf16.mxu1 %v3567_v13  ;;  %v3629_v13 = vld [vmem:[%s4632_s1 + $0x3b0] sm:$0xff]  }
  0x43   :  { %1494 = vmatmul.mubr.bf16.vlgmr.msra.gmra.mrb[4].mxu0 %v2858_v7  ;;  %v3623_v7 = vld [vmem:[%s4632_s1 + $0x3e8] sm:$0xff]  }
  0x44   :  { %1534 = vmatmul.mubr.bf16.vlgmr.msra.gmra.mrb[4].mxu1 %v2860_v10  ;;  %3231 = vmatpush3.bf16.msra.mxu0 %v3568_v14  ;;  %v3626_v10 = vld [vmem:[%s4632_s1 + $0x370] sm:$0xff]   ;;  %v3630_v14 = vld [vmem:[%s4632_s1 + $0x378] sm:$0xff]  }
  0x45   :  { %3253 = vmatpush3.bf16.msra.mxu1 %v3569_v15  ;;  %3232 = vmatprep.subr.bf16.mxu0 %v3570_v16  ;;  %v3631_v15 = vld [vmem:[%s4632_s1 + $0x3f8] sm:$0xff]  }
  0x46   :  { %3254 = vmatprep.subr.bf16.mxu1 %v3571_v17  ;;  %1573 = vmatprep.mubr.bf16.mxu0 %v2863_v47  ;;  %v3632_v16 = vld [vmem:[%s4632_s1 + $0x338] sm:$0xff]   ;;  %v3661_v47 = vld [vmem:[%s4632_s1 + $0x4a8] sm:$0xff]  }
  0x47   :  { %1613 = vmatprep.mubr.bf16.mxu1 %v2865_v49  ;;  %v3633_v17 = vld [vmem:[%s4632_s1 + $0x3b8] sm:$0xff]   ;;  %v3663_v49 = vld [vmem:[%s4632_s1 + $0x4f0] sm:$0xff]  }
  0x48   :  { %3233 = vmatpush3.bf16.msra.mxu0 %v3572_v18  ;;  %v21_v18 = vld [vmem:[%s4633_s0 + $0x30] sm:$0xff] }
  0x49   :  { %3255 = vmatpush3.bf16.msra.mxu1 %v3573_v19  ;;  %3234 = vmatprep.subr.bf16.mxu0 %v3574_v20  ;;  %v22_v19 = vld [vmem:[%s4633_s0 + $0x38] sm:$0xff]  ;;  %v2866_v20 = vcombine.low %v21_v18, %v21_v18 }
  0x4a   :  { %3256 = vmatprep.subr.bf16.mxu1 %v3575_v21  ;;  %v2867_v21 = vcombine.high %v21_v18, %v21_v18  ;;  %v3694_v18 = vld [vmem:[%s4632_s1 + $0x568] sm:$0xff]  }
  0x4c   :  { %3235 = vmatpush3.bf16.msra.mxu0 %v3576_v22  ;;  %v2868_v22 = vcombine.low %v22_v19, %v22_v19 }
  0x4d   :  { %3257 = vmatpush3.bf16.msra.mxu1 %v3577_v23  ;;  %3236 = vmatprep.subr.bf16.mxu0 %v3578_v24  ;;  %v3638_v23 = vld [vmem:[%s4632_s1 + $0x440] sm:$0xff]   ;;  %v2869_v24 = vcombine.high %v22_v19, %v22_v19  ;;  %v3695_v19 = vld [vmem:[%s4632_s1 + $0x5e8] sm:$0xff]  }
  0x4e   :  { %3258 = vmatprep.subr.bf16.mxu1 %v3579_v25  ;;  %v3639_v25 = vld [vmem:[%s4632_s1 + $0x4c0] sm:$0xff]  }
  0x50   :  { %3237 = vmatpush3.bf16.msra.mxu0 %v3580_v26  ;;  %v3640_v26 = vld [vmem:[%s4632_s1 + $0x400] sm:$0xff]  }
  0x51   :  { %3259 = vmatpush3.bf16.msra.mxu1 %v3581_v27  ;;  %3238 = vmatprep.subr.bf16.mxu0 %v3582_v28  ;;  %v3641_v27 = vld [vmem:[%s4632_s1 + $0x480] sm:$0xff]   ;;  %v3642_v28 = vld [vmem:[%s4632_s1 + $0x448] sm:$0xff]  }
  0x52   :  { %3260 = vmatprep.subr.bf16.mxu1 %v3583_v29  ;;  %v3643_v29 = vld [vmem:[%s4632_s1 + $0x4c8] sm:$0xff]  }
  0x54   :  { %3239 = vmatpush3.bf16.msra.mxu0 %v3584_v30  ;;  %v3644_v30 = vld [vmem:[%s4632_s1 + $0x408] sm:$0xff]  }
  0x55   :  { %3261 = vmatpush3.bf16.msra.mxu1 %v3585_v31  ;;  %3240 = vmatprep.subr.bf16.mxu0 %v3586_v32  ;;  %v3645_v31 = vld [vmem:[%s4632_s1 + $0x488] sm:$0xff]   ;;  %v3646_v32 = vld [vmem:[%s4632_s1 + $0x450] sm:$0xff]  }
  0x56   :  { %3262 = vmatprep.subr.bf16.mxu1 %v3587_v33  ;;  %v3647_v33 = vld [vmem:[%s4632_s1 + $0x4d0] sm:$0xff]  }
  0x58   :  { %3241 = vmatpush3.bf16.msra.mxu0 %v3588_v34  ;;  %v3648_v34 = vld [vmem:[%s4632_s1 + $0x410] sm:$0xff]  }
  0x59   :  { %3263 = vmatpush3.bf16.msra.mxu1 %v3589_v35  ;;  %3242 = vmatprep.subr.bf16.mxu0 %v3590_v36  ;;  %v3649_v35 = vld [vmem:[%s4632_s1 + $0x490] sm:$0xff]   ;;  %v3650_v36 = vld [vmem:[%s4632_s1 + $0x458] sm:$0xff]  }
  0x5a   :  { %3264 = vmatprep.subr.bf16.mxu1 %v3591_v37  ;;  %v3651_v37 = vld [vmem:[%s4632_s1 + $0x4d8] sm:$0xff]  }
  0x5c   :  { %3243 = vmatpush3.bf16.msra.mxu0 %v3592_v38  ;;  %v3652_v38 = vld [vmem:[%s4632_s1 + $0x418] sm:$0xff]  }
  0x5d   :  { %3265 = vmatpush3.bf16.msra.mxu1 %v3593_v39  ;;  %3244 = vmatprep.subr.bf16.mxu0 %v3594_v40  ;;  %v3653_v39 = vld [vmem:[%s4632_s1 + $0x498] sm:$0xff]   ;;  %v3654_v40 = vld [vmem:[%s4632_s1 + $0x460] sm:$0xff]  }
  0x5e   :  { %3266 = vmatprep.subr.bf16.mxu1 %v3595_v41  ;;  %v3655_v41 = vld [vmem:[%s4632_s1 + $0x4e0] sm:$0xff]  }
  0x60   :  { %3245 = vmatpush3.bf16.msra.mxu0 %v3596_v42  ;;  %v3656_v42 = vld [vmem:[%s4632_s1 + $0x420] sm:$0xff]  }
  0x61   :  { %3267 = vmatpush3.bf16.msra.mxu1 %v3597_v43  ;;  %3274 = vmatprep.subr.bf16.mxu0 %v3602_v50  ;;  %v3657_v43 = vld [vmem:[%s4632_s1 + $0x4a0] sm:$0xff]   ;;  %v3664_v50 = vld [vmem:[%s4632_s1 + $0x430] sm:$0xff]  }
  0x62   :  { %3296 = vmatprep.subr.bf16.mxu1 %v3603_v51  ;;  %v3665_v51 = vld [vmem:[%s4632_s1 + $0x4b0] sm:$0xff]  }
  0x63   :  { %1574 = vmatmul.mubr.bf16.vlgmr.msra.gmra.mrb[8].mxu0 %v2862_v46  ;;  %v3660_v46 = vld [vmem:[%s4632_s1 + $0x428] sm:$0xff]  }
  0x64   :  { %1614 = vmatmul.mubr.bf16.vlgmr.msra.gmra.mrb[8].mxu1 %v2864_v48  ;;  %3275 = vmatpush3.bf16.msra.mxu0 %v3604_v52  ;;  %v3662_v48 = vld [vmem:[%s4632_s1 + $0x470] sm:$0xff]   ;;  %v3666_v52 = vld [vmem:[%s4632_s1 + $0x478] sm:$0xff]  }
  0x65   :  { %3297 = vmatpush3.bf16.msra.mxu1 %v3605_v53  ;;  %3276 = vmatprep.subr.bf16.mxu0 %v3606_v54  ;;  %v3667_v53 = vld [vmem:[%s4632_s1 + $0x4f8] sm:$0xff]  }
  0x66   :  { %3298 = vmatprep.subr.bf16.mxu1 %v3607_v55  ;;  %1653 = vmatprep.mubr.bf16.mxu0 %v2867_v21  ;;  %v3668_v54 = vld [vmem:[%s4632_s1 + $0x438] sm:$0xff]   ;;  %v3697_v21 = vld [vmem:[%s4632_s1 + $0x5a8] sm:$0xff]  }
  0x67   :  { %1693 = vmatprep.mubr.bf16.mxu1 %v2869_v24  ;;  %v3669_v55 = vld [vmem:[%s4632_s1 + $0x4b8] sm:$0xff]   ;;  %v3700_v24 = vld [vmem:[%s4632_s1 + $0x530] sm:$0xff]  }
  0x68   :  { %3277 = vmatpush3.bf16.msra.mxu0 %v3608_v56  ;;  %v23_v56 = vld [vmem:[%s4633_s0 + $0x40] sm:$0xff] }
  0x69   :  { %3299 = vmatpush3.bf16.msra.mxu1 %v3609_v57  ;;  %3278 = vmatprep.subr.bf16.mxu0 %v3610_v58  ;;  %v2998_v57 = vcombine.low %v23_v56, %v23_v56  ;;  %v2999_v58 = vcombine.high %v23_v56, %v23_v56  ;;  %v3730_v56 = vld [vmem:[%s4632_s1 + $0x668] sm:$0xff]  }
  0x6a   :  { %3300 = vmatprep.subr.bf16.mxu1 %v3611_v59  ;;  %v24_v59 = vld [vmem:[%s4633_s0 + $0x48] sm:$0xff] }
  0x6c   :  { %3279 = vmatpush3.bf16.msra.mxu0 %v3612_v60  ;;  %v3000_v60 = vcombine.low %v24_v59, %v24_v59 }
  0x6d   :  { %3301 = vmatpush3.bf16.msra.mxu1 %v3613_v61  ;;  %3280 = vmatprep.subr.bf16.mxu0 %v3614_v62  ;;  %v3001_v61 = vcombine.high %v24_v59, %v24_v59  ;;  %v3674_v62 = vld [vmem:[%s4632_s1 + $0x540] sm:$0xff]   ;;  %v3733_v59 = vld [vmem:[%s4632_s1 + $0x6a8] sm:$0xff]  }
  0x6e   :  { %3302 = vmatprep.subr.bf16.mxu1 %v3615_v63  ;;  %v3675_v63 = vld [vmem:[%s4632_s1 + $0x5c0] sm:$0xff]  }
  0x70   :  { %3281 = vmatpush3.bf16.msra.mxu0 %v3616_v0  ;;  %v3676_v0 = vld [vmem:[%s4632_s1 + $0x500] sm:$0xff]  }
  0x71   :  { %3303 = vmatpush3.bf16.msra.mxu1 %v3617_v1  ;;  %3282 = vmatprep.subr.bf16.mxu0 %v3618_v2  ;;  %v3677_v1 = vld [vmem:[%s4632_s1 + $0x580] sm:$0xff]   ;;  %v3678_v2 = vld [vmem:[%s4632_s1 + $0x548] sm:$0xff]  }
  0x72   :  { %3304 = vmatprep.subr.bf16.mxu1 %v3619_v3  ;;  %v3679_v3 = vld [vmem:[%s4632_s1 + $0x5c8] sm:$0xff]  }
  0x74   :  { %3283 = vmatpush3.bf16.msra.mxu0 %v3620_v4  ;;  %v3680_v4 = vld [vmem:[%s4632_s1 + $0x508] sm:$0xff]  }
  0x75   :  { %3305 = vmatpush3.bf16.msra.mxu1 %v3621_v5  ;;  %3284 = vmatprep.subr.bf16.mxu0 %v3622_v6  ;;  %v3681_v5 = vld [vmem:[%s4632_s1 + $0x588] sm:$0xff]   ;;  %v3682_v6 = vld [vmem:[%s4632_s1 + $0x550] sm:$0xff]  }
  0x76   :  { %3306 = vmatprep.subr.bf16.mxu1 %v3623_v7  ;;  %v3683_v7 = vld [vmem:[%s4632_s1 + $0x5d0] sm:$0xff]  }
  0x78   :  { %3285 = vmatpush3.bf16.msra.mxu0 %v3624_v8  ;;  %v3684_v8 = vld [vmem:[%s4632_s1 + $0x510] sm:$0xff]  }
  0x79   :  { %3307 = vmatpush3.bf16.msra.mxu1 %v3625_v9  ;;  %3286 = vmatprep.subr.bf16.mxu0 %v3626_v10  ;;  %v3685_v9 = vld [vmem:[%s4632_s1 + $0x590] sm:$0xff]   ;;  %v3686_v10 = vld [vmem:[%s4632_s1 + $0x558] sm:$0xff]  }
  0x7a   :  { %3308 = vmatprep.subr.bf16.mxu1 %v3627_v11  ;;  %v3687_v11 = vld [vmem:[%s4632_s1 + $0x5d8] sm:$0xff]  }
  0x7c   :  { %3287 = vmatpush3.bf16.msra.mxu0 %v3628_v12  ;;  %v3688_v12 = vld [vmem:[%s4632_s1 + $0x518] sm:$0xff]  }
  0x7d   :  { %3309 = vmatpush3.bf16.msra.mxu1 %v3629_v13  ;;  %3288 = vmatprep.subr.bf16.mxu0 %v3630_v14  ;;  %v3689_v13 = vld [vmem:[%s4632_s1 + $0x598] sm:$0xff]   ;;  %v3690_v14 = vld [vmem:[%s4632_s1 + $0x560] sm:$0xff]  }
  0x7e   :  { %3310 = vmatprep.subr.bf16.mxu1 %v3631_v15  ;;  %v3691_v15 = vld [vmem:[%s4632_s1 + $0x5e0] sm:$0xff]  }
  0x80   :  { %3289 = vmatpush3.bf16.msra.mxu0 %v3632_v16  ;;  %v3692_v16 = vld [vmem:[%s4632_s1 + $0x520] sm:$0xff]  }
  0x81   :  { %3311 = vmatpush3.bf16.msra.mxu1 %v3633_v17  ;;  %3318 = vmatprep.subr.bf16.mxu0 %v3638_v23  ;;  %v3693_v17 = vld [vmem:[%s4632_s1 + $0x5a0] sm:$0xff]   ;;  %v3699_v23 = vld [vmem:[%s4632_s1 + $0x5f0] sm:$0xff]  }
  0x82   :  { %3340 = vmatprep.subr.bf16.mxu1 %v3639_v25  ;;  %v3701_v25 = vld [vmem:[%s4632_s1 + $0x5b0] sm:$0xff]  }
  0x83   :  { %1654 = vmatmul.mubr.bf16.vlgmr.msra.gmra.mrb[12].mxu0 %v2866_v20  ;;  %v3696_v20 = vld [vmem:[%s4632_s1 + $0x528] sm:$0xff]  }
  0x84   :  { %1694 = vmatmul.mubr.bf16.vlgmr.msra.gmra.mrb[12].mxu1 %v2868_v22  ;;  %3319 = vmatpush3.bf16.msra.mxu0 %v3640_v26  ;;  %v3698_v22 = vld [vmem:[%s4632_s1 + $0x570] sm:$0xff]   ;;  %v3702_v26 = vld [vmem:[%s4632_s1 + $0x578] sm:$0xff]  }
  0x85   :  { %3341 = vmatpush3.bf16.msra.mxu1 %v3641_v27  ;;  %3320 = vmatprep.subr.bf16.mxu0 %v3642_v28  ;;  %v3703_v27 = vld [vmem:[%s4632_s1 + $0x5f8] sm:$0xff]  }
  0x86   :  { %3342 = vmatprep.subr.bf16.mxu1 %v3643_v29  ;;  %2557 = vmatprep.mubr.bf16.mxu0 %v2999_v58  ;;  %v3704_v28 = vld [vmem:[%s4632_s1 + $0x538] sm:$0xff]   ;;  %v3732_v58 = vld [vmem:[%s4632_s1 + $0x628] sm:$0xff]  }
  0x87   :  { %2597 = vmatprep.mubr.bf16.mxu1 %v3001_v61  ;;  %v3705_v29 = vld [vmem:[%s4632_s1 + $0x5b8] sm:$0xff]   ;;  %v3735_v61 = vld [vmem:[%s4632_s1 + $0x6f0] sm:$0xff]  }
  0x88   :  { %3321 = vmatpush3.bf16.msra.mxu0 %v3644_v30  ;;  %v25_v30 = vld [vmem:[%s4633_s0 + $0x50] sm:$0xff] }
  0x89   :  { %3343 = vmatpush3.bf16.msra.mxu1 %v3645_v31  ;;  %3322 = vmatprep.subr.bf16.mxu0 %v3646_v32  ;;  %v26_v31 = vld [vmem:[%s4633_s0 + $0x58] sm:$0xff]  ;;  %v3002_v32 = vcombine.low %v25_v30, %v25_v30 }
  0x8a   :  { %3344 = vmatprep.subr.bf16.mxu1 %v3647_v33  ;;  %v3003_v33 = vcombine.high %v25_v30, %v25_v30  ;;  %v3765_v30 = vld [vmem:[%s4632_s1 + $0x7a0] sm:$0xff]  }
  0x8c   :  { %3323 = vmatpush3.bf16.msra.mxu0 %v3648_v34  ;;  %v3004_v34 = vcombine.low %v26_v31, %v26_v31 }
  0x8d   :  { %3345 = vmatpush3.bf16.msra.mxu1 %v3649_v35  ;;  %3324 = vmatprep.subr.bf16.mxu0 %v3650_v36  ;;  %v3005_v35 = vcombine.high %v26_v31, %v26_v31  ;;  %v3710_v36 = vld [vmem:[%s4632_s1 + $0x640] sm:$0xff]  }
  0x8e   :  { %3346 = vmatprep.subr.bf16.mxu1 %v3651_v37  ;;  %v3711_v37 = vld [vmem:[%s4632_s1 + $0x6c0] sm:$0xff]  }
  0x90   :  { %3325 = vmatpush3.bf16.msra.mxu0 %v3652_v38  ;;  %v3712_v38 = vld [vmem:[%s4632_s1 + $0x600] sm:$0xff]  }
  0x91   :  { %3347 = vmatpush3.bf16.msra.mxu1 %v3653_v39  ;;  %3326 = vmatprep.subr.bf16.mxu0 %v3654_v40  ;;  %v3713_v39 = vld [vmem:[%s4632_s1 + $0x680] sm:$0xff]   ;;  %v3714_v40 = vld [vmem:[%s4632_s1 + $0x648] sm:$0xff]  }
  0x92   :  { %3348 = vmatprep.subr.bf16.mxu1 %v3655_v41  ;;  %v3715_v41 = vld [vmem:[%s4632_s1 + $0x6c8] sm:$0xff]  }
  0x94   :  { %3327 = vmatpush3.bf16.msra.mxu0 %v3656_v42  ;;  %v3716_v42 = vld [vmem:[%s4632_s1 + $0x608] sm:$0xff]  }
  0x95   :  { %3349 = vmatpush3.bf16.msra.mxu1 %v3657_v43  ;;  %3328 = vmatprep.subr.bf16.mxu0 %v3658_v44  ;;  %v3717_v43 = vld [vmem:[%s4632_s1 + $0x688] sm:$0xff]   ;;  %v3718_v44 = vld [vmem:[%s4632_s1 + $0x650] sm:$0xff]  }
  0x96   :  { %3350 = vmatprep.subr.bf16.mxu1 %v3659_v45  ;;  %v3719_v45 = vld [vmem:[%s4632_s1 + $0x6d0] sm:$0xff]  }
  0x98   :  { %3329 = vmatpush3.bf16.msra.mxu0 %v3660_v46  ;;  %v3720_v46 = vld [vmem:[%s4632_s1 + $0x610] sm:$0xff]  }
  0x99   :  { %3351 = vmatpush3.bf16.msra.mxu1 %v3661_v47  ;;  %3330 = vmatprep.subr.bf16.mxu0 %v3662_v48  ;;  %v3721_v47 = vld [vmem:[%s4632_s1 + $0x690] sm:$0xff]   ;;  %v3722_v48 = vld [vmem:[%s4632_s1 + $0x658] sm:$0xff]  }
  0x9a   :  { %3352 = vmatprep.subr.bf16.mxu1 %v3663_v49  ;;  %v3723_v49 = vld [vmem:[%s4632_s1 + $0x6d8] sm:$0xff]  }
  0x9c   :  { %3331 = vmatpush3.bf16.msra.mxu0 %v3664_v50  ;;  %v3724_v50 = vld [vmem:[%s4632_s1 + $0x618] sm:$0xff]  }
  0x9d   :  { %3353 = vmatpush3.bf16.msra.mxu1 %v3665_v51  ;;  %3332 = vmatprep.subr.bf16.mxu0 %v3666_v52  ;;  %v3725_v51 = vld [vmem:[%s4632_s1 + $0x698] sm:$0xff]   ;;  %v3726_v52 = vld [vmem:[%s4632_s1 + $0x660] sm:$0xff]  }
  0x9e   :  { %3354 = vmatprep.subr.bf16.mxu1 %v3667_v53  ;;  %v3727_v53 = vld [vmem:[%s4632_s1 + $0x6e0] sm:$0xff]  }
  0xa0   :  { %3333 = vmatpush3.bf16.msra.mxu0 %v3668_v54  ;;  %v3728_v54 = vld [vmem:[%s4632_s1 + $0x620] sm:$0xff]  }
  0xa1   :  { %3355 = vmatpush3.bf16.msra.mxu1 %v3669_v55  ;;  %3362 = vmatprep.subr.bf16.mxu0 %v3674_v62  ;;  %v3729_v55 = vld [vmem:[%s4632_s1 + $0x6a0] sm:$0xff]   ;;  %v3736_v62 = vld [vmem:[%s4632_s1 + $0x630] sm:$0xff]  }
  0xa2   :  { %3384 = vmatprep.subr.bf16.mxu1 %v3675_v63  ;;  %v3737_v63 = vld [vmem:[%s4632_s1 + $0x6b0] sm:$0xff]  }
  0xa3   :  { %2558 = vmatmul.mubr.bf16.vlgmr.msra.gmra.mrb[16].mxu0 %v2998_v57  ;;  %v3731_v57 = vld [vmem:[%s4632_s1 + $0x6e8] sm:$0xff]  }
  0xa4   :  { %2598 = vmatmul.mubr.bf16.vlgmr.msra.gmra.mrb[16].mxu1 %v3000_v60  ;;  %3363 = vmatpush3.bf16.msra.mxu0 %v3676_v0  ;;  %v3734_v60 = vld [vmem:[%s4632_s1 + $0x670] sm:$0xff]   ;;  %v3738_v0 = vld [vmem:[%s4632_s1 + $0x678] sm:$0xff]  }
  0xa5   :  { %3385 = vmatpush3.bf16.msra.mxu1 %v3677_v1  ;;  %3364 = vmatprep.subr.bf16.mxu0 %v3678_v2  ;;  %v3739_v1 = vld [vmem:[%s4632_s1 + $0x6f8] sm:$0xff]  }
  0xa6   :  { %3386 = vmatprep.subr.bf16.mxu1 %v3679_v3  ;;  %2637 = vmatprep.mubr.bf16.mxu0 %v3003_v33  ;;  %v3740_v2 = vld [vmem:[%s4632_s1 + $0x638] sm:$0xff]  }
  0xa7   :  { %2677 = vmatprep.mubr.bf16.mxu1 %v3005_v35  ;;  %v3741_v3 = vld [vmem:[%s4632_s1 + $0x6b8] sm:$0xff]  }
  0xa8   :  { %3365 = vmatpush3.bf16.msra.mxu0 %v3680_v4  ;;  %v27_v4 = vld [vmem:[%s4633_s0 + $0x60] sm:$0xff] }
  0xa9   :  { %3387 = vmatpush3.bf16.msra.mxu1 %v3681_v5  ;;  %3366 = vmatprep.subr.bf16.mxu0 %v3682_v6  ;;  %v28_v5 = vld [vmem:[%s4633_s0 + $0x68] sm:$0xff]  ;;  %v3006_v6 = vcombine.low %v27_v4, %v27_v4 }
  0xaa   :  { %3388 = vmatprep.subr.bf16.mxu1 %v3683_v7  ;;  %v3007_v7 = vcombine.high %v27_v4, %v27_v4 }
  0xac   :  { %3367 = vmatpush3.bf16.msra.mxu0 %v3684_v8  ;;  %v3008_v8 = vcombine.low %v28_v5, %v28_v5 }
  0xad   :  { %3389 = vmatpush3.bf16.msra.mxu1 %v3685_v9  ;;  %3368 = vmatprep.subr.bf16.mxu0 %v3686_v10  ;;  %v3746_v9 = vld [vmem:[%s4632_s1 + $0x740] sm:$0xff]   ;;  %v3009_v10 = vcombine.high %v28_v5, %v28_v5 }
  0xae   :  { %3390 = vmatprep.subr.bf16.mxu1 %v3687_v11  ;;  %v3747_v11 = vld [vmem:[%s4632_s1 + $0x7c0] sm:$0xff]  }
  0xb0   :  { %3369 = vmatpush3.bf16.msra.mxu0 %v3688_v12  ;;  %v3748_v12 = vld [vmem:[%s4632_s1 + $0x700] sm:$0xff]  }
  0xb1   :  { %3391 = vmatpush3.bf16.msra.mxu1 %v3689_v13  ;;  %3370 = vmatprep.subr.bf16.mxu0 %v3690_v14  ;;  %v3749_v13 = vld [vmem:[%s4632_s1 + $0x780] sm:$0xff]   ;;  %v3750_v14 = vld [vmem:[%s4632_s1 + $0x748] sm:$0xff]  }
  0xb2   :  { %3392 = vmatprep.subr.bf16.mxu1 %v3691_v15  ;;  %v3751_v15 = vld [vmem:[%s4632_s1 + $0x7c8] sm:$0xff]  }
  0xb4   :  { %3371 = vmatpush3.bf16.msra.mxu0 %v3692_v16  ;;  %v3752_v16 = vld [vmem:[%s4632_s1 + $0x708] sm:$0xff]  }
  0xb5   :  { %3393 = vmatpush3.bf16.msra.mxu1 %v3693_v17  ;;  %3372 = vmatprep.subr.bf16.mxu0 %v3694_v18  ;;  %v3753_v17 = vld [vmem:[%s4632_s1 + $0x788] sm:$0xff]   ;;  %v3754_v18 = vld [vmem:[%s4632_s1 + $0x750] sm:$0xff]  }
  0xb6   :  { %3394 = vmatprep.subr.bf16.mxu1 %v3695_v19  ;;  %v3755_v19 = vld [vmem:[%s4632_s1 + $0x7d0] sm:$0xff]  }
  0xb8   :  { %3373 = vmatpush3.bf16.msra.mxu0 %v3696_v20  ;;  %v3756_v20 = vld [vmem:[%s4632_s1 + $0x710] sm:$0xff]  }
  0xb9   :  { %3395 = vmatpush3.bf16.msra.mxu1 %v3697_v21  ;;  %3374 = vmatprep.subr.bf16.mxu0 %v3698_v22  ;;  %v3757_v21 = vld [vmem:[%s4632_s1 + $0x790] sm:$0xff]   ;;  %v3758_v22 = vld [vmem:[%s4632_s1 + $0x758] sm:$0xff]  }
  0xba   :  { %3396 = vmatprep.subr.bf16.mxu1 %v3699_v23  ;;  %v3759_v23 = vld [vmem:[%s4632_s1 + $0x7d8] sm:$0xff]  }
  0xbc   :  { %3375 = vmatpush3.bf16.msra.mxu0 %v3700_v24  ;;  %v3760_v24 = vld [vmem:[%s4632_s1 + $0x718] sm:$0xff]  }
  0xbd   :  { %3397 = vmatpush3.bf16.msra.mxu1 %v3701_v25  ;;  %3376 = vmatprep.subr.bf16.mxu0 %v3702_v26  ;;  %v3761_v25 = vld [vmem:[%s4632_s1 + $0x798] sm:$0xff]   ;;  %v3762_v26 = vld [vmem:[%s4632_s1 + $0x760] sm:$0xff]  }
  0xbe   :  { %3398 = vmatprep.subr.bf16.mxu1 %v3703_v27  ;;  %v3763_v27 = vld [vmem:[%s4632_s1 + $0x7e0] sm:$0xff]  }
  0xc0   :  { %3377 = vmatpush3.bf16.msra.mxu0 %v3704_v28  ;;  %v3764_v28 = vld [vmem:[%s4632_s1 + $0x720] sm:$0xff]  }
  0xc1   :  { %3399 = vmatpush3.bf16.msra.mxu1 %v3705_v29  ;;  %3406 = vmatprep.subr.bf16.mxu0 %v3710_v36 }
  0xc2   :  { %3428 = vmatprep.subr.bf16.mxu1 %v3711_v37  ;;  %v3766_v37 = vld [vmem:[%s4632_s1 + $0x768] sm:$0xff]  }
  0xc3   :  { %2638 = vmatmul.mubr.bf16.vlgmr.msra.gmra.mrb[20].mxu0 %v3002_v32  ;;  %v2852_v32 = vld [vmem:[%s4634_s2] ss:$0 sm:$0xff] }
  0xc4   :  { %2678 = vmatmul.mubr.bf16.vlgmr.msra.gmra.mrb[20].mxu1 %v3004_v34  ;;  %3407 = vmatpush3.bf16.msra.mxu0 %v3712_v38 }
  0xc5   :  { %3429 = vmatpush3.bf16.msra.mxu1 %v3713_v39  ;;  %3408 = vmatprep.subr.bf16.mxu0 %v3714_v40  ;;  %v3767_v39 = vld [vmem:[%s4632_s1 + $0x7e8] sm:$0xff]  }
  0xc6   :  { %3430 = vmatprep.subr.bf16.mxu1 %v3715_v41  ;;  %2717 = vmatprep.mubr.bf16.mxu0 %v3007_v7 }
  0xc7   :  { %2757 = vmatprep.mubr.bf16.mxu1 %v3009_v10 }
  0xc8   :  { %3409 = vmatpush3.bf16.msra.mxu0 %v3716_v42  ;;  %v3768_v42 = vld [vmem:[%s4632_s1 + $0x728] sm:$0xff]  }
  0xc9   :  { %3431 = vmatpush3.bf16.msra.mxu1 %v3717_v43  ;;  %3410 = vmatprep.subr.bf16.mxu0 %v3718_v44  ;;  %v3769_v44 = vld [vmem:[%s4632_s1 + $0x7a8] sm:$0xff]  }
  0xca   :  { %3432 = vmatprep.subr.bf16.mxu1 %v3719_v45 }
  0xcc   :  { %3411 = vmatpush3.bf16.msra.mxu0 %v3720_v46 }
  0xcd   :  { %3433 = vmatpush3.bf16.msra.mxu1 %v3721_v47  ;;  %3412 = vmatprep.subr.bf16.mxu0 %v3722_v48  ;;  %v3770_v47 = vld [vmem:[%s4632_s1 + $0x770] sm:$0xff]  }
  0xce   :  { %3434 = vmatprep.subr.bf16.mxu1 %v3723_v49  ;;  %v3771_v48 = vld [vmem:[%s4632_s1 + $0x7f0] sm:$0xff]  }
  0xcf   :  { %v3772_v49 = vld [vmem:[%s4632_s1 + $0x730] sm:$0xff]  }
  0xd0   :  { %3413 = vmatpush3.bf16.msra.mxu0 %v3724_v50  ;;  %v3773_v50 = vld [vmem:[%s4632_s1 + $0x7b0] sm:$0xff]  }
  0xd1   :  { %3435 = vmatpush3.bf16.msra.mxu1 %v3725_v51  ;;  %3414 = vmatprep.subr.bf16.mxu0 %v3726_v52  ;;  %v3774_v51 = vld [vmem:[%s4632_s1 + $0x778] sm:$0xff]  }
  0xd2   :  { %3436 = vmatprep.subr.bf16.mxu1 %v3727_v53  ;;  %v3775_v52 = vld [vmem:[%s4632_s1 + $0x7f8] sm:$0xff]  }
  0xd3   :  { %v3776_v53 = vld [vmem:[%s4632_s1 + $0x738] sm:$0xff]  }
  0xd4   :  { %3415 = vmatpush3.bf16.msra.mxu0 %v3728_v54  ;;  %v3777_v54 = vld [vmem:[%s4632_s1 + $0x7b8] sm:$0xff]  }
  0xd5   :  { %3437 = vmatpush3.bf16.msra.mxu1 %v3729_v55  ;;  %3416 = vmatprep.subr.bf16.mxu0 %v3730_v56  ;;  %v29_v55 = vld [vmem:[%s4633_s0 + $0x70] sm:$0xff]  ;;  %v30_v56 = vld [vmem:[%s4633_s0 + $0x78] sm:$0xff] }
  0xd6   :  { %3438 = vmatprep.subr.bf16.mxu1 %v3731_v57  ;;  %v3010_v57 = vcombine.low %v29_v55, %v29_v55 }
  0xd8   :  { %3417 = vmatpush3.bf16.msra.mxu0 %v3732_v58  ;;  %v3011_v58 = vcombine.high %v29_v55, %v29_v55 }
  0xd9   :  { %3439 = vmatpush3.bf16.msra.mxu1 %v3733_v59  ;;  %3418 = vmatprep.subr.bf16.mxu0 %v3734_v60  ;;  %v3012_v59 = vcombine.low %v30_v56, %v30_v56  ;;  %v3013_v60 = vcombine.high %v30_v56, %v30_v56 }
  0xda   :  { %3440 = vmatprep.subr.bf16.mxu1 %v3735_v61 }
  0xdc   :  { %3419 = vmatpush3.bf16.msra.mxu0 %v3736_v62 }
  0xdd   :  { %3441 = vmatpush3.bf16.msra.mxu1 %v3737_v63  ;;  %3420 = vmatprep.subr.bf16.mxu0 %v3738_v0 }
  0xde   :  { %3442 = vmatprep.subr.bf16.mxu1 %v3739_v1 }
  0xe0   :  { %3421 = vmatpush3.bf16.msra.mxu0 %v3740_v2 }
  0xe1   :  { %3443 = vmatpush3.bf16.msra.mxu1 %v3741_v3  ;;  %3450 = vmatprep.subr.bf16.mxu0 %v3746_v9 }
  0xe2   :  { %3472 = vmatprep.subr.bf16.mxu1 %v3747_v11 }
  0xe3   :  { %2718 = vmatmul.mubr.bf16.vlgmr.msra.gmra.mrb[24].mxu0 %v3006_v6 }
  0xe4   :  { %2758 = vmatmul.mubr.bf16.vlgmr.msra.gmra.mrb[24].mxu1 %v3008_v8  ;;  %3451 = vmatpush3.bf16.msra.mxu0 %v3748_v12 }
  0xe5   :  { %3473 = vmatpush3.bf16.msra.mxu1 %v3749_v13  ;;  %3452 = vmatprep.subr.bf16.mxu0 %v3750_v14 }
  0xe6   :  { %3474 = vmatprep.subr.bf16.mxu1 %v3751_v15  ;;  %2797 = vmatprep.mubr.bf16.mxu0 %v3011_v58 }
  0xe7   :  { %2837 = vmatprep.mubr.bf16.mxu1 %v3013_v60 }
  0xe8   :  { %3453 = vmatpush3.bf16.msra.mxu0 %v3752_v16 }
  0xe9   :  { %3475 = vmatpush3.bf16.msra.mxu1 %v3753_v17  ;;  %3454 = vmatprep.subr.bf16.mxu0 %v3754_v18 }
  0xea   :  { %3476 = vmatprep.subr.bf16.mxu1 %v3755_v19 }
  0xec   :  { %3455 = vmatpush3.bf16.msra.mxu0 %v3756_v20 }
  0xed   :  { %3477 = vmatpush3.bf16.msra.mxu1 %v3757_v21  ;;  %3456 = vmatprep.subr.bf16.mxu0 %v3758_v22 }
  0xee   :  { %3478 = vmatprep.subr.bf16.mxu1 %v3759_v23 }
  0xf0   :  { %3457 = vmatpush3.bf16.msra.mxu0 %v3760_v24 }
  0xf1   :  { %3479 = vmatpush3.bf16.msra.mxu1 %v3761_v25  ;;  %3458 = vmatprep.subr.bf16.mxu0 %v3762_v26 }
  0xf2   :  { %3480 = vmatprep.subr.bf16.mxu1 %v3763_v27 }
  0xf4   :  { %3459 = vmatpush3.bf16.msra.mxu0 %v3764_v28 }
  0xf5   :  { %3481 = vmatpush3.bf16.msra.mxu1 %v3765_v30  ;;  %3460 = vmatprep.subr.bf16.mxu0 %v3766_v37 }
  0xf6   :  { %v3158_v29 = vpop.f32.mrb[0].mxu0  ;;  %3482 = vmatprep.subr.bf16.mxu1 %v3767_v39 }
  0xf7   :  { %v3180_v31 = vpop.f32.mrb[0].mxu1  ;;  %v3159_v33 = vpop.f32.mrb[1].mxu0 }
  0xf8   :  { %v3181_v34 = vpop.f32.mrb[1].mxu1  ;;  %v3160_v35 = vadd.f32 %v3159_v33, %v3158_v29  ;;  %v3161_v38 = vpop.f32.mrb[2].mxu0  ;;  %3461 = vmatpush3.bf16.msra.mxu0 %v3768_v42 }
  0xf9   :  { %v3182_v36 = vadd.f32 %v3181_v34, %v3180_v31  ;;  %v3183_v40 = vpop.f32.mrb[2].mxu1  ;;  %v3162_v43 = vpop.f32.mrb[3].mxu0  ;;  %3483 = vmatpush3.bf16.msra.mxu1 %v3769_v44  ;;  %3462 = vmatprep.subr.bf16.mxu0 %v3770_v47 }
  0xfa   :  { %v1416_v41 = vadd.f32 %v3160_v35, %v2852_v32  ;;  %v3184_v45 = vpop.f32.mrb[3].mxu1  ;;  %3484 = vmatprep.subr.bf16.mxu1 %v3771_v48  ;;  %v2853_v35 = vld [vmem:[%s4634_s2 + $0x1] ss:$0 sm:$0xff] }
  0xfc   :  { %v1456_v46 = vadd.f32 %v3182_v36, %v1416_v41  ;;  %3463 = vmatpush3.bf16.msra.mxu0 %v3772_v49 }
  0xfd   :  { %3485 = vmatpush3.bf16.msra.mxu1 %v3773_v50  ;;  %3464 = vmatprep.subr.bf16.mxu0 %v3774_v51 }
  0xfe   :  { %3486 = vmatprep.subr.bf16.mxu1 %v3775_v52 }
 0x100   :  { %3465 = vmatpush3.bf16.msra.mxu0 %v3776_v53 }
 0x101   :  { %3487 = vmatpush3.bf16.msra.mxu1 %v3777_v54 }
 0x103   :  { %2798 = vmatmul.mubr.bf16.vlgmr.msra.gmra.mrb[28].mxu0 %v3010_v57 }
 0x104   :  { %2838 = vmatmul.mubr.bf16.vlgmr.msra.gmra.mrb[28].mxu1 %v3012_v59 }
 0x116   :  { %v3202_v61 = vpop.f32.mrb[4].mxu0 }
 0x117   :  { %v3224_v62 = vpop.f32.mrb[4].mxu1  ;;  %v3203_v63 = vpop.f32.mrb[5].mxu0 }
 0x118   :  { %v3225_v0 = vpop.f32.mrb[5].mxu1  ;;  %v3204_v1 = vadd.f32 %v3203_v63, %v3202_v61  ;;  %v3205_v3 = vpop.f32.mrb[6].mxu0 }
 0x119   :  { %v3226_v2 = vadd.f32 %v3225_v0, %v3224_v62  ;;  %v3227_v4 = vpop.f32.mrb[6].mxu1  ;;  %v3206_v5 = vpop.f32.mrb[7].mxu0 }
 0x11a   :  { %v3228_v6 = vpop.f32.mrb[7].mxu1  ;;  %v1496_v7 = vadd.f32 %v3204_v1, %v1456_v46 }
 0x11c   :  { %v1536_v8 = vadd.f32 %v3226_v2, %v1496_v7 }
 0x136   :  { %v3246_v9 = vpop.f32.mrb[8].mxu0 }
 0x137   :  { %v3268_v10 = vpop.f32.mrb[8].mxu1  ;;  %v3247_v11 = vpop.f32.mrb[9].mxu0 }
 0x138   :  { %v3248_v12 = vadd.f32 %v3247_v11, %v3246_v9  ;;  %v3269_v13 = vpop.f32.mrb[9].mxu1  ;;  %v3249_v14 = vpop.f32.mrb[10].mxu0 }
 0x139   :  { %v3270_v15 = vadd.f32 %v3269_v13, %v3268_v10  ;;  %v3271_v16 = vpop.f32.mrb[10].mxu1  ;;  %v3250_v17 = vpop.f32.mrb[11].mxu0 }
 0x13a   :  { %v1576_v18 = vadd.f32 %v3248_v12, %v1536_v8  ;;  %v3272_v19 = vpop.f32.mrb[11].mxu1 }
 0x13c   :  { %v1616_v20 = vadd.f32 %v3270_v15, %v1576_v18 }
 0x156   :  { %v3290_v21 = vpop.f32.mrb[12].mxu0 }
 0x157   :  { %v3312_v22 = vpop.f32.mrb[12].mxu1  ;;  %v3291_v23 = vpop.f32.mrb[13].mxu0 }
 0x158   :  { %v3292_v24 = vadd.f32 %v3291_v23, %v3290_v21  ;;  %v3313_v25 = vpop.f32.mrb[13].mxu1  ;;  %v3293_v26 = vpop.f32.mrb[14].mxu0 }
 0x159   :  { %v3314_v27 = vadd.f32 %v3313_v25, %v3312_v22  ;;  %v3315_v28 = vpop.f32.mrb[14].mxu1  ;;  %v3294_v29 = vpop.f32.mrb[15].mxu0 }
 0x15a   :  { %v1656_v30 = vadd.f32 %v3292_v24, %v1616_v20  ;;  %v3316_v31 = vpop.f32.mrb[15].mxu1 }
 0x15c   :  { %v1696_v32 = vadd.f32 %v3314_v27, %v1656_v30 }
 0x15e   :  { %2846 = vst.msk [vmem:[%s4635_s3] sm:$0xff] %vm2845_vm0, %v1696_v32 }
 0x176   :  { %v3334_v33 = vpop.f32.mrb[16].mxu0 }
 0x177   :  { %v3356_v34 = vpop.f32.mrb[16].mxu1  ;;  %v3335_v36 = vpop.f32.mrb[17].mxu0 }
 0x178   :  { %v3357_v37 = vpop.f32.mrb[17].mxu1  ;;  %v3336_v38 = vadd.f32 %v3335_v36, %v3334_v33  ;;  %v3337_v40 = vpop.f32.mrb[18].mxu0 }
 0x179   :  { %v3358_v39 = vadd.f32 %v3357_v37, %v3356_v34  ;;  %v3359_v41 = vpop.f32.mrb[18].mxu1  ;;  %v3338_v42 = vpop.f32.mrb[19].mxu0 }
 0x17a   :  { %v3360_v43 = vpop.f32.mrb[19].mxu1  ;;  %v2560_v44 = vadd.f32 %v3336_v38, %v2853_v35 }
 0x17c   :  { %v2600_v45 = vadd.f32 %v3358_v39, %v2560_v44 }
 0x196   :  { %v3378_v46 = vpop.f32.mrb[20].mxu0 }
 0x197   :  { %v3400_v47 = vpop.f32.mrb[20].mxu1  ;;  %v3379_v48 = vpop.f32.mrb[21].mxu0 }
 0x198   :  { %v3380_v49 = vadd.f32 %v3379_v48, %v3378_v46  ;;  %v3401_v50 = vpop.f32.mrb[21].mxu1  ;;  %v3381_v51 = vpop.f32.mrb[22].mxu0 }
 0x199   :  { %v3402_v52 = vadd.f32 %v3401_v50, %v3400_v47  ;;  %v3403_v53 = vpop.f32.mrb[22].mxu1  ;;  %v3382_v54 = vpop.f32.mrb[23].mxu0 }
 0x19a   :  { %v2640_v55 = vadd.f32 %v3380_v49, %v2600_v45  ;;  %v3404_v56 = vpop.f32.mrb[23].mxu1 }
 0x19c   :  { %v2680_v57 = vadd.f32 %v3402_v52, %v2640_v55 }
 0x1b6   :  { %v3422_v58 = vpop.f32.mrb[24].mxu0 }
 0x1b7   :  { %v3444_v59 = vpop.f32.mrb[24].mxu1  ;;  %v3423_v60 = vpop.f32.mrb[25].mxu0 }
 0x1b8   :  { %v3424_v61 = vadd.f32 %v3423_v60, %v3422_v58  ;;  %v3445_v62 = vpop.f32.mrb[25].mxu1  ;;  %v3425_v63 = vpop.f32.mrb[26].mxu0 }
 0x1b9   :  { %v3446_v0 = vadd.f32 %v3445_v62, %v3444_v59  ;;  %v3447_v1 = vpop.f32.mrb[26].mxu1  ;;  %v3426_v2 = vpop.f32.mrb[27].mxu0 }
 0x1ba   :  { %v2720_v3 = vadd.f32 %v3424_v61, %v2680_v57  ;;  %v3448_v4 = vpop.f32.mrb[27].mxu1 }
 0x1bc   :  { %v2760_v5 = vadd.f32 %v3446_v0, %v2720_v3 }
 0x1d6   :  { %v3466_v6 = vpop.f32.mrb[28].mxu0 }
 0x1d7   :  { %v3488_v7 = vpop.f32.mrb[28].mxu1  ;;  %v3467_v8 = vpop.f32.mrb[29].mxu0 }
 0x1d8   :  { %v3468_v9 = vadd.f32 %v3467_v8, %v3466_v6  ;;  %v3489_v10 = vpop.f32.mrb[29].mxu1  ;;  %v3469_v11 = vpop.f32.mrb[30].mxu0 }
 0x1d9   :  { %v3490_v12 = vadd.f32 %v3489_v10, %v3488_v7  ;;  %v3491_v13 = vpop.f32.mrb[30].mxu1  ;;  %v3470_v14 = vpop.f32.mrb[31].mxu0 }
 0x1da   :  { %v2800_v15 = vadd.f32 %v3468_v9, %v2760_v5  ;;  %v3492_v16 = vpop.f32.mrb[31].mxu1 }
 0x1dc   :  { %v2840_v17 = vadd.f32 %v3490_v12, %v2800_v15 }
 0x1de   :  { %2847 = vst.msk [vmem:[%s4635_s3 + $0x8] sm:$0xff] %vm2845_vm0, %v2840_v17 }

</bundles_post_ra>
